<compile_context>
chip_gen: v7x
topology: tpu7x:2x2x1
jax: 0.10.0
libtpu: 0.0.40
codegen_flags: <defaults>
</compile_context>

<pallas_src>
import functools

import jax
import jax.numpy as jnp
from jax.experimental import pallas as pl
from jax.experimental.pallas import tpu as pltpu

LANE = 128
_NEG = -1e30  # finite "-inf" for masked log_softmax lanes


def _round_up(x, m):
    return (x + m - 1) // m * m


def _choose_tiles(n):
    # K (aggregation/reduction) tile: 512 for HBM-streaming efficiency.
    tile_k = 512
    n_pad = _round_up(max(n, 1), tile_k)
    # Row tile: keep >= 2 row tiles so the "parallel" axis can shard across
    # v7x's two TensorCores (neutral on v5e/v6e).  n_pad is a multiple of 512,
    # so both 256 and 512 divide it.
    tile_n = min(512, n_pad // 2)
    return n_pad, tile_n, tile_k


# --------------------------------------------------------------------------
# Kernel: one SAGEConv layer, tiled over (row tiles, adjacency K tiles).
# Optionally fuses the final log_softmax (pad-lane masked) into the epilogue.
# --------------------------------------------------------------------------
def _sage_layer_kernel(a_ref, hsrc_ref, hrow_ref, invdeg_ref, wl_ref, wr_ref,
                       b_ref, out_ref, acc_ref, *,
                       apply_log_softmax, out_valid):
    # a_ref      : (TILE_N, TILE_K) bf16 block of (exact integer) adjacency counts
    # hsrc_ref   : (TILE_K, F_in_pad) bf16 input features (aggregation source)
    # hrow_ref   : (TILE_N, F_in_pad) bf16 input features (self / root term)
    # invdeg_ref : (TILE_N, 1) f32 inverse degree (deferred mean scaling)
    # wl_ref     : (F_in_pad, F_out_pad) f32 neighbor-projection weight
    # wr_ref     : (F_in_pad, F_out_pad) f32 self-projection weight
    # b_ref      : (1, F_out_pad) f32 bias
    # acc_ref    : (TILE_N, F_in_pad) f32 accumulator for A @ h
    k = pl.program_id(1)
    nk = pl.num_programs(1)

    @pl.when(k == 0)
    def _():
        acc_ref[...] = jnp.zeros_like(acc_ref)

    # Neighbor-sum aggregation: bf16 x bf16 MXU matmul, f32 accumulation.
    # (1/deg mean scaling is deferred to the finalize step -> exact.)
    acc_ref[...] += jnp.dot(a_ref[...], hsrc_ref[...],
                            preferred_element_type=jnp.float32)

    @pl.when(k == nk - 1)
    def _():
        agg = acc_ref[...] * invdeg_ref[...]          # exact f32 mean scaling
        hrow = hrow_ref[...].astype(jnp.float32)
        # Two accumulated K=128 MXU passes (no lane-axis concat temp).
        y = jnp.dot(agg, wl_ref[...], preferred_element_type=jnp.float32)
        y = y + jnp.dot(hrow, wr_ref[...], preferred_element_type=jnp.float32)
        y = y + b_ref[...]
        if apply_log_softmax:
            lane = jax.lax.broadcasted_iota(jnp.int32, y.shape, 1)
            valid = lane < out_valid
            z = jnp.where(valid, y, _NEG)
            m = jnp.max(z, axis=1, keepdims=True)
            e = jnp.where(valid, jnp.exp(z - m), 0.0)
            lse = jnp.log(jnp.sum(e, axis=1, keepdims=True))
            y = jnp.where(valid, z - m - lse, 0.0)
        out_ref[...] = y.astype(out_ref.dtype)


def _sage_layer(a_bf16, h_bf16, inv_deg, wl, wr, b, *, tile_n, tile_k,
                f_in_pad, f_out_pad, out_dtype, apply_log_softmax, out_valid):
    n_pad = a_bf16.shape[0]
    grid = (n_pad // tile_n, n_pad // tile_k)
    kernel = functools.partial(_sage_layer_kernel,
                               apply_log_softmax=apply_log_softmax,
                               out_valid=out_valid)
    return pl.pallas_call(
        kernel,
        out_shape=jax.ShapeDtypeStruct((n_pad, f_out_pad), out_dtype),
        grid_spec=pltpu.PrefetchScalarGridSpec(
            num_scalar_prefetch=0,
            grid=grid,
            in_specs=[
                pl.BlockSpec((tile_n, tile_k), lambda i, k: (i, k)),        # A block
                pl.BlockSpec((tile_k, f_in_pad), lambda i, k: (k, 0)),      # h (agg src)
                pl.BlockSpec((tile_n, f_in_pad), lambda i, k: (i, 0)),      # h (self rows)
                pl.BlockSpec((tile_n, 1), lambda i, k: (i, 0)),             # 1/deg
                pl.BlockSpec((f_in_pad, f_out_pad), lambda i, k: (0, 0)),   # W_l
                pl.BlockSpec((f_in_pad, f_out_pad), lambda i, k: (0, 0)),   # W_r
                pl.BlockSpec((1, f_out_pad), lambda i, k: (0, 0)),          # bias
            ],
            out_specs=pl.BlockSpec((tile_n, f_out_pad), lambda i, k: (i, 0)),
            scratch_shapes=[pltpu.VMEM((tile_n, f_in_pad), jnp.float32)],
        ),
        compiler_params=pltpu.CompilerParams(
            dimension_semantics=("parallel", "arbitrary"),
            vmem_limit_bytes=32 * 1024 * 1024,
        ),
    )(a_bf16, h_bf16, h_bf16, inv_deg, wl, wr, b)


# --------------------------------------------------------------------------
# Plain-JAX glue (padding, weight packing, per-layer BN+ReLU hoisted out of
# the tiled loop, graph preparation done ONCE outside the forward).
# --------------------------------------------------------------------------
def _pack_weights(wl, wr, b, f_in_pad, f_out_pad):
    f_in, f_out = wl.shape
    wl_p = jnp.zeros((f_in_pad, f_out_pad), jnp.float32).at[:f_in, :f_out].set(wl)
    wr_p = jnp.zeros((f_in_pad, f_out_pad), jnp.float32).at[:f_in, :f_out].set(wr)
    b_p = jnp.zeros((1, f_out_pad), jnp.float32).at[0, :f_out].set(
        jnp.reshape(b, (-1,)))
    return wl_p, wr_p, b_p


def _bn_relu_bf16(h, n_valid, eps=1e-5):
    # Training-mode BatchNorm batch stats over the REAL node rows, then
    # normalize + ReLU once per layer (hoisted out of the row-tile loop) and
    # emit bf16 for the next layer's HBM feature stream.
    h32 = h.astype(jnp.float32)
    hv = h32[:n_valid]
    mean = jnp.mean(hv, axis=0, keepdims=True)
    var = jnp.mean(jnp.square(hv - mean), axis=0, keepdims=True)
    inv = jax.lax.rsqrt(var + eps)
    return jnp.maximum((h32 - mean) * inv, 0.0).astype(jnp.bfloat16)


def prepare_graph(edge_index, num_nodes):
    # Built ONCE (graph is static): exact small-integer adjacency counts in
    # bf16 (integers <= 256 are exact in bf16) + f32 inverse degree, both
    # padded to the tile size.
    n_pad, tile_n, tile_k = _choose_tiles(num_nodes)
    src, dst = edge_index[0], edge_index[1]
    adj = jnp.zeros((n_pad, n_pad), jnp.float32).at[dst, src].add(1.0)
    deg = jnp.sum(adj, axis=1, keepdims=True)
    inv_deg = 1.0 / jnp.maximum(deg, 1.0)                 # (n_pad, 1) f32
    a_pad = adj.astype(jnp.bfloat16)                       # exact counts
    return a_pad, inv_deg, n_pad, tile_n, tile_k


def graphsage_forward(x, a_pad, inv_deg, params, *, tile_n, tile_k, eps=1e-5):
    (w1l, w1r, b1), (w2l, w2r, b2), (w3l, w3r, b3) = params
    n, f_in = x.shape
    n_pad = a_pad.shape[0]
    h1_dim, h2_dim, out_dim = w1l.shape[1], w2l.shape[1], w3l.shape[1]

    # Pad every feature dim to 128 lanes (lane-dense loads/stores).
    f_in_p = _round_up(f_in, LANE)
    h1_p = _round_up(h1_dim, LANE)
    h2_p = _round_up(h2_dim, LANE)
    out_p = _round_up(out_dim, LANE)

    # bf16 feature stream from the very first layer.
    x_pad = (jnp.zeros((n_pad, f_in_p), jnp.bfloat16)
             .at[:n, :f_in].set(x.astype(jnp.bfloat16)))

    w1l_p, w1r_p, bb1 = _pack_weights(w1l, w1r, b1, f_in_p, h1_p)
    w2l_p, w2r_p, bb2 = _pack_weights(w2l, w2r, b2, h1_p, h2_p)
    w3l_p, w3r_p, bb3 = _pack_weights(w3l, w3r, b3, h2_p, out_p)

    # Layer 1: SAGEConv, bf16 output stream.
    h1 = _sage_layer(a_pad, x_pad, inv_deg, w1l_p, w1r_p, bb1,
                     tile_n=tile_n, tile_k=tile_k,
                     f_in_pad=f_in_p, f_out_pad=h1_p,
                     out_dtype=jnp.bfloat16,
                     apply_log_softmax=False, out_valid=h1_p)
    a1 = _bn_relu_bf16(h1, n, eps)          # BN1 + ReLU hoisted, once per layer

    # Layer 2.
    h2 = _sage_layer(a_pad, a1, inv_deg, w2l_p, w2r_p, bb2,
                     tile_n=tile_n, tile_k=tile_k,
                     f_in_pad=h1_p, f_out_pad=h2_p,
                     out_dtype=jnp.bfloat16,
                     apply_log_softmax=False, out_valid=h2_p)
    a2 = _bn_relu_bf16(h2, n, eps)          # BN2 + ReLU hoisted

    # Layer 3: log_softmax fused into the epilogue (pad lanes masked), f32 out.
    out = _sage_layer(a_pad, a2, inv_deg, w3l_p, w3r_p, bb3,
                      tile_n=tile_n, tile_k=tile_k,
                      f_in_pad=h2_p, f_out_pad=out_p,
                      out_dtype=jnp.float32,
                      apply_log_softmax=True, out_valid=out_dim)
    return out[:n, :out_dim]


# --------------------------------------------------------------------------
# Reference + test harness.
# --------------------------------------------------------------------------
def build_normalized_adjacency(edge_index, num_nodes):
    # Dense row-normalized adjacency (reference only): A[i, j] = count/deg(i).
    src, dst = edge_index[0], edge_index[1]
    adj = jnp.zeros((num_nodes, num_nodes), jnp.float32).at[dst, src].add(1.0)
    deg = jnp.sum(adj, axis=1, keepdims=True)
    return adj / jnp.maximum(deg, 1.0)


def init_sage_params(key, f_in, f_out, scale=0.1):
    k1, k2, k3 = jax.random.split(key, 3)
    wl = scale * jax.random.normal(k1, (f_in, f_out), jnp.float32)
    wr = scale * jax.random.normal(k2, (f_in, f_out), jnp.float32)
    b = scale * jax.random.normal(k3, (1, f_out), jnp.float32)
    return wl, wr, b


def _reference_forward(x, a_norm, params, eps=1e-5):
    # Pure-JAX f32 reference (mirrors the PyTorch module).
    def sage(a, h, wl, wr, b):
        return jnp.dot(jnp.dot(a, h), wl) + jnp.dot(h, wr) + b

    def bn_relu(h):
        m = jnp.mean(h, axis=0, keepdims=True)
        v = jnp.mean((h - m) ** 2, axis=0, keepdims=True)
        return jnp.maximum((h - m) * jax.lax.rsqrt(v + eps), 0.0)

    (w1l, w1r, b1), (w2l, w2r, b2), (w3l, w3r, b3) = params
    h1 = bn_relu(sage(a_norm, x, w1l, w1r, b1))
    h2 = bn_relu(sage(a_norm, h1, w2l, w2r, b2))
    h3 = sage(a_norm, h2, w3l, w3r, b3)
    return jax.nn.log_softmax(h3, axis=1)


if __name__ == "__main__":
    key = jax.random.PRNGKey(0)
    num_nodes = 32
    num_edges = 64
    in_channels = 16
    hidden1 = 32
    hidden2 = 32
    out_channels = 8

    kx, ke, k1, k2, k3 = jax.random.split(key, 5)

    x = jax.random.normal(kx, (num_nodes, in_channels), jnp.float32)
    edge_index = jax.random.randint(ke, (2, num_edges), 0, num_nodes)

    # Graph tensors are static: build the padded bf16 adjacency + inverse
    # degree once, outside the jitted forward.
    a_pad, inv_deg, n_pad, tile_n, tile_k = prepare_graph(edge_index, num_nodes)

    params = (
        init_sage_params(k1, in_channels, hidden1),
        init_sage_params(k2, hidden1, hidden2),
        init_sage_params(k3, hidden2, out_channels),
    )

    fwd = jax.jit(functools.partial(graphsage_forward,
                                    tile_n=tile_n, tile_k=tile_k))
    out = fwd(x, a_pad, inv_deg, params)
    out = jax.block_until_ready(out)

    assert out.shape == (num_nodes, out_channels)
    # log_softmax rows must (exp-)sum to ~1.
    row_sums = jnp.sum(jnp.exp(out), axis=1)
    assert bool(jnp.all(jnp.abs(row_sums - 1.0) < 1e-3))

    # Loose tolerance vs the f32 reference (feature streams are deliberately
    # bf16 per the perf review; adjacency/mean scaling is exact).
    a_norm = build_normalized_adjacency(edge_index, num_nodes)
    ref = _reference_forward(x, a_norm, params)
    assert bool(jnp.max(jnp.abs(out - ref)) < 2e-1)

    print("KERNEL_OK")
</pallas_src>

<mosaic_0001>
module attributes {stable_mosaic.version = 11 : i64} {
  func.func @_sage_layer_kernel(%arg0: i32, %arg1: i32, %arg2: memref<256x512xbf16, #tpu.memory_space<vmem>>, %arg3: memref<512x128xbf16, #tpu.memory_space<vmem>>, %arg4: memref<256x128xbf16, #tpu.memory_space<vmem>>, %arg5: memref<256x1xf32, #tpu.memory_space<vmem>>, %arg6: memref<128x128xf32, #tpu.memory_space<vmem>>, %arg7: memref<128x128xf32, #tpu.memory_space<vmem>>, %arg8: memref<1x128xf32, #tpu.memory_space<vmem>>, %arg9: memref<256x128xbf16, #tpu.memory_space<vmem>>, %arg10: memref<256x128xf32, #tpu.memory_space<vmem>>) attributes {dimension_semantics = [#tpu.dimension_semantics<parallel>, #tpu.dimension_semantics<arbitrary>], iteration_bounds = array<i64: 2, 1>, scalar_prefetch = 0 : i64, scratch_operands = 1 : i64, tpu.core_type = #tpu.core_type<tc>, window_params = [{transform_indices = @transform_0, window_bounds = array<i64: 256, 512>}, {transform_indices = @transform_1, window_bounds = array<i64: 512, 128>}, {transform_indices = @transform_2, window_bounds = array<i64: 256, 128>}, {transform_indices = @transform_3, window_bounds = array<i64: 256, 1>}, {pipeline_mode = #tpu.pipeline_mode<synchronous>, transform_indices = @transform_4, window_bounds = array<i64: 128, 128>}, {pipeline_mode = #tpu.pipeline_mode<synchronous>, transform_indices = @transform_5, window_bounds = array<i64: 128, 128>}, {pipeline_mode = #tpu.pipeline_mode<synchronous>, transform_indices = @transform_6, window_bounds = array<i64: 1, 128>}, {transform_indices = @transform_7, window_bounds = array<i64: 256, 128>}]} {
    %c0_i32 = arith.constant 0 : i32
    %0 = arith.cmpi eq, %arg1, %c0_i32 : i32
    %1 = arith.extui %0 : i1 to i32
    %c0_i32_0 = arith.constant 0 : i32
    %2 = arith.cmpi ne, %1, %c0_i32_0 : i32
    scf.if %2 {
      %cst_10 = arith.constant 0.000000e+00 : f32
      %12 = vector.broadcast %cst_10 : f32 to vector<256x128xf32>
      %c0_11 = arith.constant 0 : index
      %c0_12 = arith.constant 0 : index
      %13 = vector.load %arg10[%c0_11, %c0_12] : memref<256x128xf32, #tpu.memory_space<vmem>>, vector<256x128xf32>
      tpu.vector_store %arg10[%c0_11, %c0_12], %12 {strides = array<i32>} : memref<256x128xf32, #tpu.memory_space<vmem>>, vector<256x128xf32>,
    } else {
    }
    %c0 = arith.constant 0 : index
    %c0_1 = arith.constant 0 : index
    %3 = vector.load %arg10[%c0, %c0_1] : memref<256x128xf32, #tpu.memory_space<vmem>>, vector<256x128xf32>
    %c0_2 = arith.constant 0 : index
    %c0_3 = arith.constant 0 : index
    %4 = vector.load %arg2[%c0_2, %c0_3] : memref<256x512xbf16, #tpu.memory_space<vmem>>, vector<256x512xbf16>
    %c0_4 = arith.constant 0 : index
    %c0_5 = arith.constant 0 : index
    %5 = vector.load %arg3[%c0_4, %c0_5] : memref<512x128xbf16, #tpu.memory_space<vmem>>, vector<512x128xbf16>
    %cst = arith.constant dense<0.000000e+00> : vector<256x128xf32>
    %6 = tpu.matmul %4, %5, %cst {dimension_numbers = #tpu.dot_dimension_numbers<[1], [0], [0], [1], [0, 0, 1, 1], [], []>} : vector<256x512xbf16>, vector<512x128xbf16>, vector<256x128xf32> -> vector<256x128xf32>
    %7 = arith.addf %3, %6 : vector<256x128xf32>
    %c0_6 = arith.constant 0 : index
    %c0_7 = arith.constant 0 : index
    %8 = vector.load %arg10[%c0_6, %c0_7] : memref<256x128xf32, #tpu.memory_space<vmem>>, vector<256x128xf32>
    tpu.vector_store %arg10[%c0_6, %c0_7], %7 {strides = array<i32>} : memref<256x128xf32, #tpu.memory_space<vmem>>, vector<256x128xf32>,
    %c0_i32_8 = arith.constant 0 : i32
    %9 = arith.cmpi eq, %arg1, %c0_i32_8 : i32
    %10 = arith.extui %9 : i1 to i32
    %c0_i32_9 = arith.constant 0 : i32
    %11 = arith.cmpi ne, %10, %c0_i32_9 : i32
    scf.if %11 {
      %c0_10 = arith.constant 0 : index
      %c0_11 = arith.constant 0 : index
      %12 = vector.load %arg10[%c0_10, %c0_11] : memref<256x128xf32, #tpu.memory_space<vmem>>, vector<256x128xf32>
      %c0_12 = arith.constant 0 : index
      %c0_13 = arith.constant 0 : index
      %13 = vector.load %arg5[%c0_12, %c0_13] : memref<256x1xf32, #tpu.memory_space<vmem>>, vector<256x1xf32>
      %14 = vector.broadcast %13 : vector<256x1xf32> to vector<256x128xf32>
      %15 = arith.mulf %12, %14 : vector<256x128xf32>
      %c0_14 = arith.constant 0 : index
      %c0_15 = arith.constant 0 : index
      %16 = vector.load %arg4[%c0_14, %c0_15] : memref<256x128xbf16, #tpu.memory_space<vmem>>, vector<256x128xbf16>
      %17 = arith.extf %16 : vector<256x128xbf16> to vector<256x128xf32>
      %c0_16 = arith.constant 0 : index
      %c0_17 = arith.constant 0 : index
      %18 = vector.load %arg6[%c0_16, %c0_17] : memref<128x128xf32, #tpu.memory_space<vmem>>, vector<128x128xf32>
      %cst_18 = arith.constant dense<0.000000e+00> : vector<256x128xf32>
      %19 = tpu.matmul %15, %18, %cst_18 {dimension_numbers = #tpu.dot_dimension_numbers<[1], [0], [0], [1], [0, 0, 1, 1], [], []>} : vector<256x128xf32>, vector<128x128xf32>, vector<256x128xf32> -> vector<256x128xf32>
      %c0_19 = arith.constant 0 : index
      %c0_20 = arith.constant 0 : index
      %20 = vector.load %arg7[%c0_19, %c0_20] : memref<128x128xf32, #tpu.memory_space<vmem>>, vector<128x128xf32>
      %cst_21 = arith.constant dense<0.000000e+00> : vector<256x128xf32>
      %21 = tpu.matmul %17, %20, %cst_21 {dimension_numbers = #tpu.dot_dimension_numbers<[1], [0], [0], [1], [0, 0, 1, 1], [], []>} : vector<256x128xf32>, vector<128x128xf32>, vector<256x128xf32> -> vector<256x128xf32>
      %22 = arith.addf %19, %21 : vector<256x128xf32>
      %c0_22 = arith.constant 0 : index
      %c0_23 = arith.constant 0 : index
      %23 = vector.load %arg8[%c0_22, %c0_23] : memref<1x128xf32, #tpu.memory_space<vmem>>, vector<1x128xf32>
      %24 = vector.broadcast %23 : vector<1x128xf32> to vector<256x128xf32>
      %25 = arith.addf %22, %24 : vector<256x128xf32>
      %26 = arith.truncf %25 : vector<256x128xf32> to vector<256x128xbf16>
      %c0_24 = arith.constant 0 : index
      %c0_25 = arith.constant 0 : index
      %27 = vector.load %arg9[%c0_24, %c0_25] : memref<256x128xbf16, #tpu.memory_space<vmem>>, vector<256x128xbf16>
      tpu.vector_store %arg9[%c0_24, %c0_25], %26 {strides = array<i32>} : memref<256x128xbf16, #tpu.memory_space<vmem>>, vector<256x128xbf16>,
    } else {
    }
    return
  }
  func.func @transform_0(%arg0: i32, %arg1: i32) -> (i32, i32) {
    %c0_i32 = arith.constant 0 : i32
    return %arg0, %arg1 : i32, i32
  }
  func.func @transform_1(%arg0: i32, %arg1: i32) -> (i32, i32) {
    %c0_i32 = arith.constant 0 : i32
    %c0_i32_0 = arith.constant 0 : i32
    return %arg1, %c0_i32 : i32, i32
  }
  func.func @transform_2(%arg0: i32, %arg1: i32) -> (i32, i32) {
    %c0_i32 = arith.constant 0 : i32
    %c0_i32_0 = arith.constant 0 : i32
    return %arg0, %c0_i32 : i32, i32
  }
  func.func @transform_3(%arg0: i32, %arg1: i32) -> (i32, i32) {
    %c0_i32 = arith.constant 0 : i32
    %c0_i32_0 = arith.constant 0 : i32
    return %arg0, %c0_i32 : i32, i32
  }
  func.func @transform_4(%arg0: i32, %arg1: i32) -> (i32, i32) {
    %c0_i32 = arith.constant 0 : i32
    %c0_i32_0 = arith.constant 0 : i32
    %c0_i32_1 = arith.constant 0 : i32
    return %c0_i32, %c0_i32_0 : i32, i32
  }
  func.func @transform_5(%arg0: i32, %arg1: i32) -> (i32, i32) {
    %c0_i32 = arith.constant 0 : i32
    %c0_i32_0 = arith.constant 0 : i32
    %c0_i32_1 = arith.constant 0 : i32
    return %c0_i32, %c0_i32_0 : i32, i32
  }
  func.func @transform_6(%arg0: i32, %arg1: i32) -> (i32, i32) {
    %c0_i32 = arith.constant 0 : i32
    %c0_i32_0 = arith.constant 0 : i32
    %c0_i32_1 = arith.constant 0 : i32
    return %c0_i32, %c0_i32_0 : i32, i32
  }
  func.func @transform_7(%arg0: i32, %arg1: i32) -> (i32, i32) {
    %c0_i32 = arith.constant 0 : i32
    %c0_i32_0 = arith.constant 0 : i32
    return %arg0, %c0_i32 : i32, i32
  }
}

module attributes {stable_mosaic.version = 11 : i64} {
  func.func @_sage_layer_kernel(%arg0: i32, %arg1: i32, %arg2: memref<256x512xbf16, #tpu.memory_space<vmem>>, %arg3: memref<512x128xbf16, #tpu.memory_space<vmem>>, %arg4: memref<256x128xbf16, #tpu.memory_space<vmem>>, %arg5: memref<256x1xf32, #tpu.memory_space<vmem>>, %arg6: memref<128x128xf32, #tpu.memory_space<vmem>>, %arg7: memref<128x128xf32, #tpu.memory_space<vmem>>, %arg8: memref<1x128xf32, #tpu.memory_space<vmem>>, %arg9: memref<256x128xf32, #tpu.memory_space<vmem>>, %arg10: memref<256x128xf32, #tpu.memory_space<vmem>>) attributes {dimension_semantics = [#tpu.dimension_semantics<parallel>, #tpu.dimension_semantics<arbitrary>], iteration_bounds = array<i64: 2, 1>, scalar_prefetch = 0 : i64, scratch_operands = 1 : i64, tpu.core_type = #tpu.core_type<tc>, window_params = [{transform_indices = @transform_0, window_bounds = array<i64: 256, 512>}, {transform_indices = @transform_1, window_bounds = array<i64: 512, 128>}, {transform_indices = @transform_2, window_bounds = array<i64: 256, 128>}, {transform_indices = @transform_3, window_bounds = array<i64: 256, 1>}, {pipeline_mode = #tpu.pipeline_mode<synchronous>, transform_indices = @transform_4, window_bounds = array<i64: 128, 128>}, {pipeline_mode = #tpu.pipeline_mode<synchronous>, transform_indices = @transform_5, window_bounds = array<i64: 128, 128>}, {pipeline_mode = #tpu.pipeline_mode<synchronous>, transform_indices = @transform_6, window_bounds = array<i64: 1, 128>}, {transform_indices = @transform_7, window_bounds = array<i64: 256, 128>}]} {
    %c0_i32 = arith.constant 0 : i32
    %0 = arith.cmpi eq, %arg1, %c0_i32 : i32
    %1 = arith.extui %0 : i1 to i32
    %c0_i32_0 = arith.constant 0 : i32
    %2 = arith.cmpi ne, %1, %c0_i32_0 : i32
    scf.if %2 {
      %cst_10 = arith.constant 0.000000e+00 : f32
      %12 = vector.broadcast %cst_10 : f32 to vector<256x128xf32>
      %c0_11 = arith.constant 0 : index
      %c0_12 = arith.constant 0 : index
      %13 = vector.load %arg10[%c0_11, %c0_12] : memref<256x128xf32, #tpu.memory_space<vmem>>, vector<256x128xf32>
      tpu.vector_store %arg10[%c0_11, %c0_12], %12 {strides = array<i32>} : memref<256x128xf32, #tpu.memory_space<vmem>>, vector<256x128xf32>,
    } else {
    }
    %c0 = arith.constant 0 : index
    %c0_1 = arith.constant 0 : index
    %3 = vector.load %arg10[%c0, %c0_1] : memref<256x128xf32, #tpu.memory_space<vmem>>, vector<256x128xf32>
    %c0_2 = arith.constant 0 : index
    %c0_3 = arith.constant 0 : index
    %4 = vector.load %arg2[%c0_2, %c0_3] : memref<256x512xbf16, #tpu.memory_space<vmem>>, vector<256x512xbf16>
    %c0_4 = arith.constant 0 : index
    %c0_5 = arith.constant 0 : index
    %5 = vector.load %arg3[%c0_4, %c0_5] : memref<512x128xbf16, #tpu.memory_space<vmem>>, vector<512x128xbf16>
    %cst = arith.constant dense<0.000000e+00> : vector<256x128xf32>
    %6 = tpu.matmul %4, %5, %cst {dimension_numbers = #tpu.dot_dimension_numbers<[1], [0], [0], [1], [0, 0, 1, 1], [], []>} : vector<256x512xbf16>, vector<512x128xbf16>, vector<256x128xf32> -> vector<256x128xf32>
    %7 = arith.addf %3, %6 : vector<256x128xf32>
    %c0_6 = arith.constant 0 : index
    %c0_7 = arith.constant 0 : index
    %8 = vector.load %arg10[%c0_6, %c0_7] : memref<256x128xf32, #tpu.memory_space<vmem>>, vector<256x128xf32>
    tpu.vector_store %arg10[%c0_6, %c0_7], %7 {strides = array<i32>} : memref<256x128xf32, #tpu.memory_space<vmem>>, vector<256x128xf32>,
    %c0_i32_8 = arith.constant 0 : i32
    %9 = arith.cmpi eq, %arg1, %c0_i32_8 : i32
    %10 = arith.extui %9 : i1 to i32
    %c0_i32_9 = arith.constant 0 : i32
    %11 = arith.cmpi ne, %10, %c0_i32_9 : i32
    scf.if %11 {
      %c0_10 = arith.constant 0 : index
      %c0_11 = arith.constant 0 : index
      %12 = vector.load %arg10[%c0_10, %c0_11] : memref<256x128xf32, #tpu.memory_space<vmem>>, vector<256x128xf32>
      %c0_12 = arith.constant 0 : index
      %c0_13 = arith.constant 0 : index
      %13 = vector.load %arg5[%c0_12, %c0_13] : memref<256x1xf32, #tpu.memory_space<vmem>>, vector<256x1xf32>
      %14 = vector.broadcast %13 : vector<256x1xf32> to vector<256x128xf32>
      %15 = arith.mulf %12, %14 : vector<256x128xf32>
      %c0_14 = arith.constant 0 : index
      %c0_15 = arith.constant 0 : index
      %16 = vector.load %arg4[%c0_14, %c0_15] : memref<256x128xbf16, #tpu.memory_space<vmem>>, vector<256x128xbf16>
      %17 = arith.extf %16 : vector<256x128xbf16> to vector<256x128xf32>
      %c0_16 = arith.constant 0 : index
      %c0_17 = arith.constant 0 : index
      %18 = vector.load %arg6[%c0_16, %c0_17] : memref<128x128xf32, #tpu.memory_space<vmem>>, vector<128x128xf32>
      %cst_18 = arith.constant dense<0.000000e+00> : vector<256x128xf32>
      %19 = tpu.matmul %15, %18, %cst_18 {dimension_numbers = #tpu.dot_dimension_numbers<[1], [0], [0], [1], [0, 0, 1, 1], [], []>} : vector<256x128xf32>, vector<128x128xf32>, vector<256x128xf32> -> vector<256x128xf32>
      %c0_19 = arith.constant 0 : index
      %c0_20 = arith.constant 0 : index
      %20 = vector.load %arg7[%c0_19, %c0_20] : memref<128x128xf32, #tpu.memory_space<vmem>>, vector<128x128xf32>
      %cst_21 = arith.constant dense<0.000000e+00> : vector<256x128xf32>
      %21 = tpu.matmul %17, %20, %cst_21 {dimension_numbers = #tpu.dot_dimension_numbers<[1], [0], [0], [1], [0, 0, 1, 1], [], []>} : vector<256x128xf32>, vector<128x128xf32>, vector<256x128xf32> -> vector<256x128xf32>
      %22 = arith.addf %19, %21 : vector<256x128xf32>
      %c0_22 = arith.constant 0 : index
      %c0_23 = arith.constant 0 : index
      %23 = vector.load %arg8[%c0_22, %c0_23] : memref<1x128xf32, #tpu.memory_space<vmem>>, vector<1x128xf32>
      %24 = vector.broadcast %23 : vector<1x128xf32> to vector<256x128xf32>
      %25 = arith.addf %22, %24 : vector<256x128xf32>
      %26 = tpu.iota {dimensions = array<i32: 1>} : vector<256x128xi32>
      %c8_i32 = arith.constant 8 : i32
      %27 = vector.broadcast %c8_i32 : i32 to vector<256x128xi32>
      %28 = arith.cmpi slt, %26, %27 : vector<256x128xi32>
      %cst_24 = arith.constant -1.000000e+30 : f32
      %29 = vector.broadcast %cst_24 : f32 to vector<256x128xf32>
      %30 = arith.select %28, %25, %29 : vector<256x128xi1>, vector<256x128xf32>
      %cst_25 = arith.constant dense<0xFF800000> : vector<256xf32>
      %31 = vector.multi_reduction <maximumf>, %30, %cst_25 [1] : vector<256x128xf32> to vector<256xf32>
      %32 = vector.shape_cast %31 : vector<256xf32> to vector<256x1xf32>
      %33 = vector.broadcast %32 : vector<256x1xf32> to vector<256x128xf32>
      %34 = arith.subf %30, %33 : vector<256x128xf32>
      %35 = math.exp %34 : vector<256x128xf32>
      %cst_26 = arith.constant 0.000000e+00 : f32
      %36 = vector.broadcast %cst_26 : f32 to vector<256x128xf32>
      %37 = arith.select %28, %35, %36 : vector<256x128xi1>, vector<256x128xf32>
      %cst_27 = arith.constant dense<0.000000e+00> : vector<256xf32>
      %38 = vector.multi_reduction <add>, %37, %cst_27 [1] : vector<256x128xf32> to vector<256xf32>
      %39 = vector.shape_cast %38 : vector<256xf32> to vector<256x1xf32>
      %40 = math.log %39 : vector<256x1xf32>
      %41 = vector.broadcast %32 : vector<256x1xf32> to vector<256x128xf32>
      %42 = arith.subf %30, %41 : vector<256x128xf32>
      %43 = vector.broadcast %40 : vector<256x1xf32> to vector<256x128xf32>
      %44 = arith.subf %42, %43 : vector<256x128xf32>
      %cst_28 = arith.constant 0.000000e+00 : f32
      %45 = vector.broadcast %cst_28 : f32 to vector<256x128xf32>
      %46 = arith.select %28, %44, %45 : vector<256x128xi1>, vector<256x128xf32>
      %c0_29 = arith.constant 0 : index
      %c0_30 = arith.constant 0 : index
      %47 = vector.load %arg9[%c0_29, %c0_30] : memref<256x128xf32, #tpu.memory_space<vmem>>, vector<256x128xf32>
      tpu.vector_store %arg9[%c0_29, %c0_30], %46 {strides = array<i32>} : memref<256x128xf32, #tpu.memory_space<vmem>>, vector<256x128xf32>,
    } else {
    }
    return
  }
  func.func @transform_0(%arg0: i32, %arg1: i32) -> (i32, i32) {
    %c0_i32 = arith.constant 0 : i32
    return %arg0, %arg1 : i32, i32
  }
  func.func @transform_1(%arg0: i32, %arg1: i32) -> (i32, i32) {
    %c0_i32 = arith.constant 0 : i32
    %c0_i32_0 = arith.constant 0 : i32
    return %arg1, %c0_i32 : i32, i32
  }
  func.func @transform_2(%arg0: i32, %arg1: i32) -> (i32, i32) {
    %c0_i32 = arith.constant 0 : i32
    %c0_i32_0 = arith.constant 0 : i32
    return %arg0, %c0_i32 : i32, i32
  }
  func.func @transform_3(%arg0: i32, %arg1: i32) -> (i32, i32) {
    %c0_i32 = arith.constant 0 : i32
    %c0_i32_0 = arith.constant 0 : i32
    return %arg0, %c0_i32 : i32, i32
  }
  func.func @transform_4(%arg0: i32, %arg1: i32) -> (i32, i32) {
    %c0_i32 = arith.constant 0 : i32
    %c0_i32_0 = arith.constant 0 : i32
    %c0_i32_1 = arith.constant 0 : i32
    return %c0_i32, %c0_i32_0 : i32, i32
  }
  func.func @transform_5(%arg0: i32, %arg1: i32) -> (i32, i32) {
    %c0_i32 = arith.constant 0 : i32
    %c0_i32_0 = arith.constant 0 : i32
    %c0_i32_1 = arith.constant 0 : i32
    return %c0_i32, %c0_i32_0 : i32, i32
  }
  func.func @transform_6(%arg0: i32, %arg1: i32) -> (i32, i32) {
    %c0_i32 = arith.constant 0 : i32
    %c0_i32_0 = arith.constant 0 : i32
    %c0_i32_1 = arith.constant 0 : i32
    return %c0_i32, %c0_i32_0 : i32, i32
  }
  func.func @transform_7(%arg0: i32, %arg1: i32) -> (i32, i32) {
    %c0_i32 = arith.constant 0 : i32
    %c0_i32_0 = arith.constant 0 : i32
    return %arg0, %c0_i32 : i32, i32
  }
}

</mosaic_0001>

<bundles_post_ra>
// kernel: graphsage_forward.3
= control target key start
LH: loop header
LB: loop body
LE: loop exit
PB: predicated region body
PF: predicated region fallthrough
CT: control target
= control target key end

     0   :  { %s3753_s24 = smov 0   ;;  %s3755_s25 = smov 0   ;;  %s4262_s0 = inlined_call_operand.vmem [shape: bf16[512,512], index: 0, kind: input, shape index: {}]   ;;  %s4263_s1 = inlined_call_operand.vmem [shape: bf16[512,128], index: 1, kind: input, shape index: {}, may-alias: {1,2}]   ;;  %s4264_s2 = inlined_call_operand.vmem [shape: bf16[512,128], index: 2, kind: input, shape index: {}, may-alias: {1,2}]   ;;  %s4265_s3 = inlined_call_operand.vmem [shape: f32[512,1], index: 3, kind: input, shape index: {}]   ;;  %s4266_s4 = inlined_call_operand.vmem [shape: f32[128,128], index: 4, kind: input, shape index: {}]   ;;  %s4267_s5 = inlined_call_operand.vmem [shape: f32[128,128], index: 5, kind: input, shape index: {}]   ;;  %s4268_s6 = inlined_call_operand.vmem [shape: f32[1,128], index: 6, kind: input, shape index: {}]   ;;  %s4269_s7 = inlined_call_operand.vmem [shape: bf16[512,128], index: 7, kind: output, shape index: {}]  }
   0x1   :  { %s3757_s26 = smov 0  }
   0x2 LB: > { %s29_s27 = sadd.s32 1, %s3706_s25  ;;  %p2593_p0 = scmp.ge.s32.totalorder %s3710_s26, 1  ;;  %s3710_s26 = sphi %s3757_s26, %s17_s26   ;;  %s3706_s25 = sphi %s3755_s25, %s4271_s25   ;;  %s3702_s24 = sphi %s3753_s24, %s4270_s24  }
   0x3   : > { %p31_p1 = scmp.ge.s32.totalorder %s29_s27, 2  ;;  %p291_p2 = scmp.lt.s32.totalorder %s3710_s26, 3 }
   0x5   : > { %s4273_s27 = smov (%p31_p1, %s29_s27), 0  ;;  %p292_p3 = pnand %p2593_p0, %p291_p2 }
   0x6   : > { %v3560_v0 = vld [vmem:[%s4263_s1 + $0x40] sm:$0xff] (!%p292_p3)   ;;  %s2594_s30 = sshll.u32 (!%p292_p3), %s3702_s24, 5  ;;  %v3562_v2 = vld [vmem:[%s4263_s1 + $0x48] sm:$0xff] (!%p292_p3)   ;;  %v3564_v4 = vld [vmem:[%s4263_s1 + $0x50] sm:$0xff] (!%p292_p3)   ;;  %v3712_v41 = vmov (!%p292_p3), 0  }
   0x7   : > { %295 = sbr.rel (%p292_p3) target bundleno = 662 (0x296), region = 48  ;;  %v3561_v1 = vld [vmem:[%s4263_s1] sm:$0xff] (!%p292_p3)   ;;  %3485 = vmatprep.subr.bf16.mxu1 (!%p292_p3), %v3560_v0  ;;  %2941 = vmatprep.subr.bf16.mxu0 (!%p292_p3), %v3560_v0  ;;  %v3563_v3 = vld [vmem:[%s4263_s1 + $0x8] sm:$0xff] (!%p292_p3)   ;;  %p345_p4 = scmp.lt.s32.totalorder (!%p292_p3), %s2594_s30, 63  ;;  %v3565_v5 = vld [vmem:[%s4263_s1 + $0x10] sm:$0xff] (!%p292_p3)  }
   0x8   : > { %3493 = vmatpush3.bf16.msra.mxu1 (!%p292_p3), %v3561_v1  ;;  %2942 = vmatpush3.bf16.msra.mxu0 (!%p292_p3), %v3561_v1  ;;  %v3566_v6 = vld [vmem:[%s4263_s1 + $0x58] sm:$0xff] (!%p292_p3)   ;;  %v3568_v8 = vld [vmem:[%s4263_s1 + $0x60] sm:$0xff] (!%p292_p3)   ;;  %v3570_v10 = vld [vmem:[%s4263_s1 + $0x68] sm:$0xff] (!%p292_p3)  }
   0x9   : > { %3486 = vmatprep.subr.bf16.mxu1 (!%p292_p3), %v3562_v2  ;;  %2943 = vmatprep.subr.bf16.mxu0 (!%p292_p3), %v3562_v2  ;;  %v3567_v7 = vld [vmem:[%s4263_s1 + $0x18] sm:$0xff] (!%p292_p3)   ;;  %v3569_v9 = vld [vmem:[%s4263_s1 + $0x20] sm:$0xff] (!%p292_p3)   ;;  %v3571_v12 = vld [vmem:[%s4263_s1 + $0x28] sm:$0xff] (!%p292_p3)  }
   0xa   : > { %v3572_v13 = vld [vmem:[%s4263_s1 + $0x70] sm:$0xff] (!%p292_p3)   ;;  %v3574_v15 = vld [vmem:[%s4263_s1 + $0x78] sm:$0xff] (!%p292_p3)   ;;  %v3579_v17 = vld [vmem:[%s4263_s1 + $0xc0] sm:$0xff] (!%p292_p3)   ;;  %3558 = vset.pattern.permute.xlu0 (!%p292_p3), %v3712_v41  ;;  %3559 = vset.pattern.permute.xlu1 (!%p292_p3), %v3712_v41 }
   0xb   : > { %v3573_v14 = vld [vmem:[%s4263_s1 + $0x30] sm:$0xff] (!%p292_p3)   ;;  %v3575_v16 = vld [vmem:[%s4263_s1 + $0x38] sm:$0xff] (!%p292_p3)   ;;  %v3580_v19 = vld [vmem:[%s4263_s1 + $0x80] sm:$0xff] (!%p292_p3)  }
   0xc   : > { %3494 = vmatpush3.bf16.msra.mxu1 (!%p292_p3), %v3563_v3  ;;  %2944 = vmatpush3.bf16.msra.mxu0 (!%p292_p3), %v3563_v3  ;;  %v3584_v21 = vld [vmem:[%s4263_s1 + $0xc8] sm:$0xff] (!%p292_p3)   ;;  %v3589_v23 = vld [vmem:[%s4263_s1 + $0xd0] sm:$0xff] (!%p292_p3)   ;;  %v3594_v27 = vld [vmem:[%s4263_s1 + $0xd8] sm:$0xff] (!%p292_p3)  }
   0xd   : > { %3487 = vmatprep.subr.bf16.mxu1 (!%p292_p3), %v3564_v4  ;;  %2945 = vmatprep.subr.bf16.mxu0 (!%p292_p3), %v3564_v4  ;;  %v3585_v22 = vld [vmem:[%s4263_s1 + $0x88] sm:$0xff] (!%p292_p3)   ;;  %v3590_v26 = vld [vmem:[%s4263_s1 + $0x90] sm:$0xff] (!%p292_p3)   ;;  %v3595_v28 = vld [vmem:[%s4263_s1 + $0x98] sm:$0xff] (!%p292_p3)  }
   0xe   : > { %s4275_s30 = smov (!%p345_p4, %s2594_s30), 63  ;;  %v3599_v31 = vld [vmem:[%s4263_s1 + $0xe0] sm:$0xff]   ;;  %v3604_v36 = vld [vmem:[%s4263_s1 + $0xe8] sm:$0xff]   ;;  %v3609_v40 = vld [vmem:[%s4263_s1 + $0xf0] sm:$0xff]  }
   0xf   : > { %s2734_s22 = sshll.u32 %s4275_s30, 4  ;;  %v3600_v35 = vld [vmem:[%s4263_s1 + $0xa0] sm:$0xff]   ;;  %v3605_v37 = vld [vmem:[%s4263_s1 + $0xa8] sm:$0xff]   ;;  %v3610_v44 = vld [vmem:[%s4263_s1 + $0xb0] sm:$0xff]   ;;  %s2600_s19 = sshll.u32 %s4275_s30, 3 }
  0x10   : > { %3495 = vmatpush3.bf16.msra.mxu1 %v3565_v5  ;;  %2946 = vmatpush3.bf16.msra.mxu0 %v3565_v5  ;;  %s3804_s8 = scalar_lea.vmem %s4262_s0, %s2734_s22  ;;  %v3614_v45 = vld [vmem:[%s4263_s1 + $0xf8] sm:$0xff]   ;;  %s3897_s22 = scalar_lea.vmem %s4265_s3, %s2600_s19 }
  0x11   : > { %3488 = vmatprep.subr.bf16.mxu1 %v3566_v6  ;;  %2947 = vmatprep.subr.bf16.mxu0 %v3566_v6  ;;  %v3578_v11 = vld [vmem:[%s3804_s8 + $0x104] ss:$16 sps:$4 sm:$0xff]   ;;  %v3576_v18 = vld [vmem:[%s3804_s8 + $0x100] ss:$16 sps:$4 sm:$0xff]   ;;  %v3615_v46 = vld [vmem:[%s4263_s1 + $0xb8] sm:$0xff]   ;;  %s2598_s20 = sshll.u32 %s4275_s30, 2 }
  0x12   : > { %1184 = vmatprep.mubr.bf16.mxu1 %v3578_v11  ;;  %v3581_v20 = vld [vmem:[%s3804_s8 + $0x124] ss:$16 sps:$4 sm:$0xff]   ;;  %v3583_v24 = vld [vmem:[%s3804_s8 + $0x120] ss:$16 sps:$4 sm:$0xff]   ;;  %v1510_v55 = vld [vmem:[%s3897_s22 + $0x8] sm:$0xff]  ;;  %s4005_s24 = scalar_lea.vmem %s4264_s2, %s2598_s20  ;;  %s4205_s29 = scalar_lea.vmem %s4269_s7, %s2598_s20 }
  0x13   : > { %v3586_v25 = vld [vmem:[%s3804_s8 + $0x144] ss:$16 sps:$4 sm:$0xff]   ;;  %v3616_v29 = vld [vmem:[%s3804_s8] ss:$16 sps:$4 sm:$0xff]   ;;  %v1512_v58 = vld [vmem:[%s3897_s22 + $0x18] sm:$0xff] }
  0x14   : > { %3496 = vmatpush3.bf16.msra.mxu1 %v3567_v7  ;;  %2948 = vmatpush3.bf16.msra.mxu0 %v3567_v7  ;;  %v3618_v30 = vld [vmem:[%s3804_s8 + $0x4] ss:$16 sps:$4 sm:$0xff]   ;;  %v3588_v32 = vld [vmem:[%s3804_s8 + $0x140] ss:$16 sps:$4 sm:$0xff]   ;;  %v1514_v62 = vld [vmem:[%s3897_s22 + $0x28] sm:$0xff] }
  0x15   : > { %3489 = vmatprep.subr.bf16.mxu1 %v3568_v8  ;;  %2949 = vmatprep.subr.bf16.mxu0 %v3568_v8  ;;  %v3622_v33 = vld [vmem:[%s3804_s8 + $0x24] ss:$16 sps:$4 sm:$0xff]   ;;  %v3626_v38 = vld [vmem:[%s3804_s8 + $0x20] ss:$16 sps:$4 sm:$0xff]   ;;  %v1516_v2 = vld [vmem:[%s3897_s22 + $0x38] sm:$0xff] }
  0x16   : > { %1120 = vmatprep.mubr.bf16.mxu0 %v3618_v30  ;;  %v3591_v34 = vld [vmem:[%s3804_s8 + $0x164] ss:$16 sps:$4 sm:$0xff]   ;;  %v3593_v42 = vld [vmem:[%s3804_s8 + $0x160] ss:$16 sps:$4 sm:$0xff]   ;;  %v1518_v6 = vld [vmem:[%s3897_s22 + $0x48] sm:$0xff] }
  0x17   : > { %v3628_v39 = vld [vmem:[%s3804_s8 + $0x44] ss:$16 sps:$4 sm:$0xff]   ;;  %v3632_v47 = vld [vmem:[%s3804_s8 + $0x40] ss:$16 sps:$4 sm:$0xff]  }
  0x18   : > { %3497 = vmatpush3.bf16.msra.mxu1 %v3569_v9  ;;  %2950 = vmatpush3.bf16.msra.mxu0 %v3569_v9  ;;  %v3596_v43 = vld [vmem:[%s3804_s8 + $0x184] ss:$16 sps:$4 sm:$0xff]   ;;  %v3598_v49 = vld [vmem:[%s3804_s8 + $0x180] ss:$16 sps:$4 sm:$0xff]   ;;  %v3621_v9 = vld [vmem:[%s3804_s8 + $0xc] ss:$16 sps:$4 sm:$0xff]  }
  0x19   : > { %3490 = vmatprep.subr.bf16.mxu1 %v3570_v10  ;;  %2951 = vmatprep.subr.bf16.mxu0 %v3570_v10  ;;  %v3634_v48 = vld [vmem:[%s3804_s8 + $0x64] ss:$16 sps:$4 sm:$0xff]   ;;  %v3638_v51 = vld [vmem:[%s3804_s8 + $0x60] ss:$16 sps:$4 sm:$0xff]   ;;  %v1520_v10 = vld [vmem:[%s3897_s22 + $0x58] sm:$0xff] }
  0x1a   : > { %v3601_v50 = vld [vmem:[%s3804_s8 + $0x1a4] ss:$16 sps:$4 sm:$0xff]   ;;  %v3603_v54 = vld [vmem:[%s3804_s8 + $0x1a0] ss:$16 sps:$4 sm:$0xff]  }
  0x1b   : > { %v3640_v52 = vld [vmem:[%s3804_s8 + $0x84] ss:$16 sps:$4 sm:$0xff]   ;;  %v3644_v59 = vld [vmem:[%s3804_s8 + $0x80] ss:$16 sps:$4 sm:$0xff]  }
  0x1c   : > { %3498 = vmatpush3.bf16.msra.mxu1 %v3571_v12  ;;  %2952 = vmatpush3.bf16.msra.mxu0 %v3571_v12  ;;  %v1509_v53 = vld [vmem:[%s3897_s22] sm:$0xff]  ;;  %v1511_v56 = vld [vmem:[%s3897_s22 + $0x10] sm:$0xff] }
  0x1d   : > { %3491 = vmatprep.subr.bf16.mxu1 %v3572_v13  ;;  %2953 = vmatprep.subr.bf16.mxu0 %v3572_v13  ;;  %v3606_v57 = vld [vmem:[%s3804_s8 + $0x1c4] ss:$16 sps:$4 sm:$0xff]   ;;  %v3608_v63 = vld [vmem:[%s3804_s8 + $0x1c0] ss:$16 sps:$4 sm:$0xff]  }
  0x1e   : > { %1543 = vperm.xlu0 %3558, %v1509_v53   ;;  %1553 = vperm.xlu1 %3559, %v1511_v56   ;;  %v1513_v60 = vld [vmem:[%s3897_s22 + $0x20] sm:$0xff]  ;;  %v1515_v0 = vld [vmem:[%s3897_s22 + $0x30] sm:$0xff]  ;;  %v1826_v53 = vld [vmem:[%s4267_s5 + $0x68] sm:$0xff] }
  0x1f   : > { %v3646_v61 = vld [vmem:[%s3804_s8 + $0xa4] ss:$16 sps:$4 sm:$0xff]   ;;  %v3650_v3 = vld [vmem:[%s3804_s8 + $0xa0] ss:$16 sps:$4 sm:$0xff]  }
  0x20   : > { %3499 = vmatpush3.bf16.msra.mxu1 %v3573_v14  ;;  %2954 = vmatpush3.bf16.msra.mxu0 %v3573_v14  ;;  %v3611_v1 = vld [vmem:[%s3804_s8 + $0x1e4] ss:$16 sps:$4 sm:$0xff]   ;;  %v3613_v7 = vld [vmem:[%s3804_s8 + $0x1e0] ss:$16 sps:$4 sm:$0xff]  }
  0x21   : > { %3492 = vmatprep.subr.bf16.mxu1 %v3574_v15  ;;  %2955 = vmatprep.subr.bf16.mxu0 %v3574_v15  ;;  %v1517_v4 = vld [vmem:[%s3897_s22 + $0x40] sm:$0xff]  ;;  %v1519_v8 = vld [vmem:[%s3897_s22 + $0x50] sm:$0xff]  ;;  %v1814_v15 = vld [vmem:[%s4267_s5 + $0x8] sm:$0xff] }
  0x22   : > { %1548 = vperm.xlu0 %3558, %v1510_v55   ;;  %1558 = vperm.xlu1 %3559, %v1512_v58   ;;  %v3652_v5 = vld [vmem:[%s3804_s8 + $0xc4] ss:$16 sps:$4 sm:$0xff]   ;;  %v3656_v11 = vld [vmem:[%s3804_s8 + $0xc0] ss:$16 sps:$4 sm:$0xff]   ;;  %v1536_v58 = vld [vmem:[%s3897_s22 + $0xd8] sm:$0xff] }
  0x23   : > { %v1521_v12 = vld [vmem:[%s3897_s22 + $0x60] sm:$0xff]  ;;  %v1819_v30 = vld [vmem:[%s4267_s5 + $0x30] sm:$0xff] }
  0x24   : > { %3500 = vmatpush3.bf16.msra.mxu1 %v3575_v16  ;;  %2956 = vmatpush3.bf16.msra.mxu0 %v3575_v16  ;;  %v1813_v13 = vld [vmem:[%s4267_s5] sm:$0xff]  ;;  %v1522_v16 = vld [vmem:[%s3897_s22 + $0x68] sm:$0xff]  ;;  %v1535_v55 = vld [vmem:[%s3897_s22 + $0xd0] sm:$0xff] }
  0x25   : > { %3053 = vmatprep.subr.bf16.mxu1 %v3579_v17  ;;  %v3658_v14 = vld [vmem:[%s3804_s8 + $0xe4] ss:$16 sps:$4 sm:$0xff]   ;;  %v3421_v17 = vpack.c.bf16 %v1814_v15, %v1813_v13  ;;  %v3651_v13 = vld [vmem:[%s3804_s8 + $0xa8] ss:$16 sps:$4 sm:$0xff]  }
  0x26   : > { %1563 = vperm.xlu0 %3558, %v1513_v60   ;;  %1568 = vperm.xlu1 %3559, %v1514_v62   ;;  %v1529_v41 = vld [vmem:[%s3897_s22 + $0xa0] sm:$0xff]  ;;  %v1828_v60 = vld [vmem:[%s4267_s5 + $0x78] sm:$0xff] }
  0x27   : > { %1185 = vmatmul.mubr.bf16.vlgmr.msra.gmra.mrb[0].mxu1 %v3576_v18  ;;  %1121 = vmatmul.mubr.bf16.vlgmr.msra.gmra.mrb[0].mxu0 %v3616_v29  ;;  %v1815_v18 = vld [vmem:[%s4267_s5 + $0x10] sm:$0xff]  ;;  %v1525_v29 = vld [vmem:[%s3897_s22 + $0x80] sm:$0xff]  ;;  %v2913_v15 = vld [vmem:[%s4005_s24 + $0x18] sm:$0xff]  }
  0x28   : > { %3054 = vmatpush3.bf16.msra.mxu1 %v3580_v19  ;;  %1192 = vmatprep.mubr.bf16.mxu1 %v3581_v20  ;;  %v1816_v19 = vld [vmem:[%s4267_s5 + $0x18] sm:$0xff]  ;;  %v1537_v62 = vld [vmem:[%s3897_s22 + $0xe0] sm:$0xff] }
  0x29   : > { %3055 = vmatprep.subr.bf16.mxu1 %v3584_v21  ;;  %1128 = vmatprep.mubr.bf16.mxu0 %v3622_v33  ;;  %v3619_v20 = vld [vmem:[%s3804_s8 + $0x8] ss:$16 sps:$4 sm:$0xff]   ;;  %v3425_v21 = vpack.c.bf16 %v1816_v19, %v1815_v18  ;;  %v2914_v18 = vld [vmem:[%s4005_s24 + $0x20] sm:$0xff]  }
  0x2a   : > { %1573 = vperm.xlu0 %3558, %v1515_v0   ;;  %1578 = vperm.xlu1 %3559, %v1516_v2   ;;  %v3627_v33 = vld [vmem:[%s3804_s8 + $0x28] ss:$16 sps:$4 sm:$0xff]   ;;  %v2785_v19 = vunpack.c.l.bf16 %v2914_v18 }
  0x2b   : > { %3422 = vmatprep.subr.bf16.mxu0 %v3421_v17  ;;  %v1538_v0 = vld [vmem:[%s3897_s22 + $0xe8] sm:$0xff] }
  0x2c   : > { %3056 = vmatpush3.bf16.msra.mxu1 %v3585_v22  ;;  %v1523_v22 = vld [vmem:[%s3897_s22 + $0x70] sm:$0xff]  ;;  %3424 = vmatpush3.bf16.msra.mxu0 %v3421_v17  ;;  %v2782_v17 = vunpack.c.h.bf16 %v2913_v15 }
  0x2d   : > { %3057 = vmatprep.subr.bf16.mxu1 %v3589_v23  ;;  %v1817_v23 = vld [vmem:[%s4267_s5 + $0x20] sm:$0xff]  ;;  %3426 = vmatprep.subr.bf16.mxu0 %v3425_v21 }
  0x2e   : > { %1583 = vperm.xlu0 %3558, %v1517_v4   ;;  %1588 = vperm.xlu1 %3559, %v1518_v6   ;;  %v1539_v4 = vld [vmem:[%s3897_s22 + $0xf0] sm:$0xff]  ;;  %v2911_v6 = vld [vmem:[%s4005_s24 + $0x8] sm:$0xff]  }
  0x2f   : > { %1193 = vmatmul.mubr.bf16.gmra.mrb[4].mxu1 %v3583_v24  ;;  %1129 = vmatmul.mubr.bf16.gmra.mrb[4].mxu0 %v3626_v38  ;;  %v1818_v24 = vld [vmem:[%s4267_s5 + $0x28] sm:$0xff] }
  0x30   : > { %1200 = vmatprep.mubr.bf16.mxu1 %v3586_v25  ;;  %3058 = vmatpush3.bf16.msra.mxu1 %v3590_v26  ;;  %v3624_v25 = vld [vmem:[%s3804_s8 + $0x2c] ss:$16 sps:$4 sm:$0xff]  }
  0x31   : > { %3059 = vmatprep.subr.bf16.mxu1 %v3594_v27  ;;  %1136 = vmatprep.mubr.bf16.mxu0 %v3628_v39  ;;  %v1524_v26 = vld [vmem:[%s3897_s22 + $0x78] sm:$0xff]  ;;  %v3662_v27 = vld [vmem:[%s3804_s8 + $0xe0] ss:$16 sps:$4 sm:$0xff]  }
  0x32   : > { %1593 = vperm.xlu0 %3558, %v1519_v8   ;;  %1598 = vperm.xlu1 %3559, %v1520_v10   ;;  %v3630_v38 = vld [vmem:[%s3804_s8 + $0x4c] ss:$16 sps:$4 sm:$0xff]   ;;  %v2773_v8 = vunpack.c.l.bf16 %v2911_v6  ;;  %v2912_v10 = vld [vmem:[%s4005_s24 + $0x10] sm:$0xff]  }
  0x33   : > { %3428 = vmatpush3.bf16.msra.mxu0 %v3425_v21  ;;  %v1528_v39 = vld [vmem:[%s3897_s22 + $0x98] sm:$0xff] }
  0x34   : > { %3060 = vmatpush3.bf16.msra.mxu1 %v3595_v28  ;;  %v3429_v28 = vpack.c.bf16 %v1818_v24, %v1817_v23  ;;  %v3657_v21 = vld [vmem:[%s3804_s8 + $0xc8] ss:$16 sps:$4 sm:$0xff]  }
  0x35   : > { %3061 = vmatprep.subr.bf16.mxu1 %v3599_v31  ;;  %v1820_v31 = vld [vmem:[%s4267_s5 + $0x38] sm:$0xff]  ;;  %v2915_v23 = vld [vmem:[%s4005_s24 + $0x28] sm:$0xff]  }
  0x36   : > { %1603 = vperm.xlu0 %3558, %v1521_v12   ;;  %1608 = vperm.xlu1 %3559, %v1522_v16   ;;  %v2778_v12 = vunpack.c.h.bf16 %v2912_v10  ;;  %v2781_v16 = vunpack.c.l.bf16 %v2913_v15  ;;  %v2789_v24 = vunpack.c.l.bf16 %v2915_v23  ;;  %v1810_v15 = vld [vmem:[%s4266_s4 + $0x68] sm:$0xff] }
  0x37   : > { %1201 = vmatmul.mubr.bf16.gmra.mrb[8].mxu1 %v3588_v32  ;;  %1137 = vmatmul.mubr.bf16.gmra.mrb[8].mxu0 %v3632_v47  ;;  %v1526_v32 = vld [vmem:[%s3897_s22 + $0x88] sm:$0xff]  ;;  %v1531_v47 = vld [vmem:[%s3897_s22 + $0xb0] sm:$0xff] }
  0x38   : > { %1208 = vmatprep.mubr.bf16.mxu1 %v3591_v34  ;;  %3062 = vmatpush3.bf16.msra.mxu1 %v3600_v35  ;;  %v3433_v34 = vpack.c.bf16 %v1820_v31, %v1819_v30  ;;  %v1527_v35 = vld [vmem:[%s3897_s22 + $0x90] sm:$0xff]  ;;  %v3664_v30 = vld [vmem:[%s3804_s8 + $0x10c] ss:$16 sps:$4 sm:$0xff]  }
  0x39   : > { %3063 = vmatprep.subr.bf16.mxu1 %v3604_v36  ;;  %1144 = vmatprep.mubr.bf16.mxu0 %v3634_v48  ;;  %v1821_v36 = vld [vmem:[%s4267_s5 + $0x40] sm:$0xff]  ;;  %v3636_v48 = vld [vmem:[%s3804_s8 + $0x6c] ss:$16 sps:$4 sm:$0xff]  }
  0x3a   : > { %1613 = vperm.xlu0 %3558, %v1523_v22   ;;  %1618 = vperm.xlu1 %3559, %v1524_v26   ;;  %v3660_v22 = vld [vmem:[%s3804_s8 + $0xec] ss:$16 sps:$4 sm:$0xff]   ;;  %v2916_v26 = vld [vmem:[%s4005_s24 + $0x30] sm:$0xff]  }
  0x3b   : > { %3430 = vmatprep.subr.bf16.mxu0 %v3429_v28  ;;  %v2917_v31 = vld [vmem:[%s4005_s24 + $0x38] sm:$0xff]  }
  0x3c   : > { %3064 = vmatpush3.bf16.msra.mxu1 %v3605_v37  ;;  %v1822_v37 = vld [vmem:[%s4267_s5 + $0x48] sm:$0xff]  ;;  %3432 = vmatpush3.bf16.msra.mxu0 %v3429_v28  ;;  %v2794_v28 = vunpack.c.h.bf16 %v2916_v26 }
  0x3d   : > { %3065 = vmatprep.subr.bf16.mxu1 %v3609_v40  ;;  %3434 = vmatprep.subr.bf16.mxu0 %v3433_v34  ;;  %v3437_v40 = vpack.c.bf16 %v1822_v37, %v1821_v36  ;;  %v1797_v36 = vld [vmem:[%s4266_s4] sm:$0xff]  ;;  %v1798_v37 = vld [vmem:[%s4266_s4 + $0x8] sm:$0xff] }
  0x3e   : > { %1623 = vperm.xlu0 %3558, %v1525_v29   ;;  %1628 = vperm.xlu1 %3559, %v1526_v32   ;;  %v3663_v29 = vld [vmem:[%s3804_s8 + $0xe8] ss:$16 sps:$4 sm:$0xff]   ;;  %v2797_v32 = vunpack.c.l.bf16 %v2917_v31 }
  0x3f   : > { %1209 = vmatmul.mubr.bf16.gmra.mrb[12].mxu1 %v3593_v42  ;;  %1145 = vmatmul.mubr.bf16.gmra.mrb[12].mxu0 %v3638_v51  ;;  %v1823_v42 = vld [vmem:[%s4267_s5 + $0x50] sm:$0xff]  ;;  %v1534_v51 = vld [vmem:[%s3897_s22 + $0xc8] sm:$0xff] }
  0x40   : > { %1216 = vmatprep.mubr.bf16.mxu1 %v3596_v43  ;;  %3066 = vmatpush3.bf16.msra.mxu1 %v3610_v44  ;;  %v1824_v43 = vld [vmem:[%s4267_s5 + $0x58] sm:$0xff]  ;;  %v1530_v44 = vld [vmem:[%s3897_s22 + $0xa8] sm:$0xff] }
  0x41   : > { %3067 = vmatprep.subr.bf16.mxu1 %v3614_v45  ;;  %1152 = vmatprep.mubr.bf16.mxu0 %v3640_v52  ;;  %v3441_v45 = vpack.c.bf16 %v1824_v43, %v1823_v42  ;;  %v1825_v52 = vld [vmem:[%s4267_s5 + $0x60] sm:$0xff]  ;;  %v2919_v42 = vld [vmem:[%s4005_s24 + $0x48] sm:$0xff]  }
  0x42   : > { %1633 = vperm.xlu0 %3558, %v1527_v35   ;;  %1638 = vperm.xlu1 %3559, %v1528_v39   ;;  %v3445_v56 = vpack.c.bf16 %v1826_v53, %v1825_v52  ;;  %v3453_v39 = vpack.c.bf16 %v1798_v37, %v1797_v36  ;;  %v2805_v43 = vunpack.c.l.bf16 %v2919_v42 }
  0x43   : > { %3436 = vmatpush3.bf16.msra.mxu0 %v3433_v34  ;;  %v2918_v34 = vld [vmem:[%s4005_s24 + $0x40] sm:$0xff]  }
  0x44   : > { %3068 = vmatpush3.bf16.msra.mxu1 %v3615_v46  ;;  %3438 = vmatprep.subr.bf16.mxu0 %v3437_v40  ;;  %v3633_v46 = vld [vmem:[%s3804_s8 + $0x48] ss:$16 sps:$4 sm:$0xff]   ;;  %v2801_v35 = vunpack.c.l.bf16 %v2918_v34 }
  0x46   : > { %1643 = vperm.xlu0 %3558, %v1529_v41   ;;  %1648 = vperm.xlu1 %3559, %v1530_v44   ;;  %v3667_v41 = vld [vmem:[%s3804_s8 + $0x12c] ss:$16 sps:$4 sm:$0xff]   ;;  %v1799_v44 = vld [vmem:[%s4266_s4 + $0x10] sm:$0xff] }
  0x47   : > { %1217 = vmatmul.mubr.bf16.gmra.mrb[16].mxu1 %v3598_v49  ;;  %1153 = vmatmul.mubr.bf16.gmra.mrb[16].mxu0 %v3644_v59  ;;  %v1532_v49 = vld [vmem:[%s3897_s22 + $0xb8] sm:$0xff]  ;;  %v1827_v59 = vld [vmem:[%s4267_s5 + $0x70] sm:$0xff] }
  0x48   : > { %1224 = vmatprep.mubr.bf16.mxu1 %v3601_v50  ;;  %1160 = vmatprep.mubr.bf16.mxu0 %v3646_v61  ;;  %v1533_v50 = vld [vmem:[%s3897_s22 + $0xc0] sm:$0xff]  ;;  %v3449_v61 = vpack.c.bf16 %v1828_v60, %v1827_v59  ;;  %v1804_v59 = vld [vmem:[%s4266_s4 + $0x38] sm:$0xff] }
  0x49   : > { %3440 = vmatpush3.bf16.msra.mxu0 %v3437_v40  ;;  %v3666_v40 = vld [vmem:[%s3804_s8 + $0x108] ss:$16 sps:$4 sm:$0xff]  }
  0x4a   : > { %1653 = vperm.xlu0 %3558, %v1531_v47   ;;  %3442 = vmatprep.subr.bf16.mxu0 %v3441_v45 }
  0x4b   : > { %1658 = vperm.xlu1 %3559, %v1532_v49  }
  0x4d   : > { %3444 = vmatpush3.bf16.msra.mxu0 %v3441_v45  ;;  %v1800_v45 = vld [vmem:[%s4266_s4 + $0x18] sm:$0xff] }
  0x4e   : > { %1663 = vperm.xlu0 %3558, %v1533_v50   ;;  %3446 = vmatprep.subr.bf16.mxu0 %v3445_v56  ;;  %v3457_v47 = vpack.c.bf16 %v1800_v45, %v1799_v44  ;;  %v1801_v50 = vld [vmem:[%s4266_s4 + $0x20] sm:$0xff] }
  0x4f   : > { %1225 = vmatmul.mubr.bf16.gmra.mrb[20].mxu1 %v3603_v54  ;;  %1161 = vmatmul.mubr.bf16.gmra.mrb[20].mxu0 %v3650_v3  ;;  %v3639_v54 = vld [vmem:[%s3804_s8 + $0x68] ss:$16 sps:$4 sm:$0xff]  }
  0x50   : > { %1232 = vmatprep.mubr.bf16.mxu1 %v3606_v57  ;;  %1168 = vmatprep.mubr.bf16.mxu0 %v3652_v5  ;;  %v3642_v57 = vld [vmem:[%s3804_s8 + $0x8c] ss:$16 sps:$4 sm:$0xff]   ;;  %v3645_v3 = vld [vmem:[%s3804_s8 + $0x88] ss:$16 sps:$4 sm:$0xff]  }
  0x51   : > { %1668 = vperm.xlu1 %3559, %v1534_v51   ;;  %3448 = vmatpush3.bf16.msra.mxu0 %v3445_v56  ;;  %v3648_v5 = vld [vmem:[%s3804_s8 + $0xac] ss:$16 sps:$4 sm:$0xff]  }
  0x52   : > { %1673 = vperm.xlu0 %3558, %v1535_v55   ;;  %3450 = vmatprep.subr.bf16.mxu0 %v3449_v61  ;;  %v1802_v51 = vld [vmem:[%s4266_s4 + $0x28] sm:$0xff]  ;;  %v2921_v56 = vld [vmem:[%s4005_s24 + $0x58] sm:$0xff]  }
  0x53   : > { %v3461_v53 = vpack.c.bf16 %v1802_v51, %v1801_v50  ;;  %v3670_v55 = vld [vmem:[%s3804_s8 + $0x14c] ss:$16 sps:$4 sm:$0xff]   ;;  %v2814_v60 = vunpack.c.h.bf16 %v2921_v56 }
  0x55   : > { %1678 = vperm.xlu1 %3559, %v1536_v58   ;;  %3452 = vmatpush3.bf16.msra.mxu0 %v3449_v61  ;;  %v1803_v58 = vld [vmem:[%s4266_s4 + $0x30] sm:$0xff] }
  0x56   : > { %1683 = vperm.xlu0 %3558, %v1537_v62   ;;  %3454 = vmatprep.subr.bf16.mxu0 %v3453_v39  ;;  %v3465_v61 = vpack.c.bf16 %v1804_v59, %v1803_v58  ;;  %v2922_v62 = vld [vmem:[%s4005_s24 + $0x60] sm:$0xff]  }
  0x57   : > { %1233 = vmatmul.mubr.bf16.gmra.mrb[24].mxu1 %v3608_v63  ;;  %1169 = vmatmul.mubr.bf16.gmra.mrb[24].mxu0 %v3656_v11  ;;  %v2768_v63 = vld [vmem:[%s4005_s24] sm:$0xff]   ;;  %v2777_v11 = vunpack.c.l.bf16 %v2912_v10 }
  0x58   : > { %1240 = vmatprep.mubr.bf16.mxu1 %v3611_v1  ;;  %1176 = vmatprep.mubr.bf16.mxu0 %v3658_v14  ;;  %v2769_v1 = vunpack.c.l.bf16 %v2768_v63  ;;  %v2770_v2 = vunpack.c.h.bf16 %v2768_v63  ;;  %v3654_v14 = vld [vmem:[%s3804_s8 + $0xcc] ss:$16 sps:$4 sm:$0xff]   ;;  %v2817_v63 = vunpack.c.l.bf16 %v2922_v62 }
  0x59   : > { %1688 = vperm.xlu1 %3559, %v1538_v0   ;;  %v1805_v0 = vld [vmem:[%s4266_s4 + $0x40] sm:$0xff] }
  0x5a   : > { %1693 = vperm.xlu0 %3558, %v1539_v4   ;;  %v3672_v4 = vld [vmem:[%s3804_s8 + $0x148] ss:$16 sps:$4 sm:$0xff]  }
  0x5f   : > { %1241 = vmatmul.mubr.bf16.gmra.mrb[28].mxu1 %v3613_v7  ;;  %1177 = vmatmul.mubr.bf16.gmra.mrb[28].mxu0 %v3662_v27  ;;  %v1540_v7 = vld [vmem:[%s3897_s22 + $0xf8] sm:$0xff]  ;;  %v2793_v27 = vunpack.c.l.bf16 %v2916_v26 }
  0x60   : > { %1281 = vmatprep.mubr.bf16.mxu1 %v3621_v9  ;;  %3293 = vmatprep.mubr.f32.mxu0 %v2769_v1  ;;  %v2774_v9 = vunpack.c.h.bf16 %v2911_v6  ;;  %v1806_v1 = vld [vmem:[%s4266_s4 + $0x48] sm:$0xff] }
  0x61   : > { %1698 = vperm.xlu1 %3559, %v1540_v7   ;;  %v2923_v6 = vld [vmem:[%s4005_s24 + $0x68] sm:$0xff]  }
  0x62   : > { %v2821_v7 = vunpack.c.l.bf16 %v2923_v6  ;;  %v2822_v10 = vunpack.c.h.bf16 %v2923_v6  ;;  %v3678_v26 = vld [vmem:[%s3804_s8 + $0x188] ss:$16 sps:$4 sm:$0xff]  }
  0x67   : > { %1282 = vmatmul.mubr.bf16.vlgmr.msra.gmra.mrb[32].mxu1 %v3619_v20  ;;  %3294 = vmatmul.mubr.f32.vlgmr.msra.gmra.mrb[32].mxu0 %v2770_v2  ;;  %v2786_v20 = vunpack.c.h.bf16 %v2914_v18  ;;  %v2818_v2 = vunpack.c.h.bf16 %v2922_v62  ;;  %v3675_v18 = vld [vmem:[%s3804_s8 + $0x168] ss:$16 sps:$4 sm:$0xff]  }
  0x68   : > { %1289 = vmatprep.mubr.bf16.mxu1 %v3624_v25  ;;  %3296 = vmatprep.mubr.f32.mxu0 %v2773_v8  ;;  %v2790_v25 = vunpack.c.h.bf16 %v2915_v23  ;;  %v1807_v8 = vld [vmem:[%s4266_s4 + $0x50] sm:$0xff]  ;;  %v1812_v23 = vld [vmem:[%s4266_s4 + $0x78] sm:$0xff] }
  0x69   : > { %3456 = vmatpush3.bf16.msra.mxu0 %v3453_v39 }
  0x6a   : > { %3458 = vmatprep.subr.bf16.mxu0 %v3457_v47 }
  0x6b   : > { %3297 = vmatmul.mubr.f32.gmra.mrb[34].mxu0 %v2774_v9  ;;  %v1808_v9 = vld [vmem:[%s4266_s4 + $0x58] sm:$0xff] }
  0x6c   : > { %3299 = vmatprep.mubr.f32.mxu0 %v2777_v11  ;;  %v3473_v11 = vpack.c.bf16 %v1808_v9, %v1807_v8 }
  0x6d   : > { %3460 = vmatpush3.bf16.msra.mxu0 %v3457_v47 }
  0x6e   : > { %3462 = vmatprep.subr.bf16.mxu0 %v3461_v53 }
  0x6f   : > { %1290 = vmatmul.mubr.bf16.gmra.mrb[36].mxu1 %v3627_v33  ;;  %3300 = vmatmul.mubr.f32.gmra.mrb[36].mxu0 %v2778_v12  ;;  %v2798_v33 = vunpack.c.h.bf16 %v2917_v31  ;;  %v2924_v12 = vld [vmem:[%s4005_s24 + $0x70] sm:$0xff]   ;;  %v3685_v31 = vld [vmem:[%s3804_s8 + $0x1ec] ss:$16 sps:$4 sm:$0xff]  }
  0x70   : > { %1297 = vmatprep.mubr.bf16.mxu1 %v3630_v38  ;;  %3302 = vmatprep.mubr.f32.mxu0 %v2781_v16  ;;  %v2802_v38 = vunpack.c.h.bf16 %v2918_v34  ;;  %v2826_v16 = vunpack.c.h.bf16 %v2924_v12 }
  0x71   : > { %3464 = vmatpush3.bf16.msra.mxu0 %v3461_v53 }
  0x72   : > { %3466 = vmatprep.subr.bf16.mxu0 %v3465_v61 }
  0x73   : > { %3303 = vmatmul.mubr.f32.gmra.mrb[38].mxu0 %v2782_v17 }
  0x74   : > { %3305 = vmatprep.mubr.f32.mxu0 %v2785_v19  ;;  %v3676_v19 = vld [vmem:[%s3804_s8 + $0x18c] ss:$16 sps:$4 sm:$0xff]  }
  0x75   : > { %3468 = vmatpush3.bf16.msra.mxu0 %v3465_v61 }
  0x77   : > { %1298 = vmatmul.mubr.bf16.gmra.mrb[40].mxu1 %v3633_v46  ;;  %3306 = vmatmul.mubr.f32.gmra.mrb[40].mxu0 %v2786_v20  ;;  %v2806_v46 = vunpack.c.h.bf16 %v2919_v42  ;;  %v2925_v20 = vld [vmem:[%s4005_s24 + $0x78] sm:$0xff]  }
  0x78   : > { %1305 = vmatprep.mubr.bf16.mxu1 %v3636_v48  ;;  %3308 = vmatprep.mubr.f32.mxu0 %v2789_v24  ;;  %v2920_v48 = vld [vmem:[%s4005_s24 + $0x50] sm:$0xff]   ;;  %v2830_v24 = vunpack.c.h.bf16 %v2925_v20 }
  0x79   : > { %v2809_v49 = vunpack.c.l.bf16 %v2920_v48  ;;  %v2810_v52 = vunpack.c.h.bf16 %v2920_v48 }
  0x7b   : > { %3309 = vmatmul.mubr.f32.gmra.mrb[42].mxu0 %v2790_v25 }
  0x7c   : > { %3311 = vmatprep.mubr.f32.mxu0 %v2793_v27  ;;  %v3679_v27 = vld [vmem:[%s3804_s8 + $0x1ac] ss:$16 sps:$4 sm:$0xff]  }
  0x7f   : > { %1306 = vmatmul.mubr.bf16.gmra.mrb[44].mxu1 %v3639_v54  ;;  %3312 = vmatmul.mubr.f32.gmra.mrb[44].mxu0 %v2794_v28  ;;  %v3669_v54 = vld [vmem:[%s3804_s8 + $0x128] ss:$16 sps:$4 sm:$0xff]  }
  0x80   : > { %1313 = vmatprep.mubr.bf16.mxu1 %v3642_v57  ;;  %3314 = vmatprep.mubr.f32.mxu0 %v2797_v32  ;;  %v2813_v57 = vunpack.c.l.bf16 %v2921_v56  ;;  %v3681_v28 = vld [vmem:[%s3804_s8 + $0x1a8] ss:$16 sps:$4 sm:$0xff]  }
  0x81   : > { %v3687_v32 = vld [vmem:[%s3804_s8 + $0x1e8] ss:$16 sps:$4 sm:$0xff]  }
  0x83   : > { %3315 = vmatmul.mubr.f32.gmra.mrb[46].mxu0 %v2798_v33 }
  0x84   : > { %3317 = vmatprep.mubr.f32.mxu0 %v2801_v35 }
  0x87   : > { %1314 = vmatmul.mubr.bf16.gmra.mrb[48].mxu1 %v3645_v3  ;;  %3318 = vmatmul.mubr.f32.gmra.mrb[48].mxu0 %v2802_v38  ;;  %v3469_v3 = vpack.c.bf16 %v1806_v1, %v1805_v0 }
  0x88   : > { %1321 = vmatprep.mubr.bf16.mxu1 %v3648_v5  ;;  %3320 = vmatprep.mubr.f32.mxu0 %v2805_v43  ;;  %v3673_v5 = vld [vmem:[%s3804_s8 + $0x16c] ss:$16 sps:$4 sm:$0xff]  }
  0x89   : > { %3470 = vmatprep.subr.bf16.mxu0 %v3469_v3 }
  0x8a   : > { %3472 = vmatpush3.bf16.msra.mxu0 %v3469_v3 }
  0x8b   : > { %3321 = vmatmul.mubr.f32.gmra.mrb[50].mxu0 %v2806_v46  ;;  %3474 = vmatprep.subr.bf16.mxu0 %v3473_v11 }
  0x8c   : > { %3323 = vmatprep.mubr.f32.mxu0 %v2809_v49 }
  0x8e   : > { %3476 = vmatpush3.bf16.msra.mxu0 %v3473_v11 }
  0x8f   : > { %1322 = vmatmul.mubr.bf16.gmra.mrb[52].mxu1 %v3651_v13  ;;  %3324 = vmatmul.mubr.f32.gmra.mrb[52].mxu0 %v2810_v52  ;;  %v2825_v13 = vunpack.c.l.bf16 %v2924_v12 }
  0x90   : > { %1329 = vmatprep.mubr.bf16.mxu1 %v3654_v14  ;;  %3326 = vmatprep.mubr.f32.mxu0 %v2813_v57  ;;  %v1809_v14 = vld [vmem:[%s4266_s4 + $0x60] sm:$0xff] }
  0x91   : > { %v3477_v17 = vpack.c.bf16 %v1810_v15, %v1809_v14 }
  0x93   : > { %3327 = vmatmul.mubr.f32.gmra.mrb[54].mxu0 %v2814_v60  ;;  %3478 = vmatprep.subr.bf16.mxu0 %v3477_v17 }
  0x94   : > { %3329 = vmatprep.mubr.f32.mxu0 %v2817_v63  ;;  %3480 = vmatpush3.bf16.msra.mxu0 %v3477_v17 }
  0x97   : > { %1330 = vmatmul.mubr.bf16.gmra.mrb[56].mxu1 %v3657_v21  ;;  %3330 = vmatmul.mubr.f32.gmra.mrb[56].mxu0 %v2818_v2  ;;  %v2829_v21 = vunpack.c.l.bf16 %v2925_v20 }
  0x98   : > { %1337 = vmatprep.mubr.bf16.mxu1 %v3660_v22  ;;  %3332 = vmatprep.mubr.f32.mxu0 %v2821_v7  ;;  %v1811_v22 = vld [vmem:[%s4266_s4 + $0x70] sm:$0xff] }
  0x99   : > { %v3481_v25 = vpack.c.bf16 %v1812_v23, %v1811_v22 }
  0x9b   : > { %3333 = vmatmul.mubr.f32.gmra.mrb[58].mxu0 %v2822_v10  ;;  %3482 = vmatprep.subr.bf16.mxu0 %v3481_v25 }
  0x9c   : > { %3335 = vmatprep.mubr.f32.mxu0 %v2825_v13  ;;  %3484 = vmatpush3.bf16.msra.mxu0 %v3481_v25 }
  0x9f   : > { %1338 = vmatmul.mubr.bf16.gmra.mrb[60].mxu1 %v3663_v29  ;;  %3336 = vmatmul.mubr.f32.gmra.mrb[60].mxu0 %v2826_v16  ;;  %v3682_v29 = vld [vmem:[%s3804_s8 + $0x1cc] ss:$16 sps:$4 sm:$0xff]  }
  0xa0   : > { %1345 = vmatprep.mubr.bf16.mxu1 %v3664_v30  ;;  %3338 = vmatprep.mubr.f32.mxu0 %v2829_v21  ;;  %v3684_v30 = vld [vmem:[%s3804_s8 + $0x1c8] ss:$16 sps:$4 sm:$0xff]  }
  0xa3   : > { %3339 = vmatmul.mubr.f32.gmra.mrb[62].mxu0 %v2830_v24 }
  0xa7   : > { %1346 = vmatmul.mubr.bf16.gmra.mrb[64].mxu1 %v3666_v40 }
  0xa8   : > { %1353 = vmatprep.mubr.bf16.mxu1 %v3667_v41 }
  0xaf   : > { %1354 = vmatmul.mubr.bf16.gmra.mrb[68].mxu1 %v3669_v54 }
  0xb0   : > { %1361 = vmatprep.mubr.bf16.mxu1 %v3670_v55 }
  0xb7   : > { %1362 = vmatmul.mubr.bf16.gmra.mrb[72].mxu1 %v3672_v4 }
  0xb8   : > { %1369 = vmatprep.mubr.bf16.mxu1 %v3673_v5 }
  0xbf   : > { %1370 = vmatmul.mubr.bf16.gmra.mrb[76].mxu1 %v3675_v18 }
  0xc0   : > { %1377 = vmatprep.mubr.bf16.mxu1 %v3676_v19 }
  0xc7   : > { %1378 = vmatmul.mubr.bf16.gmra.mrb[80].mxu1 %v3678_v26 }
  0xc8   : > { %1385 = vmatprep.mubr.bf16.mxu1 %v3679_v27 }
  0xcf   : > { %1386 = vmatmul.mubr.bf16.gmra.mrb[84].mxu1 %v3681_v28 }
  0xd0   : > { %1393 = vmatprep.mubr.bf16.mxu1 %v3682_v29 }
  0xd7   : > { %1394 = vmatmul.mubr.bf16.gmra.mrb[88].mxu1 %v3684_v30 }
  0xd8   : > { %1401 = vmatprep.mubr.bf16.mxu1 %v3685_v31 }
  0xdf   : > { %1402 = vmatmul.mubr.bf16.gmra.mrb[92].mxu1 %v3687_v32 }
  0xfa   : > { %v3005_v33 = vpop.f32.mrb[0].mxu1  ;;  %v2957_v45 = vpop.f32.mrb[0].mxu0 }
  0xfb   : > { %v3006_v34 = vpop.f32.mrb[1].mxu1  ;;  %v2958_v46 = vpop.f32.mrb[1].mxu0 }
  0xfc   : > { %v4097_v35 = vadd.f32 %v3006_v34, %v3005_v33  ;;  %v3008_v36 = vpop.f32.mrb[2].mxu1  ;;  %v4105_v47 = vadd.f32 %v2958_v46, %v2957_v45  ;;  %v2960_v48 = vpop.f32.mrb[2].mxu0 }
  0xfd   : > { %v3009_v37 = vpop.f32.mrb[3].mxu1  ;;  %v2961_v49 = vpop.f32.mrb[3].mxu0 }
  0xfe   : > { %v4099_v38 = vadd.f32 %v3009_v37, %v3008_v36  ;;  %v4107_v51 = vadd.f32 %v2961_v49, %v2960_v48 }
 0x102   : > { %v3011_v39 = vpop.f32.mrb[4].mxu1  ;;  %v2963_v57 = vpop.f32.mrb[4].mxu0 }
 0x103   : > { %v3012_v40 = vpop.f32.mrb[5].mxu1  ;;  %v2964_v58 = vpop.f32.mrb[5].mxu0 }
 0x104   : > { %v4101_v41 = vadd.f32 %v3012_v40, %v3011_v39  ;;  %v3014_v42 = vpop.f32.mrb[6].mxu1  ;;  %v4113_v59 = vadd.f32 %v2964_v58, %v2963_v57  ;;  %v2966_v60 = vpop.f32.mrb[6].mxu0 }
 0x105   : > { %v3015_v43 = vpop.f32.mrb[7].mxu1  ;;  %v2967_v61 = vpop.f32.mrb[7].mxu0 }
 0x106   : > { %v4103_v44 = vadd.f32 %v3015_v43, %v3014_v42  ;;  %v4115_v63 = vadd.f32 %v2967_v61, %v2966_v60 }
 0x10a   : > { %v3017_v50 = vpop.f32.mrb[8].mxu1  ;;  %v2969_v5 = vpop.f32.mrb[8].mxu0 }
 0x10b   : > { %v3018_v52 = vpop.f32.mrb[9].mxu1  ;;  %v2970_v6 = vpop.f32.mrb[9].mxu0 }
 0x10c   : > { %v4109_v53 = vadd.f32 %v3018_v52, %v3017_v50  ;;  %v3020_v54 = vpop.f32.mrb[10].mxu1  ;;  %v4121_v7 = vadd.f32 %v2970_v6, %v2969_v5  ;;  %v2972_v8 = vpop.f32.mrb[10].mxu0 }
 0x10d   : > { %v3021_v55 = vpop.f32.mrb[11].mxu1  ;;  %v2973_v9 = vpop.f32.mrb[11].mxu0 }
 0x10e   : > { %v4111_v56 = vadd.f32 %v3021_v55, %v3020_v54  ;;  %v4123_v11 = vadd.f32 %v2973_v9, %v2972_v8  ;;  %v1544_v5 = vpop.permute.xlu0 %1543 }
 0x112   : > { %v3023_v62 = vpop.f32.mrb[12].mxu1  ;;  %v2975_v17 = vpop.f32.mrb[12].mxu0 }
 0x113   : > { %v3024_v0 = vpop.f32.mrb[13].mxu1  ;;  %v2976_v18 = vpop.f32.mrb[13].mxu0 }
 0x114   : > { %v4117_v1 = vadd.f32 %v3024_v0, %v3023_v62  ;;  %v3026_v2 = vpop.f32.mrb[14].mxu1  ;;  %v4129_v19 = vadd.f32 %v2976_v18, %v2975_v17  ;;  %v2978_v20 = vpop.f32.mrb[14].mxu0 }
 0x115   : > { %v3027_v3 = vpop.f32.mrb[15].mxu1  ;;  %v2979_v21 = vpop.f32.mrb[15].mxu0 }
 0x116   : > { %v4119_v4 = vadd.f32 %v3027_v3, %v3026_v2  ;;  %v4131_v23 = vadd.f32 %v2979_v21, %v2978_v20  ;;  %v1549_v21 = vpop.permute.xlu0 %1548 }
 0x11a   : > { %v3029_v10 = vpop.f32.mrb[16].mxu1  ;;  %v2981_v29 = vpop.f32.mrb[16].mxu0 }
 0x11b   : > { %v3030_v12 = vpop.f32.mrb[17].mxu1  ;;  %v2982_v30 = vpop.f32.mrb[17].mxu0 }
 0x11c   : > { %v4125_v13 = vadd.f32 %v3030_v12, %v3029_v10  ;;  %v3032_v14 = vpop.f32.mrb[18].mxu1  ;;  %v4137_v31 = vadd.f32 %v2982_v30, %v2981_v29  ;;  %v2984_v32 = vpop.f32.mrb[18].mxu0 }
 0x11d   : > { %v3033_v15 = vpop.f32.mrb[19].mxu1  ;;  %v2985_v33 = vpop.f32.mrb[19].mxu0 }
 0x11e   : > { %v4127_v16 = vadd.f32 %v3033_v15, %v3032_v14  ;;  %v4139_v36 = vadd.f32 %v2985_v33, %v2984_v32 }
 0x122   : > { %v3035_v22 = vpop.f32.mrb[20].mxu1  ;;  %v2987_v45 = vpop.f32.mrb[20].mxu0 }
 0x123   : > { %v3036_v24 = vpop.f32.mrb[21].mxu1  ;;  %v2988_v46 = vpop.f32.mrb[21].mxu0 }
 0x124   : > { %v4133_v25 = vadd.f32 %v3036_v24, %v3035_v22  ;;  %v3038_v26 = vpop.f32.mrb[22].mxu1  ;;  %v4145_v48 = vadd.f32 %v2988_v46, %v2987_v45  ;;  %v2990_v49 = vpop.f32.mrb[22].mxu0 }
 0x125   : > { %v3039_v27 = vpop.f32.mrb[23].mxu1  ;;  %v2991_v50 = vpop.f32.mrb[23].mxu0 }
 0x126   : > { %v4135_v28 = vadd.f32 %v3039_v27, %v3038_v26  ;;  %v4147_v54 = vadd.f32 %v2991_v50, %v2990_v49 }
 0x12a   : > { %v3041_v34 = vpop.f32.mrb[24].mxu1  ;;  %v2993_v62 = vpop.f32.mrb[24].mxu0 }
 0x12b   : > { %v3042_v37 = vpop.f32.mrb[25].mxu1  ;;  %v2994_v0 = vpop.f32.mrb[25].mxu0 }
 0x12c   : > { %v4141_v39 = vadd.f32 %v3042_v37, %v3041_v34  ;;  %v3044_v40 = vpop.f32.mrb[26].mxu1  ;;  %v4153_v2 = vadd.f32 %v2994_v0, %v2993_v62  ;;  %v2996_v3 = vpop.f32.mrb[26].mxu0 }
 0x12d   : > { %v3045_v42 = vpop.f32.mrb[27].mxu1  ;;  %v2997_v6 = vpop.f32.mrb[27].mxu0 }
 0x12e   : > { %v4143_v43 = vadd.f32 %v3045_v42, %v3044_v40  ;;  %v4155_v9 = vadd.f32 %v2997_v6, %v2996_v3  ;;  %v1554_v37 = vpop.permute.xlu1 %1553 }
 0x132   : > { %v3047_v52 = vpop.f32.mrb[28].mxu1  ;;  %v2999_v20 = vpop.f32.mrb[28].mxu0 }
 0x133   : > { %v3048_v55 = vpop.f32.mrb[29].mxu1  ;;  %v3000_v22 = vpop.f32.mrb[29].mxu0 }
 0x134   : > { %v4149_v57 = vadd.f32 %v3048_v55, %v3047_v52  ;;  %v3050_v58 = vpop.f32.mrb[30].mxu1  ;;  %v4159_v27 = vadd.f32 %v3000_v22, %v2999_v20  ;;  %v3002_v29 = vpop.f32.mrb[30].mxu0 }
 0x135   : > { %v3051_v60 = vpop.f32.mrb[31].mxu1  ;;  %v3003_v30 = vpop.f32.mrb[31].mxu0 }
 0x136   : > { %v4151_v61 = vadd.f32 %v3051_v60, %v3050_v58  ;;  %v4161_v34 = vadd.f32 %v3003_v30, %v3002_v29  ;;  %v1559_v52 = vpop.permute.xlu1 %1558 }
 0x13a   : > { %v3069_v8 = vpop.f32.mrb[32].mxu1 }
 0x13b   : > { %v3070_v10 = vpop.f32.mrb[33].mxu1 }
 0x13c   : > { %v3071_v12 = vadd.f32 %v3070_v10, %v3069_v8  ;;  %v3072_v14 = vpop.f32.mrb[34].mxu1  ;;  %v1564_v8 = vpop.permute.xlu0 %1563 }
 0x13d   : > { %v3073_v15 = vpop.f32.mrb[35].mxu1 }
 0x13e   : > { %v1284_v17 = vadd.f32 %v3071_v12, %v4105_v47  ;;  %v3074_v18 = vadd.f32 %v3073_v15, %v3072_v14  ;;  %v1569_v12 = vpop.permute.xlu1 %1568 }
 0x140   : > { %v1701_v24 = vmul.f32 %v1544_v5, %v1284_v17  ;;  %v1287_v26 = vadd.f32 %v3074_v18, %v4107_v51 }
 0x142   : > { %v1702_v32 = vmul.f32 %v1549_v21, %v1287_v26  ;;  %v3075_v33 = vpop.f32.mrb[36].mxu1  ;;  %3373 = vmatprep.mubr.f32.mxu0 %v1701_v24  ;;  %v1574_v24 = vpop.permute.xlu0 %1573 }
 0x143   : > { %v3076_v40 = vpop.f32.mrb[37].mxu1  ;;  %v1579_v29 = vpop.permute.xlu1 %1578 }
 0x144   : > { %v3077_v42 = vadd.f32 %v3076_v40, %v3075_v33  ;;  %v3078_v47 = vpop.f32.mrb[38].mxu1  ;;  %3374 = vmatmul.mubr.f32.vlgmr.msra.gmra.mrb[32].mxu0 %v1702_v32 }
 0x145   : > { %v3079_v45 = vpop.f32.mrb[39].mxu1 }
 0x146   : > { %v1292_v46 = vadd.f32 %v3077_v42, %v4113_v59  ;;  %v3080_v49 = vadd.f32 %v3079_v45, %v3078_v47  ;;  %v1584_v45 = vpop.permute.xlu0 %1583 }
 0x148   : > { %v1295_v51 = vadd.f32 %v3080_v49, %v4115_v63  ;;  %v1703_v50 = vmul.f32 %v1554_v37, %v1292_v46  ;;  %v1589_v49 = vpop.permute.xlu1 %1588 }
 0x14a   : > { %v1704_v55 = vmul.f32 %v1559_v52, %v1295_v51  ;;  %v3081_v58 = vpop.f32.mrb[40].mxu1  ;;  %3376 = vmatprep.mubr.f32.mxu0 %v1703_v50 }
 0x14b   : > { %v3082_v60 = vpop.f32.mrb[41].mxu1 }
 0x14c   : > { %v3083_v62 = vadd.f32 %v3082_v60, %v3081_v58  ;;  %v3084_v0 = vpop.f32.mrb[42].mxu1  ;;  %3377 = vmatmul.mubr.f32.gmra.mrb[34].mxu0 %v1704_v55 }
 0x14d   : > { %v3085_v3 = vpop.f32.mrb[43].mxu1 }
 0x14e   : > { %v1300_v5 = vadd.f32 %v3083_v62, %v4121_v7  ;;  %v3086_v6 = vadd.f32 %v3085_v3, %v3084_v0  ;;  %v1594_v0 = vpop.permute.xlu0 %1593 }
 0x150   : > { %v1303_v10 = vadd.f32 %v3086_v6, %v4123_v11  ;;  %v1705_v59 = vmul.f32 %v1564_v8, %v1300_v5  ;;  %v1599_v5 = vpop.permute.xlu1 %1598 }
 0x152   : > { %v3087_v14 = vpop.f32.mrb[44].mxu1  ;;  %3379 = vmatprep.mubr.f32.mxu0 %v1705_v59  ;;  %v1706_v63 = vmul.f32 %v1569_v12, %v1303_v10 }
 0x153   : > { %v3088_v15 = vpop.f32.mrb[45].mxu1 }
 0x154   : > { %v3089_v17 = vadd.f32 %v3088_v15, %v3087_v14  ;;  %v3090_v18 = vpop.f32.mrb[46].mxu1  ;;  %3380 = vmatmul.mubr.f32.gmra.mrb[36].mxu0 %v1706_v63  ;;  %v1604_v15 = vpop.permute.xlu0 %1603 }
 0x155   : > { %v3091_v20 = vpop.f32.mrb[47].mxu1 }
 0x156   : > { %v1308_v21 = vadd.f32 %v3089_v17, %v4129_v19  ;;  %v3092_v22 = vadd.f32 %v3091_v20, %v3090_v18  ;;  %v1609_v18 = vpop.permute.xlu1 %1608 }
 0x158   : > { %v1311_v7 = vadd.f32 %v3092_v22, %v4131_v23  ;;  %v1707_v26 = vmul.f32 %v1574_v24, %v1308_v21 }
 0x15a   : > { %v3093_v30 = vpop.f32.mrb[48].mxu1  ;;  %3382 = vmatprep.mubr.f32.mxu0 %v1707_v26  ;;  %v1708_v11 = vmul.f32 %v1579_v29, %v1311_v7 }
 0x15b   : > { %v3094_v32 = vpop.f32.mrb[49].mxu1 }
 0x15c   : > { %v3095_v33 = vadd.f32 %v3094_v32, %v3093_v30  ;;  %v3096_v37 = vpop.f32.mrb[50].mxu1  ;;  %3383 = vmatmul.mubr.f32.gmra.mrb[38].mxu0 %v1708_v11  ;;  %v1614_v30 = vpop.permute.xlu0 %1613 }
 0x15d   : > { %v3097_v40 = vpop.f32.mrb[51].mxu1  ;;  %v1619_v32 = vpop.permute.xlu1 %1618 }
 0x15e   : > { %v1316_v42 = vadd.f32 %v3095_v33, %v4137_v31  ;;  %v3098_v47 = vadd.f32 %v3097_v40, %v3096_v37 }
 0x160   : > { %v1319_v19 = vadd.f32 %v3098_v47, %v4139_v36  ;;  %v1709_v46 = vmul.f32 %v1584_v45, %v1316_v42 }
 0x162   : > { %v3099_v51 = vpop.f32.mrb[52].mxu1  ;;  %3385 = vmatprep.mubr.f32.mxu0 %v1709_v46  ;;  %v1710_v23 = vmul.f32 %v1589_v49, %v1319_v19  ;;  %v1624_v46 = vpop.permute.xlu0 %1623 }
 0x163   : > { %v3100_v50 = vpop.f32.mrb[53].mxu1 }
 0x164   : > { %v3101_v52 = vadd.f32 %v3100_v50, %v3099_v51  ;;  %v3102_v55 = vpop.f32.mrb[54].mxu1  ;;  %3386 = vmatmul.mubr.f32.gmra.mrb[40].mxu0 %v1710_v23  ;;  %v1629_v51 = vpop.permute.xlu1 %1628 }
 0x165   : > { %v3103_v58 = vpop.f32.mrb[55].mxu1 }
 0x166   : > { %v1324_v60 = vadd.f32 %v3101_v52, %v4145_v48  ;;  %v3104_v62 = vadd.f32 %v3103_v58, %v3102_v55 }
 0x168   : > { %v1327_v31 = vadd.f32 %v3104_v62, %v4147_v54  ;;  %v1711_v3 = vmul.f32 %v1594_v0, %v1324_v60  ;;  %v1634_v0 = vpop.permute.xlu0 %1633 }
 0x16a   : > { %v3105_v6 = vpop.f32.mrb[56].mxu1  ;;  %3388 = vmatprep.mubr.f32.mxu0 %v1711_v3  ;;  %v1712_v36 = vmul.f32 %v1599_v5, %v1327_v31  ;;  %v1639_v3 = vpop.permute.xlu1 %1638 }
 0x16b   : > { %v3106_v8 = vpop.f32.mrb[57].mxu1 }
 0x16c   : > { %v3107_v10 = vadd.f32 %v3106_v8, %v3105_v6  ;;  %v3108_v59 = vpop.f32.mrb[58].mxu1  ;;  %3389 = vmatmul.mubr.f32.gmra.mrb[42].mxu0 %v1712_v36 }
 0x16d   : > { %v3109_v12 = vpop.f32.mrb[59].mxu1 }
 0x16e   : > { %v1332_v14 = vadd.f32 %v3107_v10, %v4153_v2  ;;  %v3110_v63 = vadd.f32 %v3109_v12, %v3108_v59 }
 0x170   : > { %v1335_v48 = vadd.f32 %v3110_v63, %v4155_v9  ;;  %v1713_v17 = vmul.f32 %v1604_v15, %v1332_v14  ;;  %v1644_v14 = vpop.permute.xlu0 %1643  ;;  %v1649_v15 = vpop.permute.xlu1 %1648 }
 0x172   : > { %v3111_v20 = vpop.f32.mrb[60].mxu1  ;;  %3391 = vmatprep.mubr.f32.mxu0 %v1713_v17  ;;  %v1714_v54 = vmul.f32 %v1609_v18, %v1335_v48 }
 0x173   : > { %v3112_v21 = vpop.f32.mrb[61].mxu1 }
 0x174   : > { %v3113_v22 = vadd.f32 %v3112_v21, %v3111_v20  ;;  %v3114_v24 = vpop.f32.mrb[62].mxu1  ;;  %3392 = vmatmul.mubr.f32.gmra.mrb[44].mxu0 %v1714_v54 }
 0x175   : > { %v3115_v7 = vpop.f32.mrb[63].mxu1 }
 0x176   : > { %v1340_v26 = vadd.f32 %v3113_v22, %v4159_v27  ;;  %v3116_v29 = vadd.f32 %v3115_v7, %v3114_v24  ;;  %v1654_v24 = vpop.permute.xlu0 %1653 }
 0x178   : > { %v1343_v2 = vadd.f32 %v3116_v29, %v4161_v34  ;;  %v1715_v11 = vmul.f32 %v1614_v30, %v1340_v26  ;;  %v1659_v26 = vpop.permute.xlu1 %1658 }
 0x17a   : > { %v3117_v33 = vpop.f32.mrb[64].mxu1  ;;  %3394 = vmatprep.mubr.f32.mxu0 %v1715_v11  ;;  %v1716_v9 = vmul.f32 %v1619_v32, %v1343_v2 }
 0x17b   : > { %v3118_v37 = vpop.f32.mrb[65].mxu1 }
 0x17c   : > { %v3119_v40 = vadd.f32 %v3118_v37, %v3117_v33  ;;  %v3120_v42 = vpop.f32.mrb[66].mxu1  ;;  %3395 = vmatmul.mubr.f32.gmra.mrb[46].mxu0 %v1716_v9  ;;  %v1664_v37 = vpop.permute.xlu0 %1663 }
 0x17d   : > { %v3121_v47 = vpop.f32.mrb[67].mxu1 }
 0x17e   : > { %v1348_v45 = vadd.f32 %v3119_v40, %v4097_v35  ;;  %v3122_v19 = vadd.f32 %v3121_v47, %v3120_v42  ;;  %v1669_v42 = vpop.permute.xlu1 %1668 }
 0x180   : > { %v1351_v27 = vadd.f32 %v3122_v19, %v4099_v38  ;;  %v1717_v49 = vmul.f32 %v1624_v46, %v1348_v45 }
 0x182   : > { %v3123_v23 = vpop.f32.mrb[68].mxu1  ;;  %3397 = vmatprep.mubr.f32.mxu0 %v1717_v49  ;;  %v1718_v34 = vmul.f32 %v1629_v51, %v1351_v27 }
 0x183   : > { %v3124_v50 = vpop.f32.mrb[69].mxu1 }
 0x184   : > { %v3125_v52 = vadd.f32 %v3124_v50, %v3123_v23  ;;  %v3126_v55 = vpop.f32.mrb[70].mxu1  ;;  %3398 = vmatmul.mubr.f32.gmra.mrb[48].mxu0 %v1718_v34  ;;  %v1674_v23 = vpop.permute.xlu0 %1673 }
 0x185   : > { %v3127_v58 = vpop.f32.mrb[71].mxu1  ;;  %v1679_v50 = vpop.permute.xlu1 %1678 }
 0x186   : > { %v1356_v60 = vadd.f32 %v3125_v52, %v4101_v41  ;;  %v3128_v62 = vadd.f32 %v3127_v58, %v3126_v55 }
 0x188   : > { %v1359_v35 = vadd.f32 %v3128_v62, %v4103_v44  ;;  %v1719_v31 = vmul.f32 %v1634_v0, %v1356_v60 }
 0x18a   : > { %v3129_v5 = vpop.f32.mrb[72].mxu1  ;;  %3400 = vmatprep.mubr.f32.mxu0 %v1719_v31  ;;  %v1720_v38 = vmul.f32 %v1639_v3, %v1359_v35  ;;  %v1684_v31 = vpop.permute.xlu0 %1683 }
 0x18b   : > { %v3130_v6 = vpop.f32.mrb[73].mxu1 }
 0x18c   : > { %v3131_v36 = vadd.f32 %v3130_v6, %v3129_v5  ;;  %v3132_v8 = vpop.f32.mrb[74].mxu1  ;;  %3401 = vmatmul.mubr.f32.gmra.mrb[50].mxu0 %v1720_v38  ;;  %v1689_v5 = vpop.permute.xlu1 %1688 }
 0x18d   : > { %v3133_v10 = vpop.f32.mrb[75].mxu1 }
 0x18e   : > { %v1364_v59 = vadd.f32 %v3131_v36, %v4109_v53  ;;  %v3134_v12 = vadd.f32 %v3133_v10, %v3132_v8 }
 0x190   : > { %v1367_v41 = vadd.f32 %v3134_v12, %v4111_v56  ;;  %v1721_v63 = vmul.f32 %v1644_v14, %v1364_v59  ;;  %v1694_v14 = vpop.permute.xlu0 %1693 }
 0x192   : > { %v3135_v48 = vpop.f32.mrb[76].mxu1  ;;  %3403 = vmatprep.mubr.f32.mxu0 %v1721_v63  ;;  %v1722_v44 = vmul.f32 %v1649_v15, %v1367_v41  ;;  %v1699_v63 = vpop.permute.xlu1 %1698  ;;  %v4196_v15 = vld [vmem:[%s4268_s6] ss:$0 sm:$0xff] }
 0x193   : > { %v3136_v17 = vpop.f32.mrb[77].mxu1 }
 0x194   : > { %v3137_v18 = vadd.f32 %v3136_v17, %v3135_v48  ;;  %v3138_v20 = vpop.f32.mrb[78].mxu1  ;;  %3404 = vmatmul.mubr.f32.gmra.mrb[52].mxu0 %v1722_v44 }
 0x195   : > { %v3139_v54 = vpop.f32.mrb[79].mxu1 }
 0x196   : > { %v1372_v21 = vadd.f32 %v3137_v18, %v4117_v1  ;;  %v3140_v22 = vadd.f32 %v3139_v54, %v3138_v20 }
 0x198   : > { %v1375_v53 = vadd.f32 %v3140_v22, %v4119_v4  ;;  %v1723_v7 = vmul.f32 %v1654_v24, %v1372_v21 }
 0x19a   : > { %v3141_v29 = vpop.f32.mrb[80].mxu1  ;;  %3406 = vmatprep.mubr.f32.mxu0 %v1723_v7  ;;  %v1724_v56 = vmul.f32 %v1659_v26, %v1375_v53 }
 0x19b   : > { %v3142_v30 = vpop.f32.mrb[81].mxu1 }
 0x19c   : > { %v3143_v2 = vadd.f32 %v3142_v30, %v3141_v29  ;;  %v3144_v11 = vpop.f32.mrb[82].mxu1  ;;  %3407 = vmatmul.mubr.f32.gmra.mrb[54].mxu0 %v1724_v56 }
 0x19d   : > { %v3145_v32 = vpop.f32.mrb[83].mxu1 }
 0x19e   : > { %v1380_v33 = vadd.f32 %v3143_v2, %v4125_v13  ;;  %v3146_v9 = vadd.f32 %v3145_v32, %v3144_v11 }
 0x1a0   : > { %v1383_v1 = vadd.f32 %v3146_v9, %v4127_v16  ;;  %v1725_v40 = vmul.f32 %v1664_v37, %v1380_v33 }
 0x1a2   : > { %v3147_v47 = vpop.f32.mrb[84].mxu1  ;;  %3409 = vmatprep.mubr.f32.mxu0 %v1725_v40  ;;  %v1726_v4 = vmul.f32 %v1669_v42, %v1383_v1 }
 0x1a3   : > { %v3148_v45 = vpop.f32.mrb[85].mxu1 }
 0x1a4   : > { %v3149_v19 = vadd.f32 %v3148_v45, %v3147_v47  ;;  %v3150_v46 = vpop.f32.mrb[86].mxu1  ;;  %3410 = vmatmul.mubr.f32.gmra.mrb[56].mxu0 %v1726_v4 }
 0x1a5   : > { %v3151_v27 = vpop.f32.mrb[87].mxu1 }
 0x1a6   : > { %v1388_v49 = vadd.f32 %v3149_v19, %v4133_v25  ;;  %v3152_v51 = vadd.f32 %v3151_v27, %v3150_v46 }
 0x1a8   : > { %v1391_v13 = vadd.f32 %v3152_v51, %v4135_v28  ;;  %v1727_v34 = vmul.f32 %v1674_v23, %v1388_v49 }
 0x1aa   : > { %v3153_v52 = vpop.f32.mrb[88].mxu1  ;;  %3412 = vmatprep.mubr.f32.mxu0 %v1727_v34  ;;  %v1728_v16 = vmul.f32 %v1679_v50, %v1391_v13 }
 0x1ab   : > { %v3154_v55 = vpop.f32.mrb[89].mxu1 }
 0x1ac   : > { %v3155_v58 = vadd.f32 %v3154_v55, %v3153_v52  ;;  %v3156_v60 = vpop.f32.mrb[90].mxu1  ;;  %3413 = vmatmul.mubr.f32.gmra.mrb[58].mxu0 %v1728_v16 }
 0x1ad   : > { %v3157_v62 = vpop.f32.mrb[91].mxu1 }
 0x1ae   : > { %v1396_v0 = vadd.f32 %v3155_v58, %v4141_v39  ;;  %v3158_v35 = vadd.f32 %v3157_v62, %v3156_v60 }
 0x1b0   : > { %v1399_v25 = vadd.f32 %v3158_v35, %v4143_v43  ;;  %v1729_v3 = vmul.f32 %v1684_v31, %v1396_v0 }
 0x1b2   : > { %v3159_v38 = vpop.f32.mrb[92].mxu1  ;;  %3415 = vmatprep.mubr.f32.mxu0 %v1729_v3  ;;  %v1730_v28 = vmul.f32 %v1689_v5, %v1399_v25 }
 0x1b3   : > { %v3160_v6 = vpop.f32.mrb[93].mxu1 }
 0x1b4   : > { %v3161_v36 = vadd.f32 %v3160_v6, %v3159_v38  ;;  %v3162_v8 = vpop.f32.mrb[94].mxu1  ;;  %3416 = vmatmul.mubr.f32.gmra.mrb[60].mxu0 %v1730_v28 }
 0x1b5   : > { %v3163_v10 = vpop.f32.mrb[95].mxu1 }
 0x1b6   : > { %v1404_v59 = vadd.f32 %v3161_v36, %v4149_v57  ;;  %v3164_v12 = vadd.f32 %v3163_v10, %v3162_v8 }
 0x1b8   : > { %v1407_v39 = vadd.f32 %v3164_v12, %v4151_v61  ;;  %v1731_v41 = vmul.f32 %v1694_v14, %v1404_v59 }
 0x1ba   : > { %3418 = vmatprep.mubr.f32.mxu0 %v1731_v41  ;;  %v1732_v43 = vmul.f32 %v1699_v63, %v1407_v39 }
 0x1bc   : > { %3419 = vmatmul.mubr.f32.gmra.mrb[62].mxu0 %v1732_v43 }
 0x217   : > { %v3375_v48 = vpop.f32.mrb[32].mxu0 }
 0x218   : > { %v2287_v44 = vadd.f32 %v3375_v48, %v4196_v15  ;;  %v2120_v17 = vpop.f32.mrb[33].mxu0 }
 0x219   : > { %v2286_v57 = vadd.f32 %v4196_v15, %v2120_v17 }
 0x21b   : > { %v2834_v61 = vpack.c.bf16 %v2287_v44, %v2286_v57 }
 0x21d   : > { %2835 = vst [vmem:[%s4205_s29] sm:$0xff] %v2834_v61  }
 0x21f   : > { %v3378_v18 = vpop.f32.mrb[34].mxu0 }
 0x220   : > { %v2289_v20 = vadd.f32 %v3378_v18, %v4196_v15  ;;  %v2130_v54 = vpop.f32.mrb[35].mxu0 }
 0x221   : > { %v2288_v21 = vadd.f32 %v4196_v15, %v2130_v54 }
 0x223   : > { %v2839_v22 = vpack.c.bf16 %v2289_v20, %v2288_v21 }
 0x225   : > { %2926 = vst [vmem:[%s4205_s29 + $0x8] sm:$0xff] %v2839_v22  }
 0x227   : > { %v3381_v24 = vpop.f32.mrb[36].mxu0 }
 0x228   : > { %v2291_v53 = vadd.f32 %v3381_v24, %v4196_v15  ;;  %v2140_v7 = vpop.f32.mrb[37].mxu0 }
 0x229   : > { %v2290_v26 = vadd.f32 %v4196_v15, %v2140_v7 }
 0x22b   : > { %v2844_v29 = vpack.c.bf16 %v2291_v53, %v2290_v26 }
 0x22d   : > { %2927 = vst [vmem:[%s4205_s29 + $0x10] sm:$0xff] %v2844_v29  }
 0x22f   : > { %v3384_v56 = vpop.f32.mrb[38].mxu0 }
 0x230   : > { %v2293_v30 = vadd.f32 %v3384_v56, %v4196_v15  ;;  %v2150_v2 = vpop.f32.mrb[39].mxu0 }
 0x231   : > { %v2292_v11 = vadd.f32 %v4196_v15, %v2150_v2 }
 0x233   : > { %v2849_v32 = vpack.c.bf16 %v2293_v30, %v2292_v11 }
 0x235   : > { %2928 = vst [vmem:[%s4205_s29 + $0x18] sm:$0xff] %v2849_v32  }
 0x237   : > { %v3387_v33 = vpop.f32.mrb[40].mxu0 }
 0x238   : > { %v2295_v9 = vadd.f32 %v3387_v33, %v4196_v15  ;;  %v2160_v37 = vpop.f32.mrb[41].mxu0 }
 0x239   : > { %v2294_v1 = vadd.f32 %v4196_v15, %v2160_v37 }
 0x23b   : > { %v2854_v40 = vpack.c.bf16 %v2295_v9, %v2294_v1 }
 0x23d   : > { %2929 = vst [vmem:[%s4205_s29 + $0x20] sm:$0xff] %v2854_v40  }
 0x23f   : > { %v3390_v42 = vpop.f32.mrb[42].mxu0 }
 0x240   : > { %v2297_v47 = vadd.f32 %v3390_v42, %v4196_v15  ;;  %v2170_v4 = vpop.f32.mrb[43].mxu0 }
 0x241   : > { %v2296_v45 = vadd.f32 %v4196_v15, %v2170_v4 }
 0x243   : > { %v2859_v19 = vpack.c.bf16 %v2297_v47, %v2296_v45 }
 0x245   : > { %2930 = vst [vmem:[%s4205_s29 + $0x28] sm:$0xff] %v2859_v19  }
 0x247   : > { %v3393_v46 = vpop.f32.mrb[44].mxu0 }
 0x248   : > { %v2299_v27 = vadd.f32 %v3393_v46, %v4196_v15  ;;  %v2180_v49 = vpop.f32.mrb[45].mxu0 }
 0x249   : > { %v2298_v51 = vadd.f32 %v4196_v15, %v2180_v49 }
 0x24b   : > { %v2864_v23 = vpack.c.bf16 %v2299_v27, %v2298_v51 }
 0x24d   : > { %2931 = vst [vmem:[%s4205_s29 + $0x30] sm:$0xff] %v2864_v23  }
 0x24f   : > { %v3396_v13 = vpop.f32.mrb[46].mxu0 }
 0x250   : > { %v2301_v34 = vadd.f32 %v3396_v13, %v4196_v15  ;;  %v2190_v50 = vpop.f32.mrb[47].mxu0 }
 0x251   : > { %v2300_v52 = vadd.f32 %v4196_v15, %v2190_v50 }
 0x253   : > { %v2869_v16 = vpack.c.bf16 %v2301_v34, %v2300_v52 }
 0x255   : > { %2932 = vst [vmem:[%s4205_s29 + $0x38] sm:$0xff] %v2869_v16  }
 0x257   : > { %v3399_v55 = vpop.f32.mrb[48].mxu0 }
 0x258   : > { %v2303_v58 = vadd.f32 %v3399_v55, %v4196_v15  ;;  %v2200_v60 = vpop.f32.mrb[49].mxu0 }
 0x259   : > { %v2302_v62 = vadd.f32 %v4196_v15, %v2200_v60 }
 0x25b   : > { %v2874_v0 = vpack.c.bf16 %v2303_v58, %v2302_v62 }
 0x25d   : > { %2933 = vst [vmem:[%s4205_s29 + $0x40] sm:$0xff] %v2874_v0  }
 0x25f   : > { %v3402_v35 = vpop.f32.mrb[50].mxu0 }
 0x260   : > { %v2305_v31 = vadd.f32 %v3402_v35, %v4196_v15  ;;  %v2210_v25 = vpop.f32.mrb[51].mxu0 }
 0x261   : > { %v2304_v3 = vadd.f32 %v4196_v15, %v2210_v25 }
 0x263   : > { %v2879_v5 = vpack.c.bf16 %v2305_v31, %v2304_v3 }
 0x265   : > { %2934 = vst [vmem:[%s4205_s29 + $0x48] sm:$0xff] %v2879_v5  }
 0x267   : > { %v3405_v38 = vpop.f32.mrb[52].mxu0 }
 0x268   : > { %v2307_v28 = vadd.f32 %v3405_v38, %v4196_v15  ;;  %v2220_v6 = vpop.f32.mrb[53].mxu0 }
 0x269   : > { %v2306_v36 = vadd.f32 %v4196_v15, %v2220_v6 }
 0x26b   : > { %v2884_v8 = vpack.c.bf16 %v2307_v28, %v2306_v36 }
 0x26d   : > { %2935 = vst [vmem:[%s4205_s29 + $0x50] sm:$0xff] %v2884_v8  }
 0x26f   : > { %v3408_v10 = vpop.f32.mrb[54].mxu0 }
 0x270   : > { %v2309_v59 = vadd.f32 %v3408_v10, %v4196_v15  ;;  %v2230_v12 = vpop.f32.mrb[55].mxu0 }
 0x271   : > { %v2308_v14 = vadd.f32 %v4196_v15, %v2230_v12 }
 0x273   : > { %v2889_v39 = vpack.c.bf16 %v2309_v59, %v2308_v14 }
 0x275   : > { %2936 = vst [vmem:[%s4205_s29 + $0x58] sm:$0xff] %v2889_v39  }
 0x277   : > { %v3411_v41 = vpop.f32.mrb[56].mxu0 }
 0x278   : > { %v2311_v63 = vadd.f32 %v3411_v41, %v4196_v15  ;;  %v2240_v43 = vpop.f32.mrb[57].mxu0 }
 0x279   : > { %v2310_v48 = vadd.f32 %v4196_v15, %v2240_v43 }
 0x27b   : > { %v2894_v44 = vpack.c.bf16 %v2311_v63, %v2310_v48 }
 0x27d   : > { %2937 = vst [vmem:[%s4205_s29 + $0x60] sm:$0xff] %v2894_v44  }
 0x27f   : > { %v3414_v17 = vpop.f32.mrb[58].mxu0 }
 0x280   : > { %v2313_v57 = vadd.f32 %v3414_v17, %v4196_v15  ;;  %v2250_v61 = vpop.f32.mrb[59].mxu0 }
 0x281   : > { %v2312_v18 = vadd.f32 %v4196_v15, %v2250_v61 }
 0x283   : > { %v2899_v20 = vpack.c.bf16 %v2313_v57, %v2312_v18 }
 0x285   : > { %2938 = vst [vmem:[%s4205_s29 + $0x68] sm:$0xff] %v2899_v20  }
 0x287   : > { %v3417_v54 = vpop.f32.mrb[60].mxu0 }
 0x288   : > { %v2315_v21 = vadd.f32 %v3417_v54, %v4196_v15  ;;  %v2260_v22 = vpop.f32.mrb[61].mxu0 }
 0x289   : > { %v2314_v24 = vadd.f32 %v4196_v15, %v2260_v22 }
 0x28b   : > { %v2904_v53 = vpack.c.bf16 %v2315_v21, %v2314_v24 }
 0x28d   : > { %2939 = vst [vmem:[%s4205_s29 + $0x70] sm:$0xff] %v2904_v53  }
 0x28f   : > { %v3420_v7 = vpop.f32.mrb[62].mxu0 }
 0x290   : > { %v2317_v26 = vadd.f32 %v3420_v7, %v4196_v15  ;;  %v2270_v29 = vpop.f32.mrb[63].mxu0 }
 0x291   : > { %v2316_v56 = vadd.f32 %v4196_v15, %v2270_v29 }
 0x293   : > { %v2909_v30 = vpack.c.bf16 %v2317_v26, %v2316_v56 }
 0x295   : > { %2940 = vst [vmem:[%s4205_s29 + $0x78] sm:$0xff] %v2909_v30  }
 0x296 PF: > { %s17_s26 = sadd.s32 1, %s3710_s26   ;;  %s4270_s24 = smov %s3706_s25 }
 0x297   : > { %p14_p5 = scmp.ge.s32.totalorder %s17_s26, 4   ;;  %s4271_s25 = smov %s4273_s27 }
 0x299   :  { %16 = sbr.rel (!%p14_p5) target bundleno = 2 (0x2), region = 95 }

// kernel: graphsage_forward.5
= control target key start
LH: loop header
LB: loop body
LE: loop exit
PB: predicated region body
PF: predicated region fallthrough
CT: control target
= control target key end

     0   :  { %s4013_s24 = smov 0   ;;  %s4015_s25 = smov 0   ;;  %s4989_s0 = inlined_call_operand.vmem [shape: bf16[512,512], index: 0, kind: input, shape index: {}]   ;;  %s4990_s1 = inlined_call_operand.vmem [shape: bf16[512,128], index: 1, kind: input, shape index: {}, may-alias: {1,2}]   ;;  %s4991_s2 = inlined_call_operand.vmem [shape: bf16[512,128], index: 2, kind: input, shape index: {}, may-alias: {1,2}]   ;;  %s4992_s3 = inlined_call_operand.vmem [shape: f32[512,1], index: 3, kind: input, shape index: {}]   ;;  %s4993_s4 = inlined_call_operand.vmem [shape: f32[128,128], index: 4, kind: input, shape index: {}]   ;;  %s4994_s5 = inlined_call_operand.vmem [shape: f32[128,128], index: 5, kind: input, shape index: {}]   ;;  %s4995_s6 = inlined_call_operand.vmem [shape: f32[1,128], index: 6, kind: input, shape index: {}]   ;;  %s4996_s7 = inlined_call_operand.vmem [shape: f32[512,128], index: 7, kind: output, shape index: {}]  }
   0x1   :  { %s4017_s26 = smov 0  }
   0x2 LB: > { %s29_s27 = sadd.s32 1, %s3966_s25  ;;  %p2884_p0 = scmp.ge.s32.totalorder %s3970_s26, 1  ;;  %s3970_s26 = sphi %s4017_s26, %s17_s26   ;;  %s3966_s25 = sphi %s4015_s25, %s4998_s25   ;;  %s3962_s24 = sphi %s4013_s24, %s4997_s24  }
   0x3   : > { %p31_p1 = scmp.ge.s32.totalorder %s29_s27, 2  ;;  %p291_p2 = scmp.lt.s32.totalorder %s3970_s26, 3 }
   0x5   : > { %s5000_s27 = smov (%p31_p1, %s29_s27), 0  ;;  %p292_p3 = pnand %p2884_p0, %p291_p2 }
   0x6   : > { %v3692_v0 = vld [vmem:[%s4990_s1 + $0x40] sm:$0xff] (!%p292_p3)   ;;  %s2885_s30 = sshll.u32 (!%p292_p3), %s3962_s24, 5  ;;  %v3694_v2 = vld [vmem:[%s4990_s1 + $0x48] sm:$0xff] (!%p292_p3)   ;;  %v3696_v4 = vld [vmem:[%s4990_s1 + $0x50] sm:$0xff] (!%p292_p3)   ;;  %v3972_v41 = vmov (!%p292_p3), 0  }
   0x7   : > { %295 = sbr.rel (%p292_p3) target bundleno = 977 (0x3d1), region = 48  ;;  %v3693_v1 = vld [vmem:[%s4990_s1] sm:$0xff] (!%p292_p3)   ;;  %3617 = vmatprep.subr.bf16.mxu1 (!%p292_p3), %v3692_v0  ;;  %3073 = vmatprep.subr.bf16.mxu0 (!%p292_p3), %v3692_v0  ;;  %v3695_v3 = vld [vmem:[%s4990_s1 + $0x8] sm:$0xff] (!%p292_p3)   ;;  %p345_p4 = scmp.lt.s32.totalorder (!%p292_p3), %s2885_s30, 63  ;;  %v3697_v5 = vld [vmem:[%s4990_s1 + $0x10] sm:$0xff] (!%p292_p3)  }
   0x8   : > { %3625 = vmatpush3.bf16.msra.mxu1 (!%p292_p3), %v3693_v1  ;;  %3074 = vmatpush3.bf16.msra.mxu0 (!%p292_p3), %v3693_v1  ;;  %v3698_v6 = vld [vmem:[%s4990_s1 + $0x58] sm:$0xff] (!%p292_p3)   ;;  %v3700_v8 = vld [vmem:[%s4990_s1 + $0x60] sm:$0xff] (!%p292_p3)   ;;  %v3702_v10 = vld [vmem:[%s4990_s1 + $0x68] sm:$0xff] (!%p292_p3)  }
   0x9   : > { %3618 = vmatprep.subr.bf16.mxu1 (!%p292_p3), %v3694_v2  ;;  %3075 = vmatprep.subr.bf16.mxu0 (!%p292_p3), %v3694_v2  ;;  %v3699_v7 = vld [vmem:[%s4990_s1 + $0x18] sm:$0xff] (!%p292_p3)   ;;  %v3701_v9 = vld [vmem:[%s4990_s1 + $0x20] sm:$0xff] (!%p292_p3)   ;;  %v3703_v12 = vld [vmem:[%s4990_s1 + $0x28] sm:$0xff] (!%p292_p3)  }
   0xa   : > { %v3704_v13 = vld [vmem:[%s4990_s1 + $0x70] sm:$0xff] (!%p292_p3)   ;;  %v3706_v15 = vld [vmem:[%s4990_s1 + $0x78] sm:$0xff] (!%p292_p3)   ;;  %v3711_v17 = vld [vmem:[%s4990_s1 + $0xc0] sm:$0xff] (!%p292_p3)   ;;  %3690 = vset.pattern.permute.xlu0 (!%p292_p3), %v3972_v41  ;;  %3691 = vset.pattern.permute.xlu1 (!%p292_p3), %v3972_v41 }
   0xb   : > { %v3705_v14 = vld [vmem:[%s4990_s1 + $0x30] sm:$0xff] (!%p292_p3)   ;;  %v3707_v16 = vld [vmem:[%s4990_s1 + $0x38] sm:$0xff] (!%p292_p3)   ;;  %v3712_v19 = vld [vmem:[%s4990_s1 + $0x80] sm:$0xff] (!%p292_p3)  }
   0xc   : > { %3626 = vmatpush3.bf16.msra.mxu1 (!%p292_p3), %v3695_v3  ;;  %3076 = vmatpush3.bf16.msra.mxu0 (!%p292_p3), %v3695_v3  ;;  %v3716_v21 = vld [vmem:[%s4990_s1 + $0xc8] sm:$0xff] (!%p292_p3)   ;;  %v3721_v23 = vld [vmem:[%s4990_s1 + $0xd0] sm:$0xff] (!%p292_p3)   ;;  %v3726_v27 = vld [vmem:[%s4990_s1 + $0xd8] sm:$0xff] (!%p292_p3)  }
   0xd   : > { %3619 = vmatprep.subr.bf16.mxu1 (!%p292_p3), %v3696_v4  ;;  %3077 = vmatprep.subr.bf16.mxu0 (!%p292_p3), %v3696_v4  ;;  %v3717_v22 = vld [vmem:[%s4990_s1 + $0x88] sm:$0xff] (!%p292_p3)   ;;  %v3722_v26 = vld [vmem:[%s4990_s1 + $0x90] sm:$0xff] (!%p292_p3)   ;;  %v3727_v28 = vld [vmem:[%s4990_s1 + $0x98] sm:$0xff] (!%p292_p3)  }
   0xe   : > { %s5002_s30 = smov (!%p345_p4, %s2885_s30), 63  ;;  %v3731_v31 = vld [vmem:[%s4990_s1 + $0xe0] sm:$0xff]   ;;  %v3736_v36 = vld [vmem:[%s4990_s1 + $0xe8] sm:$0xff]   ;;  %v3741_v40 = vld [vmem:[%s4990_s1 + $0xf0] sm:$0xff]  }
   0xf   : > { %s2993_s22 = sshll.u32 %s5002_s30, 4  ;;  %v3732_v35 = vld [vmem:[%s4990_s1 + $0xa0] sm:$0xff]   ;;  %v3737_v37 = vld [vmem:[%s4990_s1 + $0xa8] sm:$0xff]   ;;  %v3742_v44 = vld [vmem:[%s4990_s1 + $0xb0] sm:$0xff]   ;;  %s2891_s19 = sshll.u32 %s5002_s30, 3 }
  0x10   : > { %3627 = vmatpush3.bf16.msra.mxu1 %v3697_v5  ;;  %3078 = vmatpush3.bf16.msra.mxu0 %v3697_v5  ;;  %s4064_s8 = scalar_lea.vmem %s4989_s0, %s2993_s22  ;;  %v3746_v45 = vld [vmem:[%s4990_s1 + $0xf8] sm:$0xff]   ;;  %s4159_s22 = scalar_lea.vmem %s4992_s3, %s2891_s19 }
  0x11   : > { %3620 = vmatprep.subr.bf16.mxu1 %v3698_v6  ;;  %3079 = vmatprep.subr.bf16.mxu0 %v3698_v6  ;;  %v3710_v11 = vld [vmem:[%s4064_s8 + $0x104] ss:$16 sps:$4 sm:$0xff]   ;;  %v3708_v18 = vld [vmem:[%s4064_s8 + $0x100] ss:$16 sps:$4 sm:$0xff]   ;;  %v3747_v46 = vld [vmem:[%s4990_s1 + $0xb8] sm:$0xff]   ;;  %s2889_s23 = sshll.u32 %s5002_s30, 2  ;;  %s4850_s10 = scalar_lea.vmem %s4996_s7, %s2891_s19 }
  0x12   : > { %1184 = vmatprep.mubr.bf16.mxu1 %v3710_v11  ;;  %v3713_v20 = vld [vmem:[%s4064_s8 + $0x124] ss:$16 sps:$4 sm:$0xff]   ;;  %v3715_v24 = vld [vmem:[%s4064_s8 + $0x120] ss:$16 sps:$4 sm:$0xff]   ;;  %v1510_v55 = vld [vmem:[%s4159_s22 + $0x8] sm:$0xff]  ;;  %s4265_s29 = scalar_lea.vmem %s4991_s2, %s2889_s23 }
  0x13   : > { %v3718_v25 = vld [vmem:[%s4064_s8 + $0x144] ss:$16 sps:$4 sm:$0xff]   ;;  %v3748_v29 = vld [vmem:[%s4064_s8] ss:$16 sps:$4 sm:$0xff]   ;;  %v1512_v58 = vld [vmem:[%s4159_s22 + $0x18] sm:$0xff] }
  0x14   : > { %3628 = vmatpush3.bf16.msra.mxu1 %v3699_v7  ;;  %3080 = vmatpush3.bf16.msra.mxu0 %v3699_v7  ;;  %v3750_v30 = vld [vmem:[%s4064_s8 + $0x4] ss:$16 sps:$4 sm:$0xff]   ;;  %v3720_v32 = vld [vmem:[%s4064_s8 + $0x140] ss:$16 sps:$4 sm:$0xff]   ;;  %v1514_v62 = vld [vmem:[%s4159_s22 + $0x28] sm:$0xff] }
  0x15   : > { %3621 = vmatprep.subr.bf16.mxu1 %v3700_v8  ;;  %3081 = vmatprep.subr.bf16.mxu0 %v3700_v8  ;;  %v3754_v33 = vld [vmem:[%s4064_s8 + $0x24] ss:$16 sps:$4 sm:$0xff]   ;;  %v3758_v38 = vld [vmem:[%s4064_s8 + $0x20] ss:$16 sps:$4 sm:$0xff]   ;;  %v1516_v2 = vld [vmem:[%s4159_s22 + $0x38] sm:$0xff] }
  0x16   : > { %1120 = vmatprep.mubr.bf16.mxu0 %v3750_v30  ;;  %v3723_v34 = vld [vmem:[%s4064_s8 + $0x164] ss:$16 sps:$4 sm:$0xff]   ;;  %v3725_v42 = vld [vmem:[%s4064_s8 + $0x160] ss:$16 sps:$4 sm:$0xff]   ;;  %v1518_v6 = vld [vmem:[%s4159_s22 + $0x48] sm:$0xff] }
  0x17   : > { %v3760_v39 = vld [vmem:[%s4064_s8 + $0x44] ss:$16 sps:$4 sm:$0xff]   ;;  %v3764_v47 = vld [vmem:[%s4064_s8 + $0x40] ss:$16 sps:$4 sm:$0xff]  }
  0x18   : > { %3629 = vmatpush3.bf16.msra.mxu1 %v3701_v9  ;;  %3082 = vmatpush3.bf16.msra.mxu0 %v3701_v9  ;;  %v3728_v43 = vld [vmem:[%s4064_s8 + $0x184] ss:$16 sps:$4 sm:$0xff]   ;;  %v3730_v49 = vld [vmem:[%s4064_s8 + $0x180] ss:$16 sps:$4 sm:$0xff]   ;;  %v3753_v9 = vld [vmem:[%s4064_s8 + $0xc] ss:$16 sps:$4 sm:$0xff]  }
  0x19   : > { %3622 = vmatprep.subr.bf16.mxu1 %v3702_v10  ;;  %3083 = vmatprep.subr.bf16.mxu0 %v3702_v10  ;;  %v3766_v48 = vld [vmem:[%s4064_s8 + $0x64] ss:$16 sps:$4 sm:$0xff]   ;;  %v3770_v51 = vld [vmem:[%s4064_s8 + $0x60] ss:$16 sps:$4 sm:$0xff]   ;;  %v1520_v10 = vld [vmem:[%s4159_s22 + $0x58] sm:$0xff] }
  0x1a   : > { %v3733_v50 = vld [vmem:[%s4064_s8 + $0x1a4] ss:$16 sps:$4 sm:$0xff]   ;;  %v3735_v54 = vld [vmem:[%s4064_s8 + $0x1a0] ss:$16 sps:$4 sm:$0xff]  }
  0x1b   : > { %v3772_v52 = vld [vmem:[%s4064_s8 + $0x84] ss:$16 sps:$4 sm:$0xff]   ;;  %v3776_v59 = vld [vmem:[%s4064_s8 + $0x80] ss:$16 sps:$4 sm:$0xff]  }
  0x1c   : > { %3630 = vmatpush3.bf16.msra.mxu1 %v3703_v12  ;;  %3084 = vmatpush3.bf16.msra.mxu0 %v3703_v12  ;;  %v1509_v53 = vld [vmem:[%s4159_s22] sm:$0xff]  ;;  %v1511_v56 = vld [vmem:[%s4159_s22 + $0x10] sm:$0xff] }
  0x1d   : > { %3623 = vmatprep.subr.bf16.mxu1 %v3704_v13  ;;  %3085 = vmatprep.subr.bf16.mxu0 %v3704_v13  ;;  %v3738_v57 = vld [vmem:[%s4064_s8 + $0x1c4] ss:$16 sps:$4 sm:$0xff]   ;;  %v3740_v63 = vld [vmem:[%s4064_s8 + $0x1c0] ss:$16 sps:$4 sm:$0xff]  }
  0x1e   : > { %1543 = vperm.xlu0 %3690, %v1509_v53   ;;  %1553 = vperm.xlu1 %3691, %v1511_v56   ;;  %v1513_v60 = vld [vmem:[%s4159_s22 + $0x20] sm:$0xff]  ;;  %v1515_v0 = vld [vmem:[%s4159_s22 + $0x30] sm:$0xff]  ;;  %v1826_v53 = vld [vmem:[%s4994_s5 + $0x68] sm:$0xff] }
  0x1f   : > { %v3778_v61 = vld [vmem:[%s4064_s8 + $0xa4] ss:$16 sps:$4 sm:$0xff]   ;;  %v3782_v3 = vld [vmem:[%s4064_s8 + $0xa0] ss:$16 sps:$4 sm:$0xff]  }
  0x20   : > { %3631 = vmatpush3.bf16.msra.mxu1 %v3705_v14  ;;  %3086 = vmatpush3.bf16.msra.mxu0 %v3705_v14  ;;  %v3743_v1 = vld [vmem:[%s4064_s8 + $0x1e4] ss:$16 sps:$4 sm:$0xff]   ;;  %v3745_v7 = vld [vmem:[%s4064_s8 + $0x1e0] ss:$16 sps:$4 sm:$0xff]   ;;  %v1814_v14 = vld [vmem:[%s4994_s5 + $0x8] sm:$0xff] }
  0x21   : > { %3624 = vmatprep.subr.bf16.mxu1 %v3706_v15  ;;  %3087 = vmatprep.subr.bf16.mxu0 %v3706_v15  ;;  %v1517_v4 = vld [vmem:[%s4159_s22 + $0x40] sm:$0xff]  ;;  %v1519_v8 = vld [vmem:[%s4159_s22 + $0x50] sm:$0xff] }
  0x22   : > { %1548 = vperm.xlu0 %3690, %v1510_v55   ;;  %1558 = vperm.xlu1 %3691, %v1512_v58   ;;  %v3784_v5 = vld [vmem:[%s4064_s8 + $0xc4] ss:$16 sps:$4 sm:$0xff]   ;;  %v3788_v11 = vld [vmem:[%s4064_s8 + $0xc0] ss:$16 sps:$4 sm:$0xff]   ;;  %v3771_v55 = vld [vmem:[%s4064_s8 + $0x68] ss:$16 sps:$4 sm:$0xff]  }
  0x23   : > { %v1521_v12 = vld [vmem:[%s4159_s22 + $0x60] sm:$0xff]  ;;  %v1819_v30 = vld [vmem:[%s4994_s5 + $0x30] sm:$0xff]  ;;  %v1536_v58 = vld [vmem:[%s4159_s22 + $0xd8] sm:$0xff] }
  0x24   : > { %3632 = vmatpush3.bf16.msra.mxu1 %v3707_v16  ;;  %3088 = vmatpush3.bf16.msra.mxu0 %v3707_v16  ;;  %v1813_v13 = vld [vmem:[%s4994_s5] sm:$0xff]  ;;  %v1535_v56 = vld [vmem:[%s4159_s22 + $0xd0] sm:$0xff] }
  0x25   : > { %3185 = vmatprep.subr.bf16.mxu1 %v3711_v17  ;;  %v3790_v15 = vld [vmem:[%s4064_s8 + $0xe4] ss:$16 sps:$4 sm:$0xff]   ;;  %v3553_v16 = vpack.c.bf16 %v1814_v14, %v1813_v13  ;;  %v1522_v17 = vld [vmem:[%s4159_s22 + $0x68] sm:$0xff] }
  0x26   : > { %1563 = vperm.xlu0 %3690, %v1513_v60   ;;  %1568 = vperm.xlu1 %3691, %v1514_v62   ;;  %v1529_v41 = vld [vmem:[%s4159_s22 + $0xa0] sm:$0xff]  ;;  %v1828_v60 = vld [vmem:[%s4994_s5 + $0x78] sm:$0xff] }
  0x27   : > { %1185 = vmatmul.mubr.bf16.vlgmr.msra.gmra.mrb[0].mxu1 %v3708_v18  ;;  %1121 = vmatmul.mubr.bf16.vlgmr.msra.gmra.mrb[0].mxu0 %v3748_v29  ;;  %v1815_v18 = vld [vmem:[%s4994_s5 + $0x10] sm:$0xff]  ;;  %v1525_v29 = vld [vmem:[%s4159_s22 + $0x80] sm:$0xff]  ;;  %v3783_v13 = vld [vmem:[%s4064_s8 + $0xa8] ss:$16 sps:$4 sm:$0xff]  }
  0x28   : > { %3186 = vmatpush3.bf16.msra.mxu1 %v3712_v19  ;;  %1192 = vmatprep.mubr.bf16.mxu1 %v3713_v20  ;;  %v1816_v19 = vld [vmem:[%s4994_s5 + $0x18] sm:$0xff]  ;;  %v1537_v62 = vld [vmem:[%s4159_s22 + $0xe0] sm:$0xff] }
  0x29   : > { %3187 = vmatprep.subr.bf16.mxu1 %v3716_v21  ;;  %1128 = vmatprep.mubr.bf16.mxu0 %v3754_v33  ;;  %v3751_v20 = vld [vmem:[%s4064_s8 + $0x8] ss:$16 sps:$4 sm:$0xff]   ;;  %v3557_v21 = vpack.c.bf16 %v1816_v19, %v1815_v18  ;;  %v3786_v14 = vld [vmem:[%s4064_s8 + $0xcc] ss:$16 sps:$4 sm:$0xff]   ;;  %v3061_v18 = vld [vmem:[%s4265_s29 + $0x20] sm:$0xff]  }
  0x2a   : > { %1573 = vperm.xlu0 %3690, %v1515_v0   ;;  %1578 = vperm.xlu1 %3691, %v1516_v2   ;;  %v3759_v33 = vld [vmem:[%s4064_s8 + $0x28] ss:$16 sps:$4 sm:$0xff]   ;;  %v3012_v19 = vunpack.c.l.bf16 %v3061_v18 }
  0x2b   : > { %3554 = vmatprep.subr.bf16.mxu0 %v3553_v16  ;;  %v1538_v0 = vld [vmem:[%s4159_s22 + $0xe8] sm:$0xff] }
  0x2c   : > { %3188 = vmatpush3.bf16.msra.mxu1 %v3717_v22  ;;  %v1523_v22 = vld [vmem:[%s4159_s22 + $0x70] sm:$0xff]  ;;  %3556 = vmatpush3.bf16.msra.mxu0 %v3553_v16 }
  0x2d   : > { %3189 = vmatprep.subr.bf16.mxu1 %v3721_v23  ;;  %v1817_v23 = vld [vmem:[%s4994_s5 + $0x20] sm:$0xff]  ;;  %3558 = vmatprep.subr.bf16.mxu0 %v3557_v21 }
  0x2e   : > { %1583 = vperm.xlu0 %3690, %v1517_v4   ;;  %1588 = vperm.xlu1 %3691, %v1518_v6   ;;  %v1539_v4 = vld [vmem:[%s4159_s22 + $0xf0] sm:$0xff]  ;;  %v3058_v6 = vld [vmem:[%s4265_s29 + $0x8] sm:$0xff]  }
  0x2f   : > { %1193 = vmatmul.mubr.bf16.gmra.mrb[4].mxu1 %v3715_v24  ;;  %1129 = vmatmul.mubr.bf16.gmra.mrb[4].mxu0 %v3758_v38  ;;  %v1818_v24 = vld [vmem:[%s4994_s5 + $0x28] sm:$0xff] }
  0x30   : > { %1200 = vmatprep.mubr.bf16.mxu1 %v3718_v25  ;;  %3190 = vmatpush3.bf16.msra.mxu1 %v3722_v26  ;;  %v3756_v25 = vld [vmem:[%s4064_s8 + $0x2c] ss:$16 sps:$4 sm:$0xff]  }
  0x31   : > { %3191 = vmatprep.subr.bf16.mxu1 %v3726_v27  ;;  %1136 = vmatprep.mubr.bf16.mxu0 %v3760_v39  ;;  %v1524_v26 = vld [vmem:[%s4159_s22 + $0x78] sm:$0xff]  ;;  %v3794_v27 = vld [vmem:[%s4064_s8 + $0xe0] ss:$16 sps:$4 sm:$0xff]  }
  0x32   : > { %1593 = vperm.xlu0 %3690, %v1519_v8   ;;  %1598 = vperm.xlu1 %3691, %v1520_v10   ;;  %v3762_v38 = vld [vmem:[%s4064_s8 + $0x4c] ss:$16 sps:$4 sm:$0xff]   ;;  %v3000_v8 = vunpack.c.l.bf16 %v3058_v6  ;;  %v3059_v10 = vld [vmem:[%s4265_s29 + $0x10] sm:$0xff]  }
  0x33   : > { %3560 = vmatpush3.bf16.msra.mxu0 %v3557_v21  ;;  %v1528_v39 = vld [vmem:[%s4159_s22 + $0x98] sm:$0xff] }
  0x34   : > { %3192 = vmatpush3.bf16.msra.mxu1 %v3727_v28  ;;  %v3561_v28 = vpack.c.bf16 %v1818_v24, %v1817_v23  ;;  %v3789_v21 = vld [vmem:[%s4064_s8 + $0xc8] ss:$16 sps:$4 sm:$0xff]  }
  0x35   : > { %3193 = vmatprep.subr.bf16.mxu1 %v3731_v31  ;;  %v1820_v31 = vld [vmem:[%s4994_s5 + $0x38] sm:$0xff]  ;;  %v3062_v23 = vld [vmem:[%s4265_s29 + $0x28] sm:$0xff]  }
  0x36   : > { %1603 = vperm.xlu0 %3690, %v1521_v12   ;;  %1608 = vperm.xlu1 %3691, %v1522_v17   ;;  %v3005_v12 = vunpack.c.h.bf16 %v3059_v10  ;;  %v3016_v24 = vunpack.c.l.bf16 %v3062_v23 }
  0x37   : > { %1201 = vmatmul.mubr.bf16.gmra.mrb[8].mxu1 %v3720_v32  ;;  %1137 = vmatmul.mubr.bf16.gmra.mrb[8].mxu0 %v3764_v47  ;;  %v1526_v32 = vld [vmem:[%s4159_s22 + $0x88] sm:$0xff]  ;;  %v1531_v47 = vld [vmem:[%s4159_s22 + $0xb0] sm:$0xff] }
  0x38   : > { %1208 = vmatprep.mubr.bf16.mxu1 %v3723_v34  ;;  %3194 = vmatpush3.bf16.msra.mxu1 %v3732_v35  ;;  %v3565_v34 = vpack.c.bf16 %v1820_v31, %v1819_v30  ;;  %v1527_v35 = vld [vmem:[%s4159_s22 + $0x90] sm:$0xff]  ;;  %v3796_v30 = vld [vmem:[%s4064_s8 + $0x10c] ss:$16 sps:$4 sm:$0xff]  }
  0x39   : > { %3195 = vmatprep.subr.bf16.mxu1 %v3736_v36  ;;  %1144 = vmatprep.mubr.bf16.mxu0 %v3766_v48  ;;  %v1821_v36 = vld [vmem:[%s4994_s5 + $0x40] sm:$0xff]  ;;  %v3768_v48 = vld [vmem:[%s4064_s8 + $0x6c] ss:$16 sps:$4 sm:$0xff]  }
  0x3a   : > { %1613 = vperm.xlu0 %3690, %v1523_v22   ;;  %1618 = vperm.xlu1 %3691, %v1524_v26   ;;  %v3792_v22 = vld [vmem:[%s4064_s8 + $0xec] ss:$16 sps:$4 sm:$0xff]   ;;  %v3063_v26 = vld [vmem:[%s4265_s29 + $0x30] sm:$0xff]  }
  0x3b   : > { %3562 = vmatprep.subr.bf16.mxu0 %v3561_v28  ;;  %v3064_v31 = vld [vmem:[%s4265_s29 + $0x38] sm:$0xff]  }
  0x3c   : > { %3196 = vmatpush3.bf16.msra.mxu1 %v3737_v37  ;;  %v1822_v37 = vld [vmem:[%s4994_s5 + $0x48] sm:$0xff]  ;;  %3564 = vmatpush3.bf16.msra.mxu0 %v3561_v28  ;;  %v3021_v28 = vunpack.c.h.bf16 %v3063_v26 }
  0x3d   : > { %3197 = vmatprep.subr.bf16.mxu1 %v3741_v40  ;;  %3566 = vmatprep.subr.bf16.mxu0 %v3565_v34  ;;  %v3569_v40 = vpack.c.bf16 %v1822_v37, %v1821_v36  ;;  %v1797_v36 = vld [vmem:[%s4993_s4] sm:$0xff]  ;;  %v1798_v37 = vld [vmem:[%s4993_s4 + $0x8] sm:$0xff] }
  0x3e   : > { %1623 = vperm.xlu0 %3690, %v1525_v29   ;;  %1628 = vperm.xlu1 %3691, %v1526_v32   ;;  %v3795_v29 = vld [vmem:[%s4064_s8 + $0xe8] ss:$16 sps:$4 sm:$0xff]   ;;  %v3024_v32 = vunpack.c.l.bf16 %v3064_v31 }
  0x3f   : > { %1209 = vmatmul.mubr.bf16.gmra.mrb[12].mxu1 %v3725_v42  ;;  %1145 = vmatmul.mubr.bf16.gmra.mrb[12].mxu0 %v3770_v51  ;;  %v1823_v42 = vld [vmem:[%s4994_s5 + $0x50] sm:$0xff]  ;;  %v1534_v51 = vld [vmem:[%s4159_s22 + $0xc8] sm:$0xff] }
  0x40   : > { %1216 = vmatprep.mubr.bf16.mxu1 %v3728_v43  ;;  %3198 = vmatpush3.bf16.msra.mxu1 %v3742_v44  ;;  %v1824_v43 = vld [vmem:[%s4994_s5 + $0x58] sm:$0xff]  ;;  %v1530_v44 = vld [vmem:[%s4159_s22 + $0xa8] sm:$0xff] }
  0x41   : > { %3199 = vmatprep.subr.bf16.mxu1 %v3746_v45  ;;  %1152 = vmatprep.mubr.bf16.mxu0 %v3772_v52  ;;  %v3573_v45 = vpack.c.bf16 %v1824_v43, %v1823_v42  ;;  %v1825_v52 = vld [vmem:[%s4994_s5 + $0x60] sm:$0xff]  ;;  %v3066_v42 = vld [vmem:[%s4265_s29 + $0x48] sm:$0xff]  }
  0x42   : > { %1633 = vperm.xlu0 %3690, %v1527_v35   ;;  %1638 = vperm.xlu1 %3691, %v1528_v39   ;;  %v3585_v39 = vpack.c.bf16 %v1798_v37, %v1797_v36  ;;  %v3032_v43 = vunpack.c.l.bf16 %v3066_v42 }
  0x43   : > { %3568 = vmatpush3.bf16.msra.mxu0 %v3565_v34  ;;  %v3065_v34 = vld [vmem:[%s4265_s29 + $0x40] sm:$0xff]  }
  0x44   : > { %3200 = vmatpush3.bf16.msra.mxu1 %v3747_v46  ;;  %3570 = vmatprep.subr.bf16.mxu0 %v3569_v40  ;;  %v3765_v46 = vld [vmem:[%s4064_s8 + $0x48] ss:$16 sps:$4 sm:$0xff]   ;;  %v3028_v35 = vunpack.c.l.bf16 %v3065_v34 }
  0x46   : > { %1643 = vperm.xlu0 %3690, %v1529_v41   ;;  %1648 = vperm.xlu1 %3691, %v1530_v44   ;;  %v3799_v41 = vld [vmem:[%s4064_s8 + $0x12c] ss:$16 sps:$4 sm:$0xff]   ;;  %v1799_v44 = vld [vmem:[%s4993_s4 + $0x10] sm:$0xff] }
  0x47   : > { %1217 = vmatmul.mubr.bf16.gmra.mrb[16].mxu1 %v3730_v49  ;;  %1153 = vmatmul.mubr.bf16.gmra.mrb[16].mxu0 %v3776_v59  ;;  %v1532_v49 = vld [vmem:[%s4159_s22 + $0xb8] sm:$0xff]  ;;  %v1827_v59 = vld [vmem:[%s4994_s5 + $0x70] sm:$0xff] }
  0x48   : > { %1224 = vmatprep.mubr.bf16.mxu1 %v3733_v50  ;;  %1160 = vmatprep.mubr.bf16.mxu0 %v3778_v61  ;;  %v1533_v50 = vld [vmem:[%s4159_s22 + $0xc0] sm:$0xff]  ;;  %v3581_v61 = vpack.c.bf16 %v1828_v60, %v1827_v59  ;;  %v1804_v59 = vld [vmem:[%s4993_s4 + $0x38] sm:$0xff] }
  0x49   : > { %3572 = vmatpush3.bf16.msra.mxu0 %v3569_v40  ;;  %v3798_v40 = vld [vmem:[%s4064_s8 + $0x108] ss:$16 sps:$4 sm:$0xff]  }
  0x4a   : > { %1653 = vperm.xlu0 %3690, %v1531_v47   ;;  %3574 = vmatprep.subr.bf16.mxu0 %v3573_v45 }
  0x4b   : > { %1658 = vperm.xlu1 %3691, %v1532_v49  }
  0x4d   : > { %3576 = vmatpush3.bf16.msra.mxu0 %v3573_v45  ;;  %v1800_v45 = vld [vmem:[%s4993_s4 + $0x18] sm:$0xff] }
  0x4e   : > { %1663 = vperm.xlu0 %3690, %v1533_v50   ;;  %v3589_v47 = vpack.c.bf16 %v1800_v45, %v1799_v44  ;;  %v1801_v50 = vld [vmem:[%s4993_s4 + $0x20] sm:$0xff] }
  0x4f   : > { %1225 = vmatmul.mubr.bf16.gmra.mrb[20].mxu1 %v3735_v54  ;;  %1161 = vmatmul.mubr.bf16.gmra.mrb[20].mxu0 %v3782_v3  ;;  %v3577_v54 = vpack.c.bf16 %v1826_v53, %v1825_v52  ;;  %v3777_v3 = vld [vmem:[%s4064_s8 + $0x88] ss:$16 sps:$4 sm:$0xff]  }
  0x50   : > { %1232 = vmatprep.mubr.bf16.mxu1 %v3738_v57  ;;  %1168 = vmatprep.mubr.bf16.mxu0 %v3784_v5  ;;  %v3774_v57 = vld [vmem:[%s4064_s8 + $0x8c] ss:$16 sps:$4 sm:$0xff]  }
  0x51   : > { %1668 = vperm.xlu1 %3691, %v1534_v51   ;;  %3578 = vmatprep.subr.bf16.mxu0 %v3577_v54  ;;  %v3780_v5 = vld [vmem:[%s4064_s8 + $0xac] ss:$16 sps:$4 sm:$0xff]  }
  0x52   : > { %3580 = vmatpush3.bf16.msra.mxu0 %v3577_v54  ;;  %1673 = vperm.xlu0 %3690, %v1535_v56   ;;  %v1802_v51 = vld [vmem:[%s4993_s4 + $0x28] sm:$0xff]  ;;  %v3068_v56 = vld [vmem:[%s4265_s29 + $0x58] sm:$0xff]  }
  0x53   : > { %3582 = vmatprep.subr.bf16.mxu0 %v3581_v61  ;;  %v3593_v53 = vpack.c.bf16 %v1802_v51, %v1801_v50  ;;  %v3801_v54 = vld [vmem:[%s4064_s8 + $0x128] ss:$16 sps:$4 sm:$0xff]   ;;  %v3041_v60 = vunpack.c.h.bf16 %v3068_v56 }
  0x55   : > { %1678 = vperm.xlu1 %3691, %v1536_v58   ;;  %v1803_v58 = vld [vmem:[%s4993_s4 + $0x30] sm:$0xff] }
  0x56   : > { %1683 = vperm.xlu0 %3690, %v1537_v62   ;;  %3584 = vmatpush3.bf16.msra.mxu0 %v3581_v61  ;;  %v3597_v61 = vpack.c.bf16 %v1804_v59, %v1803_v58  ;;  %v3069_v62 = vld [vmem:[%s4265_s29 + $0x60] sm:$0xff]  }
  0x57   : > { %1233 = vmatmul.mubr.bf16.gmra.mrb[24].mxu1 %v3740_v63  ;;  %1169 = vmatmul.mubr.bf16.gmra.mrb[24].mxu0 %v3788_v11  ;;  %v2995_v63 = vld [vmem:[%s4265_s29] sm:$0xff]   ;;  %v3004_v11 = vunpack.c.l.bf16 %v3059_v10 }
  0x58   : > { %1240 = vmatprep.mubr.bf16.mxu1 %v3743_v1  ;;  %1176 = vmatprep.mubr.bf16.mxu0 %v3790_v15  ;;  %v2996_v1 = vunpack.c.l.bf16 %v2995_v63  ;;  %v2997_v2 = vunpack.c.h.bf16 %v2995_v63  ;;  %v3060_v15 = vld [vmem:[%s4265_s29 + $0x18] sm:$0xff]   ;;  %v3044_v63 = vunpack.c.l.bf16 %v3069_v62 }
  0x59   : > { %1688 = vperm.xlu1 %3691, %v1538_v0   ;;  %v3008_v16 = vunpack.c.l.bf16 %v3060_v15  ;;  %v3009_v17 = vunpack.c.h.bf16 %v3060_v15  ;;  %3586 = vmatprep.subr.bf16.mxu0 %v3585_v39  ;;  %v1805_v0 = vld [vmem:[%s4993_s4 + $0x40] sm:$0xff]  ;;  %v1810_v15 = vld [vmem:[%s4993_s4 + $0x68] sm:$0xff] }
  0x5a   : > { %1693 = vperm.xlu0 %3690, %v1539_v4   ;;  %v3804_v4 = vld [vmem:[%s4064_s8 + $0x148] ss:$16 sps:$4 sm:$0xff]  }
  0x5f   : > { %1241 = vmatmul.mubr.bf16.gmra.mrb[28].mxu1 %v3745_v7  ;;  %1177 = vmatmul.mubr.bf16.gmra.mrb[28].mxu0 %v3794_v27  ;;  %v1540_v7 = vld [vmem:[%s4159_s22 + $0xf8] sm:$0xff]  ;;  %v3020_v27 = vunpack.c.l.bf16 %v3063_v26 }
  0x60   : > { %1281 = vmatprep.mubr.bf16.mxu1 %v3753_v9  ;;  %3425 = vmatprep.mubr.f32.mxu0 %v2996_v1  ;;  %v3001_v9 = vunpack.c.h.bf16 %v3058_v6  ;;  %v1806_v1 = vld [vmem:[%s4993_s4 + $0x48] sm:$0xff] }
  0x61   : > { %1698 = vperm.xlu1 %3691, %v1540_v7   ;;  %v3070_v6 = vld [vmem:[%s4265_s29 + $0x68] sm:$0xff]  }
  0x62   : > { %v3048_v7 = vunpack.c.l.bf16 %v3070_v6  ;;  %v3049_v10 = vunpack.c.h.bf16 %v3070_v6  ;;  %v3810_v26 = vld [vmem:[%s4064_s8 + $0x188] ss:$16 sps:$4 sm:$0xff]  }
  0x67   : > { %1282 = vmatmul.mubr.bf16.vlgmr.msra.gmra.mrb[32].mxu1 %v3751_v20  ;;  %3426 = vmatmul.mubr.f32.vlgmr.msra.gmra.mrb[32].mxu0 %v2997_v2  ;;  %v3013_v20 = vunpack.c.h.bf16 %v3061_v18  ;;  %v3045_v2 = vunpack.c.h.bf16 %v3069_v62  ;;  %v3807_v18 = vld [vmem:[%s4064_s8 + $0x168] ss:$16 sps:$4 sm:$0xff]  }
  0x68   : > { %1289 = vmatprep.mubr.bf16.mxu1 %v3756_v25  ;;  %3428 = vmatprep.mubr.f32.mxu0 %v3000_v8  ;;  %v3017_v25 = vunpack.c.h.bf16 %v3062_v23  ;;  %v1807_v8 = vld [vmem:[%s4993_s4 + $0x50] sm:$0xff]  ;;  %v1812_v23 = vld [vmem:[%s4993_s4 + $0x78] sm:$0xff] }
  0x69   : > { %3588 = vmatpush3.bf16.msra.mxu0 %v3585_v39 }
  0x6a   : > { %3590 = vmatprep.subr.bf16.mxu0 %v3589_v47 }
  0x6b   : > { %3429 = vmatmul.mubr.f32.gmra.mrb[34].mxu0 %v3001_v9  ;;  %v1808_v9 = vld [vmem:[%s4993_s4 + $0x58] sm:$0xff] }
  0x6c   : > { %3431 = vmatprep.mubr.f32.mxu0 %v3004_v11  ;;  %v3605_v11 = vpack.c.bf16 %v1808_v9, %v1807_v8 }
  0x6d   : > { %3592 = vmatpush3.bf16.msra.mxu0 %v3589_v47 }
  0x6e   : > { %3594 = vmatprep.subr.bf16.mxu0 %v3593_v53 }
  0x6f   : > { %1290 = vmatmul.mubr.bf16.gmra.mrb[36].mxu1 %v3759_v33  ;;  %3432 = vmatmul.mubr.f32.gmra.mrb[36].mxu0 %v3005_v12  ;;  %v3025_v33 = vunpack.c.h.bf16 %v3064_v31  ;;  %v3071_v12 = vld [vmem:[%s4265_s29 + $0x70] sm:$0xff]   ;;  %v3817_v31 = vld [vmem:[%s4064_s8 + $0x1ec] ss:$16 sps:$4 sm:$0xff]  }
  0x70   : > { %1297 = vmatprep.mubr.bf16.mxu1 %v3762_v38  ;;  %3434 = vmatprep.mubr.f32.mxu0 %v3008_v16  ;;  %v3029_v38 = vunpack.c.h.bf16 %v3065_v34  ;;  %v3053_v16 = vunpack.c.h.bf16 %v3071_v12 }
  0x71   : > { %3596 = vmatpush3.bf16.msra.mxu0 %v3593_v53 }
  0x72   : > { %3598 = vmatprep.subr.bf16.mxu0 %v3597_v61 }
  0x73   : > { %3435 = vmatmul.mubr.f32.gmra.mrb[38].mxu0 %v3009_v17 }
  0x74   : > { %3437 = vmatprep.mubr.f32.mxu0 %v3012_v19  ;;  %v3808_v19 = vld [vmem:[%s4064_s8 + $0x18c] ss:$16 sps:$4 sm:$0xff]  }
  0x75   : > { %3600 = vmatpush3.bf16.msra.mxu0 %v3597_v61 }
  0x77   : > { %1298 = vmatmul.mubr.bf16.gmra.mrb[40].mxu1 %v3765_v46  ;;  %3438 = vmatmul.mubr.f32.gmra.mrb[40].mxu0 %v3013_v20  ;;  %v3033_v46 = vunpack.c.h.bf16 %v3066_v42  ;;  %v3072_v20 = vld [vmem:[%s4265_s29 + $0x78] sm:$0xff]  }
  0x78   : > { %1305 = vmatprep.mubr.bf16.mxu1 %v3768_v48  ;;  %3440 = vmatprep.mubr.f32.mxu0 %v3016_v24  ;;  %v3067_v48 = vld [vmem:[%s4265_s29 + $0x50] sm:$0xff]   ;;  %v3057_v24 = vunpack.c.h.bf16 %v3072_v20 }
  0x79   : > { %v3036_v49 = vunpack.c.l.bf16 %v3067_v48  ;;  %v3037_v52 = vunpack.c.h.bf16 %v3067_v48 }
  0x7b   : > { %3441 = vmatmul.mubr.f32.gmra.mrb[42].mxu0 %v3017_v25 }
  0x7c   : > { %3443 = vmatprep.mubr.f32.mxu0 %v3020_v27  ;;  %v3811_v27 = vld [vmem:[%s4064_s8 + $0x1ac] ss:$16 sps:$4 sm:$0xff]  }
  0x7f   : > { %1306 = vmatmul.mubr.bf16.gmra.mrb[44].mxu1 %v3771_v55  ;;  %3444 = vmatmul.mubr.f32.gmra.mrb[44].mxu0 %v3021_v28  ;;  %v3802_v55 = vld [vmem:[%s4064_s8 + $0x14c] ss:$16 sps:$4 sm:$0xff]   ;;  %v3813_v28 = vld [vmem:[%s4064_s8 + $0x1a8] ss:$16 sps:$4 sm:$0xff]  }
  0x80   : > { %1313 = vmatprep.mubr.bf16.mxu1 %v3774_v57  ;;  %3446 = vmatprep.mubr.f32.mxu0 %v3024_v32  ;;  %v3040_v57 = vunpack.c.l.bf16 %v3068_v56  ;;  %v3819_v32 = vld [vmem:[%s4064_s8 + $0x1e8] ss:$16 sps:$4 sm:$0xff]  }
  0x83   : > { %3447 = vmatmul.mubr.f32.gmra.mrb[46].mxu0 %v3025_v33 }
  0x84   : > { %3449 = vmatprep.mubr.f32.mxu0 %v3028_v35 }
  0x87   : > { %1314 = vmatmul.mubr.bf16.gmra.mrb[48].mxu1 %v3777_v3  ;;  %3450 = vmatmul.mubr.f32.gmra.mrb[48].mxu0 %v3029_v38  ;;  %v3601_v3 = vpack.c.bf16 %v1806_v1, %v1805_v0 }
  0x88   : > { %1321 = vmatprep.mubr.bf16.mxu1 %v3780_v5  ;;  %3452 = vmatprep.mubr.f32.mxu0 %v3032_v43  ;;  %v3805_v5 = vld [vmem:[%s4064_s8 + $0x16c] ss:$16 sps:$4 sm:$0xff]  }
  0x89   : > { %3602 = vmatprep.subr.bf16.mxu0 %v3601_v3 }
  0x8a   : > { %3604 = vmatpush3.bf16.msra.mxu0 %v3601_v3 }
  0x8b   : > { %3453 = vmatmul.mubr.f32.gmra.mrb[50].mxu0 %v3033_v46  ;;  %3606 = vmatprep.subr.bf16.mxu0 %v3605_v11 }
  0x8c   : > { %3455 = vmatprep.mubr.f32.mxu0 %v3036_v49 }
  0x8e   : > { %3608 = vmatpush3.bf16.msra.mxu0 %v3605_v11 }
  0x8f   : > { %1322 = vmatmul.mubr.bf16.gmra.mrb[52].mxu1 %v3783_v13  ;;  %3456 = vmatmul.mubr.f32.gmra.mrb[52].mxu0 %v3037_v52  ;;  %v3052_v13 = vunpack.c.l.bf16 %v3071_v12 }
  0x90   : > { %1329 = vmatprep.mubr.bf16.mxu1 %v3786_v14  ;;  %3458 = vmatprep.mubr.f32.mxu0 %v3040_v57  ;;  %v1809_v14 = vld [vmem:[%s4993_s4 + $0x60] sm:$0xff] }
  0x91   : > { %v3609_v17 = vpack.c.bf16 %v1810_v15, %v1809_v14 }
  0x93   : > { %3459 = vmatmul.mubr.f32.gmra.mrb[54].mxu0 %v3041_v60  ;;  %3610 = vmatprep.subr.bf16.mxu0 %v3609_v17 }
  0x94   : > { %3461 = vmatprep.mubr.f32.mxu0 %v3044_v63  ;;  %3612 = vmatpush3.bf16.msra.mxu0 %v3609_v17 }
  0x97   : > { %1330 = vmatmul.mubr.bf16.gmra.mrb[56].mxu1 %v3789_v21  ;;  %3462 = vmatmul.mubr.f32.gmra.mrb[56].mxu0 %v3045_v2  ;;  %v3056_v21 = vunpack.c.l.bf16 %v3072_v20 }
  0x98   : > { %1337 = vmatprep.mubr.bf16.mxu1 %v3792_v22  ;;  %3464 = vmatprep.mubr.f32.mxu0 %v3048_v7  ;;  %v1811_v22 = vld [vmem:[%s4993_s4 + $0x70] sm:$0xff] }
  0x99   : > { %v3613_v25 = vpack.c.bf16 %v1812_v23, %v1811_v22 }
  0x9b   : > { %3465 = vmatmul.mubr.f32.gmra.mrb[58].mxu0 %v3049_v10  ;;  %3614 = vmatprep.subr.bf16.mxu0 %v3613_v25 }
  0x9c   : > { %3467 = vmatprep.mubr.f32.mxu0 %v3052_v13  ;;  %3616 = vmatpush3.bf16.msra.mxu0 %v3613_v25 }
  0x9f   : > { %1338 = vmatmul.mubr.bf16.gmra.mrb[60].mxu1 %v3795_v29  ;;  %3468 = vmatmul.mubr.f32.gmra.mrb[60].mxu0 %v3053_v16  ;;  %v3814_v29 = vld [vmem:[%s4064_s8 + $0x1cc] ss:$16 sps:$4 sm:$0xff]  }
  0xa0   : > { %1345 = vmatprep.mubr.bf16.mxu1 %v3796_v30  ;;  %3470 = vmatprep.mubr.f32.mxu0 %v3056_v21  ;;  %v3816_v30 = vld [vmem:[%s4064_s8 + $0x1c8] ss:$16 sps:$4 sm:$0xff]  }
  0xa3   : > { %3471 = vmatmul.mubr.f32.gmra.mrb[62].mxu0 %v3057_v24 }
  0xa7   : > { %1346 = vmatmul.mubr.bf16.gmra.mrb[64].mxu1 %v3798_v40 }
  0xa8   : > { %1353 = vmatprep.mubr.bf16.mxu1 %v3799_v41 }
  0xaf   : > { %1354 = vmatmul.mubr.bf16.gmra.mrb[68].mxu1 %v3801_v54 }
  0xb0   : > { %1361 = vmatprep.mubr.bf16.mxu1 %v3802_v55 }
  0xb7   : > { %1362 = vmatmul.mubr.bf16.gmra.mrb[72].mxu1 %v3804_v4 }
  0xb8   : > { %1369 = vmatprep.mubr.bf16.mxu1 %v3805_v5 }
  0xbf   : > { %1370 = vmatmul.mubr.bf16.gmra.mrb[76].mxu1 %v3807_v18 }
  0xc0   : > { %1377 = vmatprep.mubr.bf16.mxu1 %v3808_v19 }
  0xc7   : > { %1378 = vmatmul.mubr.bf16.gmra.mrb[80].mxu1 %v3810_v26 }
  0xc8   : > { %1385 = vmatprep.mubr.bf16.mxu1 %v3811_v27 }
  0xcf   : > { %1386 = vmatmul.mubr.bf16.gmra.mrb[84].mxu1 %v3813_v28 }
  0xd0   : > { %1393 = vmatprep.mubr.bf16.mxu1 %v3814_v29 }
  0xd7   : > { %1394 = vmatmul.mubr.bf16.gmra.mrb[88].mxu1 %v3816_v30 }
  0xd8   : > { %1401 = vmatprep.mubr.bf16.mxu1 %v3817_v31 }
  0xdf   : > { %1402 = vmatmul.mubr.bf16.gmra.mrb[92].mxu1 %v3819_v32 }
  0xfa   : > { %v3137_v33 = vpop.f32.mrb[0].mxu1  ;;  %v3089_v45 = vpop.f32.mrb[0].mxu0 }
  0xfb   : > { %v3138_v34 = vpop.f32.mrb[1].mxu1  ;;  %v3090_v46 = vpop.f32.mrb[1].mxu0 }
  0xfc   : > { %v4357_v35 = vadd.f32 %v3138_v34, %v3137_v33  ;;  %v3140_v36 = vpop.f32.mrb[2].mxu1  ;;  %v4365_v47 = vadd.f32 %v3090_v46, %v3089_v45  ;;  %v3092_v48 = vpop.f32.mrb[2].mxu0 }
  0xfd   : > { %v3141_v37 = vpop.f32.mrb[3].mxu1  ;;  %v3093_v49 = vpop.f32.mrb[3].mxu0 }
  0xfe   : > { %v4359_v38 = vadd.f32 %v3141_v37, %v3140_v36  ;;  %v4367_v51 = vadd.f32 %v3093_v49, %v3092_v48 }
 0x102   : > { %v3143_v39 = vpop.f32.mrb[4].mxu1  ;;  %v3095_v57 = vpop.f32.mrb[4].mxu0 }
 0x103   : > { %v3144_v40 = vpop.f32.mrb[5].mxu1  ;;  %v3096_v58 = vpop.f32.mrb[5].mxu0 }
 0x104   : > { %v4361_v41 = vadd.f32 %v3144_v40, %v3143_v39  ;;  %v3146_v42 = vpop.f32.mrb[6].mxu1  ;;  %v4373_v59 = vadd.f32 %v3096_v58, %v3095_v57  ;;  %v3098_v60 = vpop.f32.mrb[6].mxu0 }
 0x105   : > { %v3147_v43 = vpop.f32.mrb[7].mxu1  ;;  %v3099_v61 = vpop.f32.mrb[7].mxu0 }
 0x106   : > { %v4363_v44 = vadd.f32 %v3147_v43, %v3146_v42  ;;  %v4375_v63 = vadd.f32 %v3099_v61, %v3098_v60 }
 0x10a   : > { %v3149_v50 = vpop.f32.mrb[8].mxu1  ;;  %v3101_v5 = vpop.f32.mrb[8].mxu0 }
 0x10b   : > { %v3150_v52 = vpop.f32.mrb[9].mxu1  ;;  %v3102_v6 = vpop.f32.mrb[9].mxu0 }
 0x10c   : > { %v4369_v53 = vadd.f32 %v3150_v52, %v3149_v50  ;;  %v3152_v54 = vpop.f32.mrb[10].mxu1  ;;  %v4381_v7 = vadd.f32 %v3102_v6, %v3101_v5  ;;  %v3104_v8 = vpop.f32.mrb[10].mxu0 }
 0x10d   : > { %v3153_v55 = vpop.f32.mrb[11].mxu1  ;;  %v3105_v9 = vpop.f32.mrb[11].mxu0 }
 0x10e   : > { %v4371_v56 = vadd.f32 %v3153_v55, %v3152_v54  ;;  %v4383_v11 = vadd.f32 %v3105_v9, %v3104_v8  ;;  %v1544_v9 = vpop.permute.xlu0 %1543 }
 0x112   : > { %v3155_v62 = vpop.f32.mrb[12].mxu1  ;;  %v3107_v17 = vpop.f32.mrb[12].mxu0 }
 0x113   : > { %v3156_v0 = vpop.f32.mrb[13].mxu1  ;;  %v3108_v18 = vpop.f32.mrb[13].mxu0 }
 0x114   : > { %v4377_v1 = vadd.f32 %v3156_v0, %v3155_v62  ;;  %v3158_v2 = vpop.f32.mrb[14].mxu1  ;;  %v4389_v19 = vadd.f32 %v3108_v18, %v3107_v17  ;;  %v3110_v20 = vpop.f32.mrb[14].mxu0 }
 0x115   : > { %v3159_v3 = vpop.f32.mrb[15].mxu1  ;;  %v3111_v21 = vpop.f32.mrb[15].mxu0 }
 0x116   : > { %v4379_v4 = vadd.f32 %v3159_v3, %v3158_v2  ;;  %v4391_v23 = vadd.f32 %v3111_v21, %v3110_v20 }
 0x11a   : > { %v3161_v10 = vpop.f32.mrb[16].mxu1  ;;  %v3113_v29 = vpop.f32.mrb[16].mxu0 }
 0x11b   : > { %v3162_v12 = vpop.f32.mrb[17].mxu1  ;;  %v3114_v30 = vpop.f32.mrb[17].mxu0 }
 0x11c   : > { %v4385_v13 = vadd.f32 %v3162_v12, %v3161_v10  ;;  %v3164_v14 = vpop.f32.mrb[18].mxu1  ;;  %v4397_v31 = vadd.f32 %v3114_v30, %v3113_v29  ;;  %v3116_v32 = vpop.f32.mrb[18].mxu0 }
 0x11d   : > { %v3165_v15 = vpop.f32.mrb[19].mxu1  ;;  %v3117_v33 = vpop.f32.mrb[19].mxu0 }
 0x11e   : > { %v4387_v16 = vadd.f32 %v3165_v15, %v3164_v14  ;;  %v4399_v36 = vadd.f32 %v3117_v33, %v3116_v32  ;;  %v1549_v29 = vpop.permute.xlu0 %1548 }
 0x122   : > { %v3167_v22 = vpop.f32.mrb[20].mxu1  ;;  %v3119_v45 = vpop.f32.mrb[20].mxu0 }
 0x123   : > { %v3168_v24 = vpop.f32.mrb[21].mxu1  ;;  %v3120_v46 = vpop.f32.mrb[21].mxu0 }
 0x124   : > { %v4393_v25 = vadd.f32 %v3168_v24, %v3167_v22  ;;  %v3170_v26 = vpop.f32.mrb[22].mxu1  ;;  %v4405_v48 = vadd.f32 %v3120_v46, %v3119_v45  ;;  %v3122_v49 = vpop.f32.mrb[22].mxu0 }
 0x125   : > { %v3171_v27 = vpop.f32.mrb[23].mxu1  ;;  %v3123_v50 = vpop.f32.mrb[23].mxu0 }
 0x126   : > { %v4395_v28 = vadd.f32 %v3171_v27, %v3170_v26  ;;  %v4407_v54 = vadd.f32 %v3123_v50, %v3122_v49 }
 0x12a   : > { %v3173_v34 = vpop.f32.mrb[24].mxu1  ;;  %v3125_v62 = vpop.f32.mrb[24].mxu0 }
 0x12b   : > { %v3174_v37 = vpop.f32.mrb[25].mxu1  ;;  %v3126_v0 = vpop.f32.mrb[25].mxu0 }
 0x12c   : > { %v4401_v39 = vadd.f32 %v3174_v37, %v3173_v34  ;;  %v3176_v40 = vpop.f32.mrb[26].mxu1  ;;  %v4413_v2 = vadd.f32 %v3126_v0, %v3125_v62  ;;  %v3128_v3 = vpop.f32.mrb[26].mxu0 }
 0x12d   : > { %v3177_v42 = vpop.f32.mrb[27].mxu1  ;;  %v3129_v5 = vpop.f32.mrb[27].mxu0 }
 0x12e   : > { %v4403_v43 = vadd.f32 %v3177_v42, %v3176_v40  ;;  %v4415_v8 = vadd.f32 %v3129_v5, %v3128_v3  ;;  %v1554_v37 = vpop.permute.xlu1 %1553 }
 0x132   : > { %v3179_v52 = vpop.f32.mrb[28].mxu1  ;;  %v3131_v20 = vpop.f32.mrb[28].mxu0 }
 0x133   : > { %v3180_v55 = vpop.f32.mrb[29].mxu1  ;;  %v3132_v21 = vpop.f32.mrb[29].mxu0 }
 0x134   : > { %v4409_v57 = vadd.f32 %v3180_v55, %v3179_v52  ;;  %v3182_v58 = vpop.f32.mrb[30].mxu1  ;;  %v4419_v26 = vadd.f32 %v3132_v21, %v3131_v20  ;;  %v3134_v27 = vpop.f32.mrb[30].mxu0 }
 0x135   : > { %v3183_v60 = vpop.f32.mrb[31].mxu1  ;;  %v3135_v30 = vpop.f32.mrb[31].mxu0 }
 0x136   : > { %v4411_v61 = vadd.f32 %v3183_v60, %v3182_v58  ;;  %v4421_v34 = vadd.f32 %v3135_v30, %v3134_v27  ;;  %v1559_v52 = vpop.permute.xlu1 %1558 }
 0x13a   : > { %v3201_v6 = vpop.f32.mrb[32].mxu1 }
 0x13b   : > { %v3202_v10 = vpop.f32.mrb[33].mxu1 }
 0x13c   : > { %v3203_v12 = vadd.f32 %v3202_v10, %v3201_v6  ;;  %v3204_v14 = vpop.f32.mrb[34].mxu1 }
 0x13d   : > { %v3205_v15 = vpop.f32.mrb[35].mxu1 }
 0x13e   : > { %v1284_v17 = vadd.f32 %v3203_v12, %v4365_v47  ;;  %v3206_v18 = vadd.f32 %v3205_v15, %v3204_v14  ;;  %v1569_v12 = vpop.permute.xlu1 %1568 }
 0x140   : > { %v1287_v22 = vadd.f32 %v3206_v18, %v4367_v51  ;;  %v1701_v24 = vmul.f32 %v1544_v9, %v1284_v17  ;;  %v1564_v9 = vpop.permute.xlu0 %1563 }
 0x142   : > { %v1702_v32 = vmul.f32 %v1549_v29, %v1287_v22  ;;  %v3207_v33 = vpop.f32.mrb[36].mxu1  ;;  %3505 = vmatprep.mubr.f32.mxu0 %v1701_v24  ;;  %v1579_v29 = vpop.permute.xlu1 %1578 }
 0x143   : > { %v3208_v40 = vpop.f32.mrb[37].mxu1 }
 0x144   : > { %v3209_v42 = vadd.f32 %v3208_v40, %v3207_v33  ;;  %v3210_v47 = vpop.f32.mrb[38].mxu1  ;;  %3506 = vmatmul.mubr.f32.vlgmr.msra.gmra.mrb[32].mxu0 %v1702_v32  ;;  %v1574_v24 = vpop.permute.xlu0 %1573 }
 0x145   : > { %v3211_v45 = vpop.f32.mrb[39].mxu1 }
 0x146   : > { %v1292_v46 = vadd.f32 %v3209_v42, %v4373_v59  ;;  %v3212_v51 = vadd.f32 %v3211_v45, %v3210_v47 }
 0x148   : > { %v1295_v49 = vadd.f32 %v3212_v51, %v4375_v63  ;;  %v1703_v50 = vmul.f32 %v1554_v37, %v1292_v46  ;;  %v1584_v45 = vpop.permute.xlu0 %1583  ;;  %v1589_v51 = vpop.permute.xlu1 %1588 }
 0x14a   : > { %v3213_v55 = vpop.f32.mrb[40].mxu1  ;;  %3508 = vmatprep.mubr.f32.mxu0 %v1703_v50  ;;  %v1704_v58 = vmul.f32 %v1559_v52, %v1295_v49 }
 0x14b   : > { %v3214_v60 = vpop.f32.mrb[41].mxu1 }
 0x14c   : > { %v3215_v62 = vadd.f32 %v3214_v60, %v3213_v55  ;;  %v3216_v0 = vpop.f32.mrb[42].mxu1  ;;  %3509 = vmatmul.mubr.f32.gmra.mrb[34].mxu0 %v1704_v58 }
 0x14d   : > { %v3217_v3 = vpop.f32.mrb[43].mxu1 }
 0x14e   : > { %v1300_v5 = vadd.f32 %v3215_v62, %v4381_v7  ;;  %v3218_v6 = vadd.f32 %v3217_v3, %v3216_v0  ;;  %v1594_v0 = vpop.permute.xlu0 %1593 }
 0x150   : > { %v1303_v10 = vadd.f32 %v3218_v6, %v4383_v11  ;;  %v1705_v59 = vmul.f32 %v1564_v9, %v1300_v5  ;;  %v1599_v5 = vpop.permute.xlu1 %1598 }
 0x152   : > { %v3219_v14 = vpop.f32.mrb[44].mxu1  ;;  %3511 = vmatprep.mubr.f32.mxu0 %v1705_v59  ;;  %v1706_v63 = vmul.f32 %v1569_v12, %v1303_v10 }
 0x153   : > { %v3220_v15 = vpop.f32.mrb[45].mxu1 }
 0x154   : > { %v3221_v17 = vadd.f32 %v3220_v15, %v3219_v14  ;;  %v3222_v18 = vpop.f32.mrb[46].mxu1  ;;  %3512 = vmatmul.mubr.f32.gmra.mrb[36].mxu0 %v1706_v63  ;;  %v1604_v15 = vpop.permute.xlu0 %1603 }
 0x155   : > { %v3223_v20 = vpop.f32.mrb[47].mxu1 }
 0x156   : > { %v1308_v21 = vadd.f32 %v3221_v17, %v4389_v19  ;;  %v3224_v22 = vadd.f32 %v3223_v20, %v3222_v18  ;;  %v1609_v18 = vpop.permute.xlu1 %1608 }
 0x158   : > { %v1311_v7 = vadd.f32 %v3224_v22, %v4391_v23  ;;  %v1707_v27 = vmul.f32 %v1574_v24, %v1308_v21 }
 0x15a   : > { %v3225_v30 = vpop.f32.mrb[48].mxu1  ;;  %3514 = vmatprep.mubr.f32.mxu0 %v1707_v27  ;;  %v1708_v11 = vmul.f32 %v1579_v29, %v1311_v7 }
 0x15b   : > { %v3226_v32 = vpop.f32.mrb[49].mxu1 }
 0x15c   : > { %v3227_v33 = vadd.f32 %v3226_v32, %v3225_v30  ;;  %v3228_v37 = vpop.f32.mrb[50].mxu1  ;;  %3515 = vmatmul.mubr.f32.gmra.mrb[38].mxu0 %v1708_v11  ;;  %v1614_v30 = vpop.permute.xlu0 %1613 }
 0x15d   : > { %v3229_v40 = vpop.f32.mrb[51].mxu1  ;;  %v1619_v32 = vpop.permute.xlu1 %1618 }
 0x15e   : > { %v1316_v42 = vadd.f32 %v3227_v33, %v4397_v31  ;;  %v3230_v47 = vadd.f32 %v3229_v40, %v3228_v37 }
 0x160   : > { %v1319_v19 = vadd.f32 %v3230_v47, %v4399_v36  ;;  %v1709_v46 = vmul.f32 %v1584_v45, %v1316_v42 }
 0x162   : > { %v3231_v49 = vpop.f32.mrb[52].mxu1  ;;  %3517 = vmatprep.mubr.f32.mxu0 %v1709_v46  ;;  %v1710_v23 = vmul.f32 %v1589_v51, %v1319_v19  ;;  %v1624_v46 = vpop.permute.xlu0 %1623 }
 0x163   : > { %v3232_v50 = vpop.f32.mrb[53].mxu1 }
 0x164   : > { %v3233_v52 = vadd.f32 %v3232_v50, %v3231_v49  ;;  %v3234_v55 = vpop.f32.mrb[54].mxu1  ;;  %3518 = vmatmul.mubr.f32.gmra.mrb[40].mxu0 %v1710_v23  ;;  %v1629_v49 = vpop.permute.xlu1 %1628 }
 0x165   : > { %v3235_v58 = vpop.f32.mrb[55].mxu1 }
 0x166   : > { %v1324_v60 = vadd.f32 %v3233_v52, %v4405_v48  ;;  %v3236_v62 = vadd.f32 %v3235_v58, %v3234_v55 }
 0x168   : > { %v1327_v31 = vadd.f32 %v3236_v62, %v4407_v54  ;;  %v1711_v3 = vmul.f32 %v1594_v0, %v1324_v60  ;;  %v1634_v0 = vpop.permute.xlu0 %1633 }
 0x16a   : > { %v3237_v6 = vpop.f32.mrb[56].mxu1  ;;  %3520 = vmatprep.mubr.f32.mxu0 %v1711_v3  ;;  %v1712_v36 = vmul.f32 %v1599_v5, %v1327_v31  ;;  %v1639_v3 = vpop.permute.xlu1 %1638 }
 0x16b   : > { %v3238_v9 = vpop.f32.mrb[57].mxu1 }
 0x16c   : > { %v3239_v10 = vadd.f32 %v3238_v9, %v3237_v6  ;;  %v3240_v59 = vpop.f32.mrb[58].mxu1  ;;  %3521 = vmatmul.mubr.f32.gmra.mrb[42].mxu0 %v1712_v36 }
 0x16d   : > { %v3241_v12 = vpop.f32.mrb[59].mxu1 }
 0x16e   : > { %v1332_v14 = vadd.f32 %v3239_v10, %v4413_v2  ;;  %v3242_v63 = vadd.f32 %v3241_v12, %v3240_v59 }
 0x170   : > { %v1335_v48 = vadd.f32 %v3242_v63, %v4415_v8  ;;  %v1713_v17 = vmul.f32 %v1604_v15, %v1332_v14  ;;  %v1644_v14 = vpop.permute.xlu0 %1643  ;;  %v1649_v15 = vpop.permute.xlu1 %1648 }
 0x172   : > { %v3243_v20 = vpop.f32.mrb[60].mxu1  ;;  %3523 = vmatprep.mubr.f32.mxu0 %v1713_v17  ;;  %v1714_v54 = vmul.f32 %v1609_v18, %v1335_v48 }
 0x173   : > { %v3244_v21 = vpop.f32.mrb[61].mxu1 }
 0x174   : > { %v3245_v22 = vadd.f32 %v3244_v21, %v3243_v20  ;;  %v3246_v24 = vpop.f32.mrb[62].mxu1  ;;  %3524 = vmatmul.mubr.f32.gmra.mrb[44].mxu0 %v1714_v54 }
 0x175   : > { %v3247_v7 = vpop.f32.mrb[63].mxu1 }
 0x176   : > { %v1340_v27 = vadd.f32 %v3245_v22, %v4419_v26  ;;  %v3248_v29 = vadd.f32 %v3247_v7, %v3246_v24  ;;  %v1654_v24 = vpop.permute.xlu0 %1653 }
 0x178   : > { %v1343_v2 = vadd.f32 %v3248_v29, %v4421_v34  ;;  %v1715_v11 = vmul.f32 %v1614_v30, %v1340_v27  ;;  %v1659_v27 = vpop.permute.xlu1 %1658 }
 0x17a   : > { %v3249_v33 = vpop.f32.mrb[64].mxu1  ;;  %3526 = vmatprep.mubr.f32.mxu0 %v1715_v11  ;;  %v1716_v8 = vmul.f32 %v1619_v32, %v1343_v2 }
 0x17b   : > { %v3250_v37 = vpop.f32.mrb[65].mxu1 }
 0x17c   : > { %v3251_v40 = vadd.f32 %v3250_v37, %v3249_v33  ;;  %v3252_v42 = vpop.f32.mrb[66].mxu1  ;;  %3527 = vmatmul.mubr.f32.gmra.mrb[46].mxu0 %v1716_v8  ;;  %v1664_v37 = vpop.permute.xlu0 %1663 }
 0x17d   : > { %v3253_v47 = vpop.f32.mrb[67].mxu1 }
 0x17e   : > { %v1348_v45 = vadd.f32 %v3251_v40, %v4357_v35  ;;  %v3254_v19 = vadd.f32 %v3253_v47, %v3252_v42  ;;  %v1669_v42 = vpop.permute.xlu1 %1668 }
 0x180   : > { %v1351_v26 = vadd.f32 %v3254_v19, %v4359_v38  ;;  %v1717_v51 = vmul.f32 %v1624_v46, %v1348_v45 }
 0x182   : > { %v3255_v23 = vpop.f32.mrb[68].mxu1  ;;  %3529 = vmatprep.mubr.f32.mxu0 %v1717_v51  ;;  %v1718_v34 = vmul.f32 %v1629_v49, %v1351_v26 }
 0x183   : > { %v3256_v50 = vpop.f32.mrb[69].mxu1 }
 0x184   : > { %v3257_v52 = vadd.f32 %v3256_v50, %v3255_v23  ;;  %v3258_v55 = vpop.f32.mrb[70].mxu1  ;;  %3530 = vmatmul.mubr.f32.gmra.mrb[48].mxu0 %v1718_v34  ;;  %v1674_v23 = vpop.permute.xlu0 %1673 }
 0x185   : > { %v3259_v58 = vpop.f32.mrb[71].mxu1  ;;  %v1679_v50 = vpop.permute.xlu1 %1678 }
 0x186   : > { %v1356_v60 = vadd.f32 %v3257_v52, %v4361_v41  ;;  %v3260_v62 = vadd.f32 %v3259_v58, %v3258_v55 }
 0x188   : > { %v1359_v35 = vadd.f32 %v3260_v62, %v4363_v44  ;;  %v1719_v31 = vmul.f32 %v1634_v0, %v1356_v60 }
 0x18a   : > { %v3261_v5 = vpop.f32.mrb[72].mxu1  ;;  %3532 = vmatprep.mubr.f32.mxu0 %v1719_v31  ;;  %v1720_v38 = vmul.f32 %v1639_v3, %v1359_v35  ;;  %v1684_v31 = vpop.permute.xlu0 %1683 }
 0x18b   : > { %v3262_v6 = vpop.f32.mrb[73].mxu1 }
 0x18c   : > { %v3263_v36 = vadd.f32 %v3262_v6, %v3261_v5  ;;  %v3264_v9 = vpop.f32.mrb[74].mxu1  ;;  %3533 = vmatmul.mubr.f32.gmra.mrb[50].mxu0 %v1720_v38  ;;  %v1689_v5 = vpop.permute.xlu1 %1688 }
 0x18d   : > { %v3265_v10 = vpop.f32.mrb[75].mxu1 }
 0x18e   : > { %v1364_v59 = vadd.f32 %v3263_v36, %v4369_v53  ;;  %v3266_v12 = vadd.f32 %v3265_v10, %v3264_v9 }
 0x190   : > { %v1367_v41 = vadd.f32 %v3266_v12, %v4371_v56  ;;  %v1721_v63 = vmul.f32 %v1644_v14, %v1364_v59  ;;  %v1694_v14 = vpop.permute.xlu0 %1693 }
 0x192   : > { %v3267_v48 = vpop.f32.mrb[76].mxu1  ;;  %3535 = vmatprep.mubr.f32.mxu0 %v1721_v63  ;;  %v1722_v44 = vmul.f32 %v1649_v15, %v1367_v41  ;;  %v1699_v63 = vpop.permute.xlu1 %1698  ;;  %v2318_v15 = vlaneseq }
 0x193   : > { %v3268_v17 = vpop.f32.mrb[77].mxu1 }
 0x194   : > { %v3269_v18 = vadd.f32 %v3268_v17, %v3267_v48  ;;  %v3270_v20 = vpop.f32.mrb[78].mxu1  ;;  %3536 = vmatmul.mubr.f32.gmra.mrb[52].mxu0 %v1722_v44  ;;  %v4453_v48 = vand.u32 127, %v2318_v15  ;;  %v4458_v44 = vld [vmem:[%s4995_s6] ss:$0 sm:$0xff] }
 0x195   : > { %v3271_v54 = vpop.f32.mrb[79].mxu1 }
 0x196   : > { %v1372_v21 = vadd.f32 %v3269_v18, %v4377_v1  ;;  %v3272_v22 = vadd.f32 %v3271_v54, %v3270_v20  ;;  %vm2320_vm0 = vcmp.lt.s32.totalorder %v4453_v48, 8 }
 0x198   : > { %v1375_v53 = vadd.f32 %v3272_v22, %v4379_v4  ;;  %v1723_v7 = vmul.f32 %v1654_v24, %v1372_v21 }
 0x19a   : > { %v3273_v29 = vpop.f32.mrb[80].mxu1  ;;  %3538 = vmatprep.mubr.f32.mxu0 %v1723_v7  ;;  %v1724_v56 = vmul.f32 %v1659_v27, %v1375_v53 }
 0x19b   : > { %v3274_v30 = vpop.f32.mrb[81].mxu1 }
 0x19c   : > { %v3275_v2 = vadd.f32 %v3274_v30, %v3273_v29  ;;  %v3276_v11 = vpop.f32.mrb[82].mxu1  ;;  %3539 = vmatmul.mubr.f32.gmra.mrb[54].mxu0 %v1724_v56 }
 0x19d   : > { %v3277_v32 = vpop.f32.mrb[83].mxu1 }
 0x19e   : > { %v1380_v33 = vadd.f32 %v3275_v2, %v4385_v13  ;;  %v3278_v8 = vadd.f32 %v3277_v32, %v3276_v11 }
 0x1a0   : > { %v1383_v1 = vadd.f32 %v3278_v8, %v4387_v16  ;;  %v1725_v40 = vmul.f32 %v1664_v37, %v1380_v33 }
 0x1a2   : > { %v3279_v47 = vpop.f32.mrb[84].mxu1  ;;  %3541 = vmatprep.mubr.f32.mxu0 %v1725_v40  ;;  %v1726_v4 = vmul.f32 %v1669_v42, %v1383_v1 }
 0x1a3   : > { %v3280_v45 = vpop.f32.mrb[85].mxu1 }
 0x1a4   : > { %v3281_v19 = vadd.f32 %v3280_v45, %v3279_v47  ;;  %v3282_v46 = vpop.f32.mrb[86].mxu1  ;;  %3542 = vmatmul.mubr.f32.gmra.mrb[56].mxu0 %v1726_v4 }
 0x1a5   : > { %v3283_v26 = vpop.f32.mrb[87].mxu1 }
 0x1a6   : > { %v1388_v51 = vadd.f32 %v3281_v19, %v4393_v25  ;;  %v3284_v49 = vadd.f32 %v3283_v26, %v3282_v46 }
 0x1a8   : > { %v1391_v13 = vadd.f32 %v3284_v49, %v4395_v28  ;;  %v1727_v34 = vmul.f32 %v1674_v23, %v1388_v51 }
 0x1aa   : > { %v3285_v52 = vpop.f32.mrb[88].mxu1  ;;  %3544 = vmatprep.mubr.f32.mxu0 %v1727_v34  ;;  %v1728_v16 = vmul.f32 %v1679_v50, %v1391_v13 }
 0x1ab   : > { %v3286_v55 = vpop.f32.mrb[89].mxu1 }
 0x1ac   : > { %v3287_v58 = vadd.f32 %v3286_v55, %v3285_v52  ;;  %v3288_v60 = vpop.f32.mrb[90].mxu1  ;;  %3545 = vmatmul.mubr.f32.gmra.mrb[58].mxu0 %v1728_v16 }
 0x1ad   : > { %v3289_v62 = vpop.f32.mrb[91].mxu1 }
 0x1ae   : > { %v1396_v0 = vadd.f32 %v3287_v58, %v4401_v39  ;;  %v3290_v35 = vadd.f32 %v3289_v62, %v3288_v60 }
 0x1b0   : > { %v1399_v25 = vadd.f32 %v3290_v35, %v4403_v43  ;;  %v1729_v3 = vmul.f32 %v1684_v31, %v1396_v0 }
 0x1b2   : > { %v3291_v38 = vpop.f32.mrb[92].mxu1  ;;  %3547 = vmatprep.mubr.f32.mxu0 %v1729_v3  ;;  %v1730_v28 = vmul.f32 %v1689_v5, %v1399_v25 }
 0x1b3   : > { %v3292_v6 = vpop.f32.mrb[93].mxu1 }
 0x1b4   : > { %v3293_v36 = vadd.f32 %v3292_v6, %v3291_v38  ;;  %v3294_v9 = vpop.f32.mrb[94].mxu1  ;;  %3548 = vmatmul.mubr.f32.gmra.mrb[60].mxu0 %v1730_v28 }
 0x1b5   : > { %v3295_v10 = vpop.f32.mrb[95].mxu1 }
 0x1b6   : > { %v1404_v59 = vadd.f32 %v3293_v36, %v4409_v57  ;;  %v3296_v12 = vadd.f32 %v3295_v10, %v3294_v9 }
 0x1b8   : > { %v1407_v39 = vadd.f32 %v3296_v12, %v4411_v61  ;;  %v1731_v41 = vmul.f32 %v1694_v14, %v1404_v59 }
 0x1ba   : > { %3550 = vmatprep.mubr.f32.mxu0 %v1731_v41  ;;  %v1732_v43 = vmul.f32 %v1699_v63, %v1407_v39 }
 0x1bc   : > { %3551 = vmatmul.mubr.f32.gmra.mrb[62].mxu0 %v1732_v43 }
 0x217   : > { %v3507_v17 = vpop.f32.mrb[32].mxu0 }
 0x218   : > { %v2287_v57 = vadd.f32 %v3507_v17, %v4458_v44  ;;  %v2120_v18 = vpop.f32.mrb[33].mxu0 }
 0x219   : > { %v2286_v61 = vadd.f32 %v4458_v44, %v2120_v18 }
 0x21a   : > { %v4465_v20 = vsel %vm2320_vm0, %v2287_v57, -1e+30 }
 0x21b   : > { %2355 = vmax.xlane.f32.xlu1 %v4465_v20  ;;  %v4470_v54 = vsel %vm2320_vm0, %v2286_v61, -1e+30 }
 0x21c   : > { %2353 = vmax.xlane.f32.xlu0 %v4470_v54 }
 0x21f   : > { %v3510_v21 = vpop.f32.mrb[34].mxu0 }
 0x220   : > { %v2289_v22 = vadd.f32 %v3510_v21, %v4458_v44  ;;  %v2130_v24 = vpop.f32.mrb[35].mxu0 }
 0x221   : > { %v2288_v53 = vadd.f32 %v4458_v44, %v2130_v24 }
 0x222   : > { %v4477_v7 = vsel %vm2320_vm0, %v2289_v22, -1e+30 }
 0x223   : > { %2359 = vmax.xlane.f32.xlu0 %v4477_v7  ;;  %v4482_v27 = vsel %vm2320_vm0, %v2288_v53, -1e+30 }
 0x227   : > { %2357 = vmax.xlane.f32.xlu0 %v4482_v27  ;;  %v3513_v29 = vpop.f32.mrb[36].mxu0 }
 0x228   : > { %v2291_v56 = vadd.f32 %v3513_v29, %v4458_v44  ;;  %v2140_v30 = vpop.f32.mrb[37].mxu0 }
 0x229   : > { %v2290_v2 = vadd.f32 %v4458_v44, %v2140_v30 }
 0x22a   : > { %v4489_v11 = vsel %vm2320_vm0, %v2291_v56, -1e+30 }
 0x22b   : > { %2363 = vmax.xlane.f32.xlu0 %v4489_v11  ;;  %v4494_v32 = vsel %vm2320_vm0, %v2290_v2, -1e+30 }
 0x22c   : > { %2361 = vmax.xlane.f32.xlu1 %v4494_v32 }
 0x22f   : > { %v3516_v33 = vpop.f32.mrb[38].mxu0 }
 0x230   : > { %v2293_v8 = vadd.f32 %v3516_v33, %v4458_v44  ;;  %v2150_v37 = vpop.f32.mrb[39].mxu0 }
 0x231   : > { %v2292_v1 = vadd.f32 %v4458_v44, %v2150_v37 }
 0x232   : > { %v4501_v40 = vsel %vm2320_vm0, %v2293_v8, -1e+30 }
 0x233   : > { %2367 = vmax.xlane.f32.xlu0 %v4501_v40  ;;  %v4506_v42 = vsel %vm2320_vm0, %v2292_v1, -1e+30 }
 0x234   : > { %2365 = vmax.xlane.f32.xlu1 %v4506_v42 }
 0x237   : > { %v3519_v47 = vpop.f32.mrb[40].mxu0 }
 0x238   : > { %v2295_v4 = vadd.f32 %v3519_v47, %v4458_v44  ;;  %v2160_v45 = vpop.f32.mrb[41].mxu0 }
 0x239   : > { %v2294_v19 = vadd.f32 %v4458_v44, %v2160_v45 }
 0x23a   : > { %v4513_v46 = vsel %vm2320_vm0, %v2295_v4, -1e+30 }
 0x23b   : > { %2371 = vmax.xlane.f32.xlu0 %v4513_v46  ;;  %v4518_v26 = vsel %vm2320_vm0, %v2294_v19, -1e+30 }
 0x23c   : > { %2369 = vmax.xlane.f32.xlu1 %v4518_v26 }
 0x23f   : > { %v3522_v51 = vpop.f32.mrb[42].mxu0 }
 0x240   : > { %v2297_v49 = vadd.f32 %v3522_v51, %v4458_v44  ;;  %v2170_v23 = vpop.f32.mrb[43].mxu0 }
 0x241   : > { %v2296_v13 = vadd.f32 %v4458_v44, %v2170_v23 }
 0x242   : > { %v4525_v34 = vsel %vm2320_vm0, %v2297_v49, -1e+30 }
 0x243   : > { %2375 = vmax.xlane.f32.xlu0 %v4525_v34  ;;  %v4530_v50 = vsel %vm2320_vm0, %v2296_v13, -1e+30 }
 0x244   : > { %2373 = vmax.xlane.f32.xlu1 %v4530_v50 }
 0x247   : > { %v3525_v52 = vpop.f32.mrb[44].mxu0 }
 0x248   : > { %v2299_v16 = vadd.f32 %v3525_v52, %v4458_v44  ;;  %v2180_v55 = vpop.f32.mrb[45].mxu0 }
 0x249   : > { %v2298_v58 = vadd.f32 %v4458_v44, %v2180_v55 }
 0x24a   : > { %v4537_v60 = vsel %vm2320_vm0, %v2299_v16, -1e+30 }
 0x24b   : > { %2379 = vmax.xlane.f32.xlu0 %v4537_v60  ;;  %v4542_v62 = vsel %vm2320_vm0, %v2298_v58, -1e+30 }
 0x24c   : > { %2377 = vmax.xlane.f32.xlu1 %v4542_v62 }
 0x24f   : > { %v3528_v0 = vpop.f32.mrb[46].mxu0 }
 0x250   : > { %v2301_v35 = vadd.f32 %v3528_v0, %v4458_v44  ;;  %v2190_v31 = vpop.f32.mrb[47].mxu0 }
 0x251   : > { %v2300_v25 = vadd.f32 %v4458_v44, %v2190_v31 }
 0x252   : > { %v4549_v3 = vsel %vm2320_vm0, %v2301_v35, -1e+30 }
 0x253   : > { %2383 = vmax.xlane.f32.xlu0 %v4549_v3  ;;  %v4554_v5 = vsel %vm2320_vm0, %v2300_v25, -1e+30 }
 0x254   : > { %2381 = vmax.xlane.f32.xlu1 %v4554_v5 }
 0x257   : > { %v3531_v38 = vpop.f32.mrb[48].mxu0 }
 0x258   : > { %v2303_v28 = vadd.f32 %v3531_v38, %v4458_v44  ;;  %v2200_v6 = vpop.f32.mrb[49].mxu0 }
 0x259   : > { %v2302_v36 = vadd.f32 %v4458_v44, %v2200_v6 }
 0x25a   : > { %v4561_v9 = vsel %vm2320_vm0, %v2303_v28, -1e+30 }
 0x25b   : > { %2387 = vmax.xlane.f32.xlu0 %v4561_v9  ;;  %v4566_v10 = vsel %vm2320_vm0, %v2302_v36, -1e+30 }
 0x25c   : > { %2385 = vmax.xlane.f32.xlu1 %v4566_v10 }
 0x25f   : > { %v3534_v59 = vpop.f32.mrb[50].mxu0 }
 0x260   : > { %v2305_v12 = vadd.f32 %v3534_v59, %v4458_v44  ;;  %v2210_v14 = vpop.f32.mrb[51].mxu0 }
 0x261   : > { %v2304_v39 = vadd.f32 %v4458_v44, %v2210_v14 }
 0x262   : > { %v4573_v41 = vsel %vm2320_vm0, %v2305_v12, -1e+30 }
 0x263   : > { %2391 = vmax.xlane.f32.xlu0 %v4573_v41  ;;  %v4578_v63 = vsel %vm2320_vm0, %v2304_v39, -1e+30 }
 0x264   : > { %2389 = vmax.xlane.f32.xlu1 %v4578_v63 }
 0x267   : > { %v3537_v43 = vpop.f32.mrb[52].mxu0 }
 0x268   : > { %v2307_v15 = vadd.f32 %v3537_v43, %v4458_v44  ;;  %v2220_v17 = vpop.f32.mrb[53].mxu0 }
 0x269   : > { %v2306_v57 = vadd.f32 %v4458_v44, %v2220_v17 }
 0x26a   : > { %v4585_v18 = vsel %vm2320_vm0, %v2307_v15, -1e+30 }
 0x26b   : > { %2395 = vmax.xlane.f32.xlu0 %v4585_v18  ;;  %v4590_v61 = vsel %vm2320_vm0, %v2306_v57, -1e+30 }
 0x26c   : > { %2393 = vmax.xlane.f32.xlu1 %v4590_v61 }
 0x26f   : > { %v3540_v21 = vpop.f32.mrb[54].mxu0 }
 0x270   : > { %v2309_v22 = vadd.f32 %v3540_v21, %v4458_v44  ;;  %v2230_v24 = vpop.f32.mrb[55].mxu0 }
 0x271   : > { %v2308_v53 = vadd.f32 %v4458_v44, %v2230_v24 }
 0x272   : > { %v4597_v29 = vsel %vm2320_vm0, %v2309_v22, -1e+30 }
 0x273   : > { %2399 = vmax.xlane.f32.xlu0 %v4597_v29  ;;  %v4602_v56 = vsel %vm2320_vm0, %v2308_v53, -1e+30 }
 0x274   : > { %2397 = vmax.xlane.f32.xlu1 %v4602_v56 }
 0x277   : > { %v3543_v30 = vpop.f32.mrb[56].mxu0 }
 0x278   : > { %v2311_v2 = vadd.f32 %v3543_v30, %v4458_v44  ;;  %v2240_v33 = vpop.f32.mrb[57].mxu0 }
 0x279   : > { %v2310_v8 = vadd.f32 %v4458_v44, %v2240_v33 }
 0x27a   : > { %v4609_v37 = vsel %vm2320_vm0, %v2311_v2, -1e+30 }
 0x27b   : > { %2403 = vmax.xlane.f32.xlu0 %v4609_v37  ;;  %v4614_v1 = vsel %vm2320_vm0, %v2310_v8, -1e+30 }
 0x27c   : > { %2401 = vmax.xlane.f32.xlu1 %v4614_v1 }
 0x27f   : > { %v3546_v47 = vpop.f32.mrb[58].mxu0 }
 0x280   : > { %v2313_v4 = vadd.f32 %v3546_v47, %v4458_v44  ;;  %v2250_v45 = vpop.f32.mrb[59].mxu0 }
 0x281   : > { %v2312_v19 = vadd.f32 %v4458_v44, %v2250_v45 }
 0x282   : > { %v4621_v51 = vsel %vm2320_vm0, %v2313_v4, -1e+30 }
 0x283   : > { %2407 = vmax.xlane.f32.xlu0 %v4621_v51  ;;  %v4626_v49 = vsel %vm2320_vm0, %v2312_v19, -1e+30 }
 0x284   : > { %2405 = vmax.xlane.f32.xlu1 %v4626_v49 }
 0x287   : > { %v3549_v23 = vpop.f32.mrb[60].mxu0 }
 0x288   : > { %v2315_v13 = vadd.f32 %v3549_v23, %v4458_v44  ;;  %v2260_v52 = vpop.f32.mrb[61].mxu0 }
 0x289   : > { %v2314_v16 = vadd.f32 %v4458_v44, %v2260_v52 }
 0x28a   : > { %v4633_v55 = vsel %vm2320_vm0, %v2315_v13, -1e+30 }
 0x28b   : > { %2411 = vmax.xlane.f32.xlu0 %v4633_v55  ;;  %v4638_v58 = vsel %vm2320_vm0, %v2314_v16, -1e+30 }
 0x28c   : > { %2409 = vmax.xlane.f32.xlu1 %v4638_v58 }
 0x28f   : > { %v3552_v0 = vpop.f32.mrb[62].mxu0 }
 0x290   : > { %v2317_v35 = vadd.f32 %v3552_v0, %v4458_v44  ;;  %v2270_v31 = vpop.f32.mrb[63].mxu0 }
 0x291   : > { %v2316_v25 = vadd.f32 %v4458_v44, %v2270_v31 }
 0x292   : > { %v4645_v38 = vsel %vm2320_vm0, %v2317_v35, -1e+30 }
 0x293   : > { %2415 = vmax.xlane.f32.xlu0 %v4645_v38  ;;  %v4650_v28 = vsel %vm2320_vm0, %v2316_v25, -1e+30 }
 0x294   : > { %2413 = vmax.xlane.f32.xlu1 %v4650_v28 }
 0x2a8   : > { %v2356_v6 = vpop.xlane.xlu1 %2355 }
 0x2a9   : > { %v4654_v36 = vsub.f32 %v4465_v20, %v2356_v6  ;;  %v2354_v59 = vpop.xlane.xlu0 %2353 }
 0x2aa   : > { %v4657_v12 = vsub.f32 %v4470_v54, %v2354_v59 }
 0x2ab   : > { %v2451_v44 = vmul.f32 1.442695, %v4654_v36 }
 0x2ac   : > { %v2449_v14 = vmul.f32 1.442695, %v4657_v12 }
 0x2ad   : > { %3820 = vpow2.f32 %v2451_v44 }
 0x2ae   : > { %3822 = vpow2.f32 %v2449_v14 }
 0x2b0   : > { %v2360_v39 = vpop.xlane.xlu0 %2359 }
 0x2b1   : > { %v4662_v43 = vsub.f32 %v4477_v7, %v2360_v39 }
 0x2b3   : > { %v2455_v15 = vmul.f32 1.442695, %v4662_v43 }
 0x2b4   : > { %v2358_v17 = vpop.xlane.xlu0 %2357 }
 0x2b5   : > { %3824 = vpow2.f32 %v2455_v15  ;;  %v4666_v20 = vsub.f32 %v4482_v27, %v2358_v17 }
 0x2b7   : > { %v3821_v57 = vpop.eup %3820  ;;  %v2453_v54 = vmul.f32 1.442695, %v4666_v20 }
 0x2b8   : > { %v3823_v21 = vpop.eup %3822  ;;  %v2364_v22 = vpop.xlane.xlu0 %2363  ;;  %v2514_v24 = vsel %vm2320_vm0, %v3821_v57, 0.0 }
 0x2b9   : > { %3826 = vpow2.f32 %v2453_v54  ;;  %v4672_v53 = vsub.f32 %v4489_v11, %v2364_v22  ;;  %v2362_v7 = vpop.xlane.xlu1 %2361  ;;  %2547 = vadd.xlane.f32.xlu0 %v2514_v24  ;;  %v2513_v30 = vsel %vm2320_vm0, %v3823_v21, 0.0 }
 0x2ba   : > { %v4677_v27 = vsub.f32 %v4494_v32, %v2362_v7  ;;  %2545 = vadd.xlane.f32.xlu1 %v2513_v30 }
 0x2bb   : > { %v2459_v2 = vmul.f32 1.442695, %v4672_v53 }
 0x2bc   : > { %v2457_v33 = vmul.f32 1.442695, %v4677_v27 }
 0x2bd   : > { %3828 = vpow2.f32 %v2459_v2 }
 0x2be   : > { %3830 = vpow2.f32 %v2457_v33 }
 0x2bf   : > { %v3825_v8 = vpop.eup %3824 }
 0x2c0   : > { %v2368_v47 = vpop.xlane.xlu0 %2367  ;;  %v2516_v11 = vsel %vm2320_vm0, %v3825_v8, 0.0 }
 0x2c1   : > { %v4684_v4 = vsub.f32 %v4501_v40, %v2368_v47  ;;  %v2366_v45 = vpop.xlane.xlu1 %2365  ;;  %2551 = vadd.xlane.f32.xlu0 %v2516_v11 }
 0x2c2   : > { %v4687_v32 = vsub.f32 %v4506_v42, %v2366_v45 }
 0x2c3   : > { %v3827_v19 = vpop.eup %3826  ;;  %v2463_v23 = vmul.f32 1.442695, %v4684_v4 }
 0x2c4   : > { %v2461_v13 = vmul.f32 1.442695, %v4687_v32  ;;  %v2515_v52 = vsel %vm2320_vm0, %v3827_v19, 0.0 }
 0x2c5   : > { %3832 = vpow2.f32 %v2463_v23  ;;  %2549 = vadd.xlane.f32.xlu1 %v2515_v52 }
 0x2c6   : > { %3834 = vpow2.f32 %v2461_v13 }
 0x2c7   : > { %v3829_v16 = vpop.eup %3828 }
 0x2c8   : > { %v3831_v0 = vpop.eup %3830  ;;  %v2372_v40 = vpop.xlane.xlu0 %2371  ;;  %v2518_v35 = vsel %vm2320_vm0, %v3829_v16, 0.0 }
 0x2c9   : > { %v4696_v42 = vsub.f32 %v4513_v46, %v2372_v40  ;;  %v2370_v31 = vpop.xlane.xlu1 %2369  ;;  %2555 = vadd.xlane.f32.xlu0 %v2518_v35  ;;  %v2517_v25 = vsel %vm2320_vm0, %v3831_v0, 0.0 }
 0x2ca   : > { %v4701_v6 = vsub.f32 %v4518_v26, %v2370_v31  ;;  %2553 = vadd.xlane.f32.xlu1 %v2517_v25 }
 0x2cb   : > { %v2467_v59 = vmul.f32 1.442695, %v4696_v42 }
 0x2cc   : > { %v2465_v44 = vmul.f32 1.442695, %v4701_v6 }
 0x2cd   : > { %3836 = vpow2.f32 %v2467_v59 }
 0x2ce   : > { %3838 = vpow2.f32 %v2465_v44 }
 0x2cf   : > { %v3833_v14 = vpop.eup %3832 }
 0x2d0   : > { %v3835_v39 = vpop.eup %3834  ;;  %v2376_v15 = vpop.xlane.xlu0 %2375  ;;  %v2520_v46 = vsel %vm2320_vm0, %v3833_v14, 0.0 }
 0x2d1   : > { %v4708_v17 = vsub.f32 %v4525_v34, %v2376_v15  ;;  %v2374_v57 = vpop.xlane.xlu1 %2373  ;;  %2559 = vadd.xlane.f32.xlu0 %v2520_v46  ;;  %v2519_v26 = vsel %vm2320_vm0, %v3835_v39, 0.0 }
 0x2d2   : > { %v4713_v54 = vsub.f32 %v4530_v50, %v2374_v57  ;;  %2557 = vadd.xlane.f32.xlu1 %v2519_v26 }
 0x2d3   : > { %v2471_v21 = vmul.f32 1.442695, %v4708_v17 }
 0x2d4   : > { %v2469_v22 = vmul.f32 1.442695, %v4713_v54 }
 0x2d5   : > { %3840 = vpow2.f32 %v2471_v21 }
 0x2d6   : > { %3842 = vpow2.f32 %v2469_v22 }
 0x2d7   : > { %v3837_v24 = vpop.eup %3836 }
 0x2d8   : > { %v3839_v7 = vpop.eup %3838  ;;  %v2380_v30 = vpop.xlane.xlu0 %2379  ;;  %v2522_v34 = vsel %vm2320_vm0, %v3837_v24, 0.0 }
 0x2d9   : > { %v4720_v2 = vsub.f32 %v4537_v60, %v2380_v30  ;;  %v2378_v33 = vpop.xlane.xlu1 %2377  ;;  %2563 = vadd.xlane.f32.xlu0 %v2522_v34  ;;  %v2521_v50 = vsel %vm2320_vm0, %v3839_v7, 0.0 }
 0x2da   : > { %v4725_v8 = vsub.f32 %v4542_v62, %v2378_v33  ;;  %2561 = vadd.xlane.f32.xlu1 %v2521_v50 }
 0x2db   : > { %v2475_v47 = vmul.f32 1.442695, %v4720_v2 }
 0x2dc   : > { %v2473_v11 = vmul.f32 1.442695, %v4725_v8 }
 0x2dd   : > { %3844 = vpow2.f32 %v2475_v47 }
 0x2de   : > { %3846 = vpow2.f32 %v2473_v11 }
 0x2df   : > { %v3841_v45 = vpop.eup %3840 }
 0x2e0   : > { %v3843_v19 = vpop.eup %3842  ;;  %v2384_v23 = vpop.xlane.xlu0 %2383  ;;  %v2524_v60 = vsel %vm2320_vm0, %v3841_v45, 0.0 }
 0x2e1   : > { %v4732_v13 = vsub.f32 %v4549_v3, %v2384_v23  ;;  %v2382_v52 = vpop.xlane.xlu1 %2381  ;;  %2567 = vadd.xlane.f32.xlu0 %v2524_v60  ;;  %v2523_v62 = vsel %vm2320_vm0, %v3843_v19, 0.0 }
 0x2e2   : > { %v4737_v16 = vsub.f32 %v4554_v5, %v2382_v52  ;;  %2565 = vadd.xlane.f32.xlu1 %v2523_v62 }
 0x2e3   : > { %v2479_v0 = vmul.f32 1.442695, %v4732_v13 }
 0x2e4   : > { %v2477_v40 = vmul.f32 1.442695, %v4737_v16 }
 0x2e5   : > { %3848 = vpow2.f32 %v2479_v0 }
 0x2e6   : > { %3850 = vpow2.f32 %v2477_v40 }
 0x2e7   : > { %v3845_v35 = vpop.eup %3844 }
 0x2e8   : > { %v3847_v31 = vpop.eup %3846  ;;  %v2388_v25 = vpop.xlane.xlu0 %2387  ;;  %v2526_v3 = vsel %vm2320_vm0, %v3845_v35, 0.0 }
 0x2e9   : > { %v4744_v59 = vsub.f32 %v4561_v9, %v2388_v25  ;;  %v2386_v44 = vpop.xlane.xlu1 %2385  ;;  %2571 = vadd.xlane.f32.xlu0 %v2526_v3  ;;  %v2525_v5 = vsel %vm2320_vm0, %v3847_v31, 0.0 }
 0x2ea   : > { %v4749_v14 = vsub.f32 %v4566_v10, %v2386_v44  ;;  %2569 = vadd.xlane.f32.xlu1 %v2525_v5 }
 0x2eb   : > { %v2483_v39 = vmul.f32 1.442695, %v4744_v59 }
 0x2ec   : > { %v2481_v15 = vmul.f32 1.442695, %v4749_v14 }
 0x2ed   : > { %3852 = vpow2.f32 %v2483_v39 }
 0x2ee   : > { %3854 = vpow2.f32 %v2481_v15 }
 0x2ef   : > { %v3849_v46 = vpop.eup %3848 }
 0x2f0   : > { %v3851_v57 = vpop.eup %3850  ;;  %v2392_v26 = vpop.xlane.xlu0 %2391  ;;  %v2528_v9 = vsel %vm2320_vm0, %v3849_v46, 0.0 }
 0x2f1   : > { %v4756_v21 = vsub.f32 %v4573_v41, %v2392_v26  ;;  %v2390_v22 = vpop.xlane.xlu1 %2389  ;;  %2575 = vadd.xlane.f32.xlu0 %v2528_v9  ;;  %v2527_v10 = vsel %vm2320_vm0, %v3851_v57, 0.0 }
 0x2f2   : > { %v4761_v24 = vsub.f32 %v4578_v63, %v2390_v22  ;;  %2573 = vadd.xlane.f32.xlu1 %v2527_v10 }
 0x2f3   : > { %v2487_v7 = vmul.f32 1.442695, %v4756_v21 }
 0x2f4   : > { %v2485_v30 = vmul.f32 1.442695, %v4761_v24 }
 0x2f5   : > { %3856 = vpow2.f32 %v2487_v7 }
 0x2f6   : > { %3858 = vpow2.f32 %v2485_v30 }
 0x2f7   : > { %v3853_v34 = vpop.eup %3852 }
 0x2f8   : > { %v3855_v33 = vpop.eup %3854  ;;  %v2396_v50 = vpop.xlane.xlu0 %2395  ;;  %v2530_v41 = vsel %vm2320_vm0, %v3853_v34, 0.0 }
 0x2f9   : > { %v4768_v47 = vsub.f32 %v4585_v18, %v2396_v50  ;;  %v2394_v11 = vpop.xlane.xlu1 %2393  ;;  %2579 = vadd.xlane.f32.xlu0 %v2530_v41  ;;  %v2529_v63 = vsel %vm2320_vm0, %v3855_v33, 0.0 }
 0x2fa   : > { %v4773_v45 = vsub.f32 %v4590_v61, %v2394_v11  ;;  %2577 = vadd.xlane.f32.xlu1 %v2529_v63 }
 0x2fb   : > { %v2491_v19 = vmul.f32 1.442695, %v4768_v47 }
 0x2fc   : > { %v2489_v23 = vmul.f32 1.442695, %v4773_v45 }
 0x2fd   : > { %3860 = vpow2.f32 %v2491_v19 }
 0x2fe   : > { %3862 = vpow2.f32 %v2489_v23 }
 0x2ff   : > { %v3857_v60 = vpop.eup %3856 }
 0x300   : > { %v3859_v52 = vpop.eup %3858  ;;  %v2400_v62 = vpop.xlane.xlu0 %2399  ;;  %v2532_v18 = vsel %vm2320_vm0, %v3857_v60, 0.0 }
 0x301   : > { %v4780_v0 = vsub.f32 %v4597_v29, %v2400_v62  ;;  %v2398_v40 = vpop.xlane.xlu1 %2397  ;;  %2583 = vadd.xlane.f32.xlu0 %v2532_v18  ;;  %v2531_v61 = vsel %vm2320_vm0, %v3859_v52, 0.0 }
 0x302   : > { %v4785_v35 = vsub.f32 %v4602_v56, %v2398_v40  ;;  %2581 = vadd.xlane.f32.xlu1 %v2531_v61 }
 0x303   : > { %v2495_v31 = vmul.f32 1.442695, %v4780_v0 }
 0x304   : > { %v2493_v25 = vmul.f32 1.442695, %v4785_v35 }
 0x305   : > { %3864 = vpow2.f32 %v2495_v31 }
 0x306   : > { %3866 = vpow2.f32 %v2493_v25 }
 0x307   : > { %v3861_v3 = vpop.eup %3860 }
 0x308   : > { %v3863_v44 = vpop.eup %3862  ;;  %v2404_v5 = vpop.xlane.xlu0 %2403  ;;  %v2534_v29 = vsel %vm2320_vm0, %v3861_v3, 0.0 }
 0x309   : > { %v4792_v39 = vsub.f32 %v4609_v37, %v2404_v5  ;;  %v2402_v15 = vpop.xlane.xlu1 %2401  ;;  %2587 = vadd.xlane.f32.xlu0 %v2534_v29  ;;  %v2533_v56 = vsel %vm2320_vm0, %v3863_v44, 0.0 }
 0x30a   : > { %v4797_v46 = vsub.f32 %v4614_v1, %v2402_v15  ;;  %2585 = vadd.xlane.f32.xlu1 %v2533_v56 }
 0x30b   : > { %v2499_v57 = vmul.f32 1.442695, %v4792_v39 }
 0x30c   : > { %v2497_v26 = vmul.f32 1.442695, %v4797_v46 }
 0x30d   : > { %3868 = vpow2.f32 %v2499_v57 }
 0x30e   : > { %3870 = vpow2.f32 %v2497_v26 }
 0x30f   : > { %v3865_v9 = vpop.eup %3864 }
 0x310   : > { %v3867_v22 = vpop.eup %3866  ;;  %v2408_v10 = vpop.xlane.xlu0 %2407  ;;  %v2536_v37 = vsel %vm2320_vm0, %v3865_v9, 0.0 }
 0x311   : > { %v4804_v7 = vsub.f32 %v4621_v51, %v2408_v10  ;;  %v2406_v30 = vpop.xlane.xlu1 %2405  ;;  %2591 = vadd.xlane.f32.xlu0 %v2536_v37  ;;  %v2535_v1 = vsel %vm2320_vm0, %v3867_v22, 0.0 }
 0x312   : > { %v4809_v34 = vsub.f32 %v4626_v49, %v2406_v30  ;;  %2589 = vadd.xlane.f32.xlu1 %v2535_v1 }
 0x313   : > { %v2503_v33 = vmul.f32 1.442695, %v4804_v7 }
 0x314   : > { %v2501_v50 = vmul.f32 1.442695, %v4809_v34 }
 0x315   : > { %3872 = vpow2.f32 %v2503_v33 }
 0x316   : > { %3874 = vpow2.f32 %v2501_v50 }
 0x317   : > { %v3869_v41 = vpop.eup %3868 }
 0x318   : > { %v3871_v11 = vpop.eup %3870  ;;  %v2412_v63 = vpop.xlane.xlu0 %2411  ;;  %v2538_v51 = vsel %vm2320_vm0, %v3869_v41, 0.0 }
 0x319   : > { %v4816_v19 = vsub.f32 %v4633_v55, %v2412_v63  ;;  %v2410_v23 = vpop.xlane.xlu1 %2409  ;;  %2595 = vadd.xlane.f32.xlu0 %v2538_v51  ;;  %v2537_v49 = vsel %vm2320_vm0, %v3871_v11, 0.0 }
 0x31a   : > { %v4821_v60 = vsub.f32 %v4638_v58, %v2410_v23  ;;  %2593 = vadd.xlane.f32.xlu1 %v2537_v49 }
 0x31b   : > { %v2507_v52 = vmul.f32 1.442695, %v4816_v19 }
 0x31c   : > { %v2505_v62 = vmul.f32 1.442695, %v4821_v60 }
 0x31d   : > { %3876 = vpow2.f32 %v2507_v52 }
 0x31e   : > { %3878 = vpow2.f32 %v2505_v62 }
 0x31f   : > { %v3873_v18 = vpop.eup %3872 }
 0x320   : > { %v3875_v40 = vpop.eup %3874  ;;  %v2416_v61 = vpop.xlane.xlu0 %2415  ;;  %v2540_v55 = vsel %vm2320_vm0, %v3873_v18, 0.0 }
 0x321   : > { %v4828_v31 = vsub.f32 %v4645_v38, %v2416_v61  ;;  %2599 = vadd.xlane.f32.xlu0 %v2540_v55  ;;  %v2414_v25 = vpop.xlane.xlu1 %2413  ;;  %v2539_v58 = vsel %vm2320_vm0, %v3875_v40, 0.0 }
 0x322   : > { %v4833_v3 = vsub.f32 %v4650_v28, %v2414_v25  ;;  %2597 = vadd.xlane.f32.xlu1 %v2539_v58 }
 0x323   : > { %v2511_v44 = vmul.f32 1.442695, %v4828_v31 }
 0x324   : > { %v2509_v5 = vmul.f32 1.442695, %v4833_v3 }
 0x325   : > { %3880 = vpow2.f32 %v2511_v44 }
 0x326   : > { %3882 = vpow2.f32 %v2509_v5 }
 0x327   : > { %v3877_v29 = vpop.eup %3876 }
 0x328   : > { %v3879_v15 = vpop.eup %3878  ;;  %v2542_v38 = vsel %vm2320_vm0, %v3877_v29, 0.0 }
 0x329   : > { %2603 = vadd.xlane.f32.xlu0 %v2542_v38  ;;  %v2541_v56 = vsel %vm2320_vm0, %v3879_v15, 0.0 }
 0x32a   : > { %2601 = vadd.xlane.f32.xlu1 %v2541_v56 }
 0x32f   : > { %v3881_v57 = vpop.eup %3880 }
 0x330   : > { %v3883_v28 = vpop.eup %3882  ;;  %v2544_v26 = vsel %vm2320_vm0, %v3881_v57, 0.0 }
 0x331   : > { %2607 = vadd.xlane.f32.xlu0 %v2544_v26  ;;  %v2543_v9 = vsel %vm2320_vm0, %v3883_v28, 0.0 }
 0x332   : > { %2605 = vadd.xlane.f32.xlu1 %v2543_v9 }
 0x346   : > { %v2548_v22 = vpop.xlane.xlu0 %2547 }
 0x347   : > { %3884 = vlog2.f32 %v2548_v22  ;;  %v2546_v10 = vpop.xlane.xlu1 %2545 }
 0x348   : > { %3886 = vlog2.f32 %v2546_v10 }
 0x34e   : > { %v2552_v37 = vpop.xlane.xlu0 %2551 }
 0x34f   : > { %3888 = vlog2.f32 %v2552_v37 }
 0x351   : > { %v3885_v30 = vpop.eup %3884 }
 0x352   : > { %v3887_v1 = vpop.eup %3886  ;;  %v2612_v33 = vmul.f32 0.6931472, %v3885_v30  ;;  %v2550_v50 = vpop.xlane.xlu1 %2549 }
 0x353   : > { %v2610_v41 = vmul.f32 0.6931472, %v3887_v1  ;;  %3890 = vlog2.f32 %v2550_v50 }
 0x354   : > { %v2674_v11 = vsub.f32 %v4654_v36, %v2612_v33 }
 0x355   : > { %v2673_v63 = vsub.f32 %v4657_v12, %v2610_v41 }
 0x356   : > { %v2706_v51 = vsel %vm2320_vm0, %v2674_v11, 0.0  ;;  %v2556_v23 = vpop.xlane.xlu0 %2555 }
 0x357   : > { %2738 = vst [vmem:[%s4850_s10 + $0x8] sm:$0xff] %v2706_v51  ;;  %v2705_v49 = vsel %vm2320_vm0, %v2673_v63, 0.0  ;;  %3892 = vlog2.f32 %v2556_v23  ;;  %v2554_v52 = vpop.xlane.xlu1 %2553 }
 0x358   : > { %2737 = vst [vmem:[%s4850_s10] sm:$0xff] %v2705_v49  ;;  %3894 = vlog2.f32 %v2554_v52 }
 0x359   : > { %v3889_v62 = vpop.eup %3888 }
 0x35a   : > { %v2616_v18 = vmul.f32 0.6931472, %v3889_v62 }
 0x35c   : > { %v2676_v36 = vsub.f32 %v4662_v43, %v2616_v18 }
 0x35d   : > { %v3891_v40 = vpop.eup %3890 }
 0x35e   : > { %v2708_v12 = vsel %vm2320_vm0, %v2676_v36, 0.0  ;;  %v2614_v61 = vmul.f32 0.6931472, %v3891_v40  ;;  %v2560_v55 = vpop.xlane.xlu0 %2559 }
 0x35f   : > { %2740 = vst [vmem:[%s4850_s10 + $0x18] sm:$0xff] %v2708_v12  ;;  %3896 = vlog2.f32 %v2560_v55  ;;  %v2558_v25 = vpop.xlane.xlu1 %2557 }
 0x360   : > { %v2675_v58 = vsub.f32 %v4666_v20, %v2614_v61  ;;  %3898 = vlog2.f32 %v2558_v25 }
 0x361   : > { %v3893_v44 = vpop.eup %3892 }
 0x362   : > { %v3895_v5 = vpop.eup %3894  ;;  %v2707_v29 = vsel %vm2320_vm0, %v2675_v58, 0.0  ;;  %v2620_v43 = vmul.f32 0.6931472, %v3893_v44 }
 0x363   : > { %2739 = vst [vmem:[%s4850_s10 + $0x10] sm:$0xff] %v2707_v29  ;;  %v2618_v15 = vmul.f32 0.6931472, %v3895_v5 }
 0x364   : > { %v2678_v38 = vsub.f32 %v4672_v53, %v2620_v43 }
 0x365   : > { %v2677_v56 = vsub.f32 %v4677_v27, %v2618_v15 }
 0x366   : > { %v2710_v57 = vsel %vm2320_vm0, %v2678_v38, 0.0  ;;  %v2564_v28 = vpop.xlane.xlu0 %2563 }
 0x367   : > { %2742 = vst [vmem:[%s4850_s10 + $0x28] sm:$0xff] %v2710_v57  ;;  %v2709_v20 = vsel %vm2320_vm0, %v2677_v56, 0.0  ;;  %3900 = vlog2.f32 %v2564_v28  ;;  %v2562_v26 = vpop.xlane.xlu1 %2561 }
 0x368   : > { %2741 = vst [vmem:[%s4850_s10 + $0x20] sm:$0xff] %v2709_v20  ;;  %3902 = vlog2.f32 %v2562_v26 }
 0x369   : > { %v3897_v9 = vpop.eup %3896 }
 0x36a   : > { %v3899_v22 = vpop.eup %3898  ;;  %v2624_v10 = vmul.f32 0.6931472, %v3897_v9 }
 0x36b   : > { %v2622_v53 = vmul.f32 0.6931472, %v3899_v22 }
 0x36c   : > { %v2680_v27 = vsub.f32 %v4684_v4, %v2624_v10 }
 0x36d   : > { %v2679_v37 = vsub.f32 %v4687_v32, %v2622_v53 }
 0x36e   : > { %v2712_v30 = vsel %vm2320_vm0, %v2680_v27, 0.0  ;;  %v2568_v1 = vpop.xlane.xlu0 %2567 }
 0x36f   : > { %2744 = vst [vmem:[%s4850_s10 + $0x38] sm:$0xff] %v2712_v30  ;;  %v2711_v33 = vsel %vm2320_vm0, %v2679_v37, 0.0  ;;  %3904 = vlog2.f32 %v2568_v1  ;;  %v2566_v50 = vpop.xlane.xlu1 %2565 }
 0x370   : > { %2743 = vst [vmem:[%s4850_s10 + $0x30] sm:$0xff] %v2711_v33  ;;  %3906 = vlog2.f32 %v2566_v50 }
 0x371   : > { %v3901_v41 = vpop.eup %3900 }
 0x372   : > { %v3903_v11 = vpop.eup %3902  ;;  %v2628_v63 = vmul.f32 0.6931472, %v3901_v41 }
 0x373   : > { %v2626_v4 = vmul.f32 0.6931472, %v3903_v11 }
 0x374   : > { %v2682_v32 = vsub.f32 %v4696_v42, %v2628_v63 }
 0x375   : > { %v2681_v51 = vsub.f32 %v4701_v6, %v2626_v4 }
 0x376   : > { %v2714_v23 = vsel %vm2320_vm0, %v2682_v32, 0.0  ;;  %v2572_v49 = vpop.xlane.xlu0 %2571 }
 0x377   : > { %2746 = vst [vmem:[%s4850_s10 + $0x48] sm:$0xff] %v2714_v23  ;;  %v2713_v52 = vsel %vm2320_vm0, %v2681_v51, 0.0  ;;  %3908 = vlog2.f32 %v2572_v49  ;;  %v2570_v62 = vpop.xlane.xlu1 %2569 }
 0x378   : > { %2745 = vst [vmem:[%s4850_s10 + $0x40] sm:$0xff] %v2713_v52  ;;  %3910 = vlog2.f32 %v2570_v62 }
 0x379   : > { %v3905_v18 = vpop.eup %3904 }
 0x37a   : > { %v3907_v36 = vpop.eup %3906  ;;  %v2632_v40 = vmul.f32 0.6931472, %v3905_v18 }
 0x37b   : > { %v2630_v42 = vmul.f32 0.6931472, %v3907_v36 }
 0x37c   : > { %v2684_v6 = vsub.f32 %v4708_v17, %v2632_v40 }
 0x37d   : > { %v2683_v12 = vsub.f32 %v4713_v54, %v2630_v42 }
 0x37e   : > { %v2716_v61 = vsel %vm2320_vm0, %v2684_v6, 0.0  ;;  %v2576_v55 = vpop.xlane.xlu0 %2575 }
 0x37f   : > { %2748 = vst [vmem:[%s4850_s10 + $0x58] sm:$0xff] %v2716_v61  ;;  %v2715_v25 = vsel %vm2320_vm0, %v2683_v12, 0.0  ;;  %3912 = vlog2.f32 %v2576_v55  ;;  %v2574_v58 = vpop.xlane.xlu1 %2573 }
 0x380   : > { %2747 = vst [vmem:[%s4850_s10 + $0x50] sm:$0xff] %v2715_v25  ;;  %3914 = vlog2.f32 %v2574_v58 }
 0x381   : > { %v3909_v44 = vpop.eup %3908 }
 0x382   : > { %v3911_v5 = vpop.eup %3910  ;;  %v2636_v29 = vmul.f32 0.6931472, %v3909_v44 }
 0x383   : > { %v2634_v17 = vmul.f32 0.6931472, %v3911_v5 }
 0x384   : > { %v2686_v54 = vsub.f32 %v4720_v2, %v2636_v29 }
 0x385   : > { %v2685_v43 = vsub.f32 %v4725_v8, %v2634_v17 }
 0x386   : > { %v2718_v15 = vsel %vm2320_vm0, %v2686_v54, 0.0  ;;  %v2580_v38 = vpop.xlane.xlu0 %2579 }
 0x387   : > { %2750 = vst [vmem:[%s4850_s10 + $0x68] sm:$0xff] %v2718_v15  ;;  %v2717_v56 = vsel %vm2320_vm0, %v2685_v43, 0.0  ;;  %3916 = vlog2.f32 %v2580_v38  ;;  %v2578_v57 = vpop.xlane.xlu1 %2577 }
 0x388   : > { %2749 = vst [vmem:[%s4850_s10 + $0x60] sm:$0xff] %v2717_v56  ;;  %3918 = vlog2.f32 %v2578_v57 }
 0x389   : > { %v3913_v28 = vpop.eup %3912 }
 0x38a   : > { %v3915_v20 = vpop.eup %3914  ;;  %v2640_v26 = vmul.f32 0.6931472, %v3913_v28 }
 0x38b   : > { %v2638_v2 = vmul.f32 0.6931472, %v3915_v20 }
 0x38c   : > { %v2688_v8 = vsub.f32 %v4732_v13, %v2640_v26 }
 0x38d   : > { %v2687_v9 = vsub.f32 %v4737_v16, %v2638_v2 }
 0x38e   : > { %v2720_v22 = vsel %vm2320_vm0, %v2688_v8, 0.0  ;;  %v2584_v10 = vpop.xlane.xlu0 %2583 }
 0x38f   : > { %2752 = vst [vmem:[%s4850_s10 + $0x78] sm:$0xff] %v2720_v22  ;;  %v2719_v53 = vsel %vm2320_vm0, %v2687_v9, 0.0  ;;  %3920 = vlog2.f32 %v2584_v10  ;;  %v2582_v27 = vpop.xlane.xlu1 %2581 }
 0x390   : > { %2751 = vst [vmem:[%s4850_s10 + $0x70] sm:$0xff] %v2719_v53  ;;  %3922 = vlog2.f32 %v2582_v27 }
 0x391   : > { %v3917_v37 = vpop.eup %3916 }
 0x392   : > { %v3919_v30 = vpop.eup %3918  ;;  %v2644_v1 = vmul.f32 0.6931472, %v3917_v37 }
 0x393   : > { %v2642_v13 = vmul.f32 0.6931472, %v3919_v30 }
 0x394   : > { %v2690_v16 = vsub.f32 %v4744_v59, %v2644_v1 }
 0x395   : > { %v2689_v33 = vsub.f32 %v4749_v14, %v2642_v13 }
 0x396   : > { %v2722_v50 = vsel %vm2320_vm0, %v2690_v16, 0.0  ;;  %v2588_v41 = vpop.xlane.xlu0 %2587 }
 0x397   : > { %2754 = vst [vmem:[%s4850_s10 + $0x88] sm:$0xff] %v2722_v50  ;;  %v2721_v11 = vsel %vm2320_vm0, %v2689_v33, 0.0  ;;  %3924 = vlog2.f32 %v2588_v41  ;;  %v2586_v63 = vpop.xlane.xlu1 %2585 }
 0x398   : > { %2753 = vst [vmem:[%s4850_s10 + $0x80] sm:$0xff] %v2721_v11  ;;  %3926 = vlog2.f32 %v2586_v63 }
 0x399   : > { %v3921_v4 = vpop.eup %3920 }
 0x39a   : > { %v3923_v32 = vpop.eup %3922  ;;  %v2648_v51 = vmul.f32 0.6931472, %v3921_v4 }
 0x39b   : > { %v2646_v59 = vmul.f32 0.6931472, %v3923_v32 }
 0x39c   : > { %v2692_v14 = vsub.f32 %v4756_v21, %v2648_v51 }
 0x39d   : > { %v2691_v23 = vsub.f32 %v4761_v24, %v2646_v59 }
 0x39e   : > { %v2724_v49 = vsel %vm2320_vm0, %v2692_v14, 0.0  ;;  %v2592_v52 = vpop.xlane.xlu0 %2591 }
 0x39f   : > { %2756 = vst [vmem:[%s4850_s10 + $0x98] sm:$0xff] %v2724_v49  ;;  %v2723_v62 = vsel %vm2320_vm0, %v2691_v23, 0.0  ;;  %3928 = vlog2.f32 %v2592_v52  ;;  %v2590_v18 = vpop.xlane.xlu1 %2589 }
 0x3a0   : > { %2755 = vst [vmem:[%s4850_s10 + $0x90] sm:$0xff] %v2723_v62  ;;  %3930 = vlog2.f32 %v2590_v18 }
 0x3a1   : > { %v3925_v36 = vpop.eup %3924 }
 0x3a2   : > { %v3927_v40 = vpop.eup %3926  ;;  %v2652_v42 = vmul.f32 0.6931472, %v3925_v36 }
 0x3a3   : > { %v2650_v21 = vmul.f32 0.6931472, %v3927_v40 }
 0x3a4   : > { %v2694_v24 = vsub.f32 %v4768_v47, %v2652_v42 }
 0x3a5   : > { %v2693_v6 = vsub.f32 %v4773_v45, %v2650_v21 }
 0x3a6   : > { %v2726_v12 = vsel %vm2320_vm0, %v2694_v24, 0.0  ;;  %v2596_v61 = vpop.xlane.xlu0 %2595 }
 0x3a7   : > { %2758 = vst [vmem:[%s4850_s10 + $0xa8] sm:$0xff] %v2726_v12  ;;  %v2725_v55 = vsel %vm2320_vm0, %v2693_v6, 0.0  ;;  %3932 = vlog2.f32 %v2596_v61  ;;  %v2594_v25 = vpop.xlane.xlu1 %2593 }
 0x3a8   : > { %2757 = vst [vmem:[%s4850_s10 + $0xa0] sm:$0xff] %v2725_v55  ;;  %3934 = vlog2.f32 %v2594_v25 }
 0x3a9   : > { %v3929_v58 = vpop.eup %3928 }
 0x3aa   : > { %v3931_v44 = vpop.eup %3930  ;;  %v2656_v5 = vmul.f32 0.6931472, %v3929_v58 }
 0x3ab   : > { %v2654_v47 = vmul.f32 0.6931472, %v3931_v44 }
 0x3ac   : > { %v2696_v45 = vsub.f32 %v4780_v0, %v2656_v5 }
 0x3ad   : > { %v2695_v29 = vsub.f32 %v4785_v35, %v2654_v47 }
 0x3ae   : > { %v2728_v17 = vsel %vm2320_vm0, %v2696_v45, 0.0  ;;  %v2600_v54 = vpop.xlane.xlu0 %2599 }
 0x3af   : > { %2760 = vst [vmem:[%s4850_s10 + $0xb8] sm:$0xff] %v2728_v17  ;;  %v2727_v43 = vsel %vm2320_vm0, %v2695_v29, 0.0  ;;  %3936 = vlog2.f32 %v2600_v54  ;;  %v2598_v15 = vpop.xlane.xlu1 %2597 }
 0x3b0   : > { %2759 = vst [vmem:[%s4850_s10 + $0xb0] sm:$0xff] %v2727_v43  ;;  %3938 = vlog2.f32 %v2598_v15 }
 0x3b1   : > { %v3933_v38 = vpop.eup %3932 }
 0x3b2   : > { %v3935_v56 = vpop.eup %3934  ;;  %v2660_v57 = vmul.f32 0.6931472, %v3933_v38 }
 0x3b3   : > { %v2658_v0 = vmul.f32 0.6931472, %v3935_v56 }
 0x3b4   : > { %v2698_v35 = vsub.f32 %v4792_v39, %v2660_v57 }
 0x3b5   : > { %v2697_v28 = vsub.f32 %v4797_v46, %v2658_v0 }
 0x3b6   : > { %v2730_v20 = vsel %vm2320_vm0, %v2698_v35, 0.0  ;;  %v2604_v26 = vpop.xlane.xlu0 %2603 }
 0x3b7   : > { %2762 = vst [vmem:[%s4850_s10 + $0xc8] sm:$0xff] %v2730_v20  ;;  %v2729_v2 = vsel %vm2320_vm0, %v2697_v28, 0.0  ;;  %3940 = vlog2.f32 %v2604_v26  ;;  %v2602_v8 = vpop.xlane.xlu1 %2601 }
 0x3b8   : > { %2761 = vst [vmem:[%s4850_s10 + $0xc0] sm:$0xff] %v2729_v2  ;;  %3942 = vlog2.f32 %v2602_v8 }
 0x3b9   : > { %v3937_v9 = vpop.eup %3936 }
 0x3ba   : > { %v3939_v22 = vpop.eup %3938  ;;  %v2664_v10 = vmul.f32 0.6931472, %v3937_v9 }
 0x3bb   : > { %v2662_v39 = vmul.f32 0.6931472, %v3939_v22 }
 0x3bc   : > { %v2700_v46 = vsub.f32 %v4804_v7, %v2664_v10 }
 0x3bd   : > { %v2699_v53 = vsub.f32 %v4809_v34, %v2662_v39 }
 0x3be   : > { %v2732_v27 = vsel %vm2320_vm0, %v2700_v46, 0.0  ;;  %v2608_v37 = vpop.xlane.xlu0 %2607 }
 0x3bf   : > { %2764 = vst [vmem:[%s4850_s10 + $0xd8] sm:$0xff] %v2732_v27  ;;  %v2731_v30 = vsel %vm2320_vm0, %v2699_v53, 0.0  ;;  %3944 = vlog2.f32 %v2608_v37  ;;  %v2606_v1 = vpop.xlane.xlu1 %2605 }
 0x3c0   : > { %2763 = vst [vmem:[%s4850_s10 + $0xd0] sm:$0xff] %v2731_v30  ;;  %3946 = vlog2.f32 %v2606_v1 }
 0x3c1   : > { %v3941_v13 = vpop.eup %3940 }
 0x3c2   : > { %v3943_v16 = vpop.eup %3942  ;;  %v2668_v7 = vmul.f32 0.6931472, %v3941_v13 }
 0x3c3   : > { %v2666_v33 = vmul.f32 0.6931472, %v3943_v16 }
 0x3c4   : > { %v2702_v34 = vsub.f32 %v4816_v19, %v2668_v7 }
 0x3c5   : > { %v2701_v50 = vsub.f32 %v4821_v60, %v2666_v33 }
 0x3c6   : > { %v2734_v41 = vsel %vm2320_vm0, %v2702_v34, 0.0 }
 0x3c7   : > { %2766 = vst [vmem:[%s4850_s10 + $0xe8] sm:$0xff] %v2734_v41  ;;  %v2733_v11 = vsel %vm2320_vm0, %v2701_v50, 0.0 }
 0x3c8   : > { %2765 = vst [vmem:[%s4850_s10 + $0xe0] sm:$0xff] %v2733_v11 }
 0x3c9   : > { %v3945_v63 = vpop.eup %3944 }
 0x3ca   : > { %v3947_v4 = vpop.eup %3946  ;;  %v2672_v32 = vmul.f32 0.6931472, %v3945_v63 }
 0x3cb   : > { %v2670_v51 = vmul.f32 0.6931472, %v3947_v4 }
 0x3cc   : > { %v2704_v59 = vsub.f32 %v4828_v31, %v2672_v32 }
 0x3cd   : > { %v2703_v14 = vsub.f32 %v4833_v3, %v2670_v51 }
 0x3ce   : > { %v2736_v19 = vsel %vm2320_vm0, %v2704_v59, 0.0 }
 0x3cf   : > { %2768 = vst [vmem:[%s4850_s10 + $0xf8] sm:$0xff] %v2736_v19  ;;  %v2735_v60 = vsel %vm2320_vm0, %v2703_v14, 0.0 }
 0x3d0   : > { %2767 = vst [vmem:[%s4850_s10 + $0xf0] sm:$0xff] %v2735_v60 }
 0x3d1 PF: > { %s17_s26 = sadd.s32 1, %s3970_s26   ;;  %s4997_s24 = smov %s3966_s25 }
 0x3d2   : > { %p14_p5 = scmp.ge.s32.totalorder %s17_s26, 4   ;;  %s4998_s25 = smov %s5000_s27 }
 0x3d4   :  { %16 = sbr.rel (!%p14_p5) target bundleno = 2 (0x2), region = 95 }

</bundles_post_ra>
